<compile_context>
chip_gen: v6e
topology: v6e:2x2x1
jax: 0.10.0
libtpu: 0.0.40
codegen_flags: <defaults>
</compile_context>

<pallas_src>
import numpy as np
import jax
import jax.numpy as jnp
from jax import lax
from jax.experimental import pallas as pl
from jax.experimental.pallas import tpu as pltpu


def _mlp_kernel(x_ref,
                w1_ref, b1_ref,
                w2_ref, b2_ref,
                w3_ref, b3_ref,
                w4_ref, b4_ref,
                w5_ref, b5_ref,
                w6_ref, b6_ref,
                o_ref):
    """Fused forward pass for one batch tile."""

    def linear_relu(h, w_ref, b_ref):
        # bf16 x bf16 matmul, f32 accumulation, f32 bias + ReLU, back to bf16.
        y = jnp.dot(h, w_ref[...], preferred_element_type=jnp.float32)
        y = jnp.maximum(y + b_ref[...], 0.0)
        return y.astype(jnp.bfloat16)

    h = x_ref[...]                               # already bf16 (pre-cast outside)
    h = linear_relu(h, w1_ref, b1_ref)           # L    -> 4L
    h = linear_relu(h, w2_ref, b2_ref)           # 4L   -> 8L
    h = linear_relu(h, w3_ref, b3_ref)           # 8L   -> 32L
    h = linear_relu(h, w4_ref, b4_ref)           # 32L  -> 4L
    h = linear_relu(h, w5_ref, b5_ref)           # 4L   -> 2L

    # Final layer (2L -> 1): contract w6 (1, 2L) against h (tile, 2L) on the
    # shared last dim -> (1, tile). Batch lands on lanes, so the output store
    # is a dense >=128-wide row instead of a (tile, 1) masked store.
    y = lax.dot_general(w6_ref[...], h,
                        dimension_numbers=(((1,), (1,)), ((), ())),
                        preferred_element_type=jnp.float32)
    o_ref[...] = y + b6_ref[...]                 # b6 is (1, 1), broadcasts


def prepare_params(params):
    """Hoisted (one-time) weight prep: transpose the final layer and cast to bf16.

    params: list of (W, b), W:(in, out) f32, b:(1, out) f32.
    Returns a tuple of (W_bf16, b_f32) pairs ready for mymodel_forward.
    """
    n_layers = len(params)
    prepared = []
    for li, (w, b) in enumerate(params):
        if li == n_layers - 1:
            w = w.T                               # (1, 2L) row for the final layer
        prepared.append((jnp.asarray(w, jnp.bfloat16), jnp.asarray(b, jnp.float32)))
    return tuple(prepared)


def _const_block_spec(shape):
    """Whole-array, constant-index (resident) block; single-buffered when supported."""
    try:
        return pl.BlockSpec(shape, lambda i: (0, 0), pipeline_mode=pl.Buffered(1))
    except TypeError:
        return pl.BlockSpec(shape, lambda i: (0, 0))


def _choose_batch_tile(B):
    # Round batch up to a lane-dense multiple of 128, cap the tile at 256
    # (fills the 256-row MXU on v6e/v7x; 128-row MXU on v5e is already full).
    b128 = 128 * pl.cdiv(B, 128)
    return int(min(256, b128))


def mymodel_forward(x, prepared_params, *, batch_tile=None):
    """x: (B, length) f32/bf16. prepared_params: output of prepare_params().

    Returns (B, 1) f32.
    """
    B, length = x.shape
    if batch_tile is None:
        batch_tile = _choose_batch_tile(B)
    assert batch_tile % 128 == 0, "batch_tile must be a multiple of 128"

    num_tiles = pl.cdiv(B, batch_tile)
    b_pad = num_tiles * batch_tile
    if b_pad != B:
        x = jnp.pad(x, ((0, b_pad - B), (0, 0)))  # zero-pad; padded rows sliced off
    x = x.astype(jnp.bfloat16)                    # halve the per-step x DMA

    # x is tiled over batch; weights/biases are whole-array, constant-index
    # blocks (fetched once, resident and single-buffered across the grid).
    # TODO(synk): on v7x (64 MiB VMEM) at length >= ~192, K-tile W3 (8Lx32L)
    # and W4 (32Lx4L) via an inner pltpu.emit_pipeline instead of holding them
    # whole-array resident.
    in_specs = [pl.BlockSpec((batch_tile, length), lambda i: (i, 0))]
    flat_args = [x]
    weight_bytes = 0
    for (w, b) in prepared_params:
        in_specs.append(_const_block_spec(w.shape))
        in_specs.append(_const_block_spec(b.shape))
        flat_args += [w, b]
        weight_bytes += w.size * w.dtype.itemsize + b.size * b.dtype.itemsize

    # Lane-dense output: one >=128-wide row chunk per grid step.
    out_specs = pl.BlockSpec((1, batch_tile), lambda i: (0, i))

    # Explicit VMEM budget: resident weights (single-buffered) + generous
    # activation slab headroom + double-buffered x/out tiles.
    act_bytes = 3 * batch_tile * (32 * length) * 4
    io_bytes = 2 * (batch_tile * length * 2 + batch_tile * 4)
    vmem_limit = int(weight_bytes + act_bytes + io_bytes + (8 << 20))
    vmem_limit = int(min(max(vmem_limit, 32 << 20), 100 << 20))

    out = pl.pallas_call(
        _mlp_kernel,
        out_shape=jax.ShapeDtypeStruct((1, b_pad), jnp.float32),
        grid=(num_tiles,),
        in_specs=in_specs,
        out_specs=out_specs,
        compiler_params=pltpu.CompilerParams(
            dimension_semantics=("parallel",),
            vmem_limit_bytes=vmem_limit),
    )(*flat_args)

    return out.reshape(b_pad, 1)[:B]


def init_params(length, key):
    """Deterministic init matching PyTorch nn.Linear shapes (stored transposed)."""
    dims = [length, 4 * length, 8 * length, 32 * length, 4 * length, 2 * length, 1]
    params = []
    for i in range(len(dims) - 1):
        fan_in, fan_out = dims[i], dims[i + 1]
        key, kw, kb = jax.random.split(key, 3)
        bound = 1.0 / np.sqrt(fan_in)
        w = jax.random.uniform(kw, (fan_in, fan_out), jnp.float32, -bound, bound)
        b = jax.random.uniform(kb, (1, fan_out), jnp.float32, -bound, bound)
        params.append((w, b))
    return params


def reference_forward(x, params):
    h = x
    for i, (w, b) in enumerate(params):
        h = h @ w + b
        if i < len(params) - 1:
            h = jnp.maximum(h, 0.0)
    return h


if __name__ == "__main__":
    length = 32
    batch = 512     # 2 grid steps of batch_tile=256 (exercises both TCs on v7x)

    key = jax.random.PRNGKey(0)
    key, kx = jax.random.split(key)
    x = jax.random.normal(kx, (batch, length), jnp.float32)
    params = init_params(length, key)

    # One-time weight prep outside the hot path; forward is jitted.
    prepared = prepare_params(params)
    fwd = jax.jit(mymodel_forward)

    out = jax.block_until_ready(fwd(x, prepared))
    ref = reference_forward(x, params)

    assert out.shape == (batch, 1), out.shape
    # bf16 matmuls with f32 accumulation vs pure-f32 reference -> loose tolerance.
    assert jnp.allclose(out, ref, atol=5e-2, rtol=5e-2), \
        float(jnp.max(jnp.abs(out - ref)))

    print("KERNEL_OK")
</pallas_src>

<mosaic_0001>
module attributes {stable_mosaic.version = 11 : i64} {
  func.func @_mlp_kernel(%arg0: i32, %arg1: memref<256x32xbf16, #tpu.memory_space<vmem>>, %arg2: memref<32x128xbf16, #tpu.memory_space<vmem>>, %arg3: memref<1x128xf32, #tpu.memory_space<vmem>>, %arg4: memref<128x256xbf16, #tpu.memory_space<vmem>>, %arg5: memref<1x256xf32, #tpu.memory_space<vmem>>, %arg6: memref<256x1024xbf16, #tpu.memory_space<vmem>>, %arg7: memref<1x1024xf32, #tpu.memory_space<vmem>>, %arg8: memref<1024x128xbf16, #tpu.memory_space<vmem>>, %arg9: memref<1x128xf32, #tpu.memory_space<vmem>>, %arg10: memref<128x64xbf16, #tpu.memory_space<vmem>>, %arg11: memref<1x64xf32, #tpu.memory_space<vmem>>, %arg12: memref<1x64xbf16, #tpu.memory_space<vmem>>, %arg13: memref<1x1xf32, #tpu.memory_space<vmem>>, %arg14: memref<1x256xf32, #tpu.memory_space<vmem>>) attributes {dimension_semantics = [#tpu.dimension_semantics<parallel>], iteration_bounds = array<i64: 2>, scalar_prefetch = 0 : i64, scratch_operands = 0 : i64, tpu.core_type = #tpu.core_type<tc>, window_params = [{transform_indices = @transform_0, window_bounds = array<i64: 256, 32>}, {pipeline_mode = #tpu.pipeline_mode<synchronous>, transform_indices = @transform_1, window_bounds = array<i64: 32, 128>}, {pipeline_mode = #tpu.pipeline_mode<synchronous>, transform_indices = @transform_2, window_bounds = array<i64: 1, 128>}, {pipeline_mode = #tpu.pipeline_mode<synchronous>, transform_indices = @transform_3, window_bounds = array<i64: 128, 256>}, {pipeline_mode = #tpu.pipeline_mode<synchronous>, transform_indices = @transform_4, window_bounds = array<i64: 1, 256>}, {pipeline_mode = #tpu.pipeline_mode<synchronous>, transform_indices = @transform_5, window_bounds = array<i64: 256, 1024>}, {pipeline_mode = #tpu.pipeline_mode<synchronous>, transform_indices = @transform_6, window_bounds = array<i64: 1, 1024>}, {pipeline_mode = #tpu.pipeline_mode<synchronous>, transform_indices = @transform_7, window_bounds = array<i64: 1024, 128>}, {pipeline_mode = #tpu.pipeline_mode<synchronous>, transform_indices = @transform_8, window_bounds = array<i64: 1, 128>}, {pipeline_mode = #tpu.pipeline_mode<synchronous>, transform_indices = @transform_9, window_bounds = array<i64: 128, 64>}, {pipeline_mode = #tpu.pipeline_mode<synchronous>, transform_indices = @transform_10, window_bounds = array<i64: 1, 64>}, {pipeline_mode = #tpu.pipeline_mode<synchronous>, transform_indices = @transform_11, window_bounds = array<i64: 1, 64>}, {pipeline_mode = #tpu.pipeline_mode<synchronous>, transform_indices = @transform_12, window_bounds = array<i64: 1, 1>}, {transform_indices = @transform_13, window_bounds = array<i64: 1, 256>}]} {
    %c0 = arith.constant 0 : index
    %c0_0 = arith.constant 0 : index
    %0 = vector.load %arg1[%c0, %c0_0] : memref<256x32xbf16, #tpu.memory_space<vmem>>, vector<256x32xbf16>
    %c0_1 = arith.constant 0 : index
    %c0_2 = arith.constant 0 : index
    %1 = vector.load %arg2[%c0_1, %c0_2] : memref<32x128xbf16, #tpu.memory_space<vmem>>, vector<32x128xbf16>
    %cst = arith.constant dense<0.000000e+00> : vector<256x128xf32>
    %2 = tpu.matmul %0, %1, %cst {dimension_numbers = #tpu.dot_dimension_numbers<[1], [0], [0], [1], [0, 0, 1, 1], [], []>} : vector<256x32xbf16>, vector<32x128xbf16>, vector<256x128xf32> -> vector<256x128xf32>
    %c0_3 = arith.constant 0 : index
    %c0_4 = arith.constant 0 : index
    %3 = vector.load %arg3[%c0_3, %c0_4] : memref<1x128xf32, #tpu.memory_space<vmem>>, vector<1x128xf32>
    %4 = vector.broadcast %3 : vector<1x128xf32> to vector<256x128xf32>
    %5 = arith.addf %2, %4 : vector<256x128xf32>
    %cst_5 = arith.constant 0.000000e+00 : f32
    %6 = vector.broadcast %cst_5 : f32 to vector<256x128xf32>
    %7 = arith.maximumf %5, %6 : vector<256x128xf32>
    %8 = arith.truncf %7 : vector<256x128xf32> to vector<256x128xbf16>
    %c0_6 = arith.constant 0 : index
    %c0_7 = arith.constant 0 : index
    %9 = vector.load %arg4[%c0_6, %c0_7] : memref<128x256xbf16, #tpu.memory_space<vmem>>, vector<128x256xbf16>
    %cst_8 = arith.constant dense<0.000000e+00> : vector<256x256xf32>
    %10 = tpu.matmul %8, %9, %cst_8 {dimension_numbers = #tpu.dot_dimension_numbers<[1], [0], [0], [1], [0, 0, 1, 1], [], []>} : vector<256x128xbf16>, vector<128x256xbf16>, vector<256x256xf32> -> vector<256x256xf32>
    %c0_9 = arith.constant 0 : index
    %c0_10 = arith.constant 0 : index
    %11 = vector.load %arg5[%c0_9, %c0_10] : memref<1x256xf32, #tpu.memory_space<vmem>>, vector<1x256xf32>
    %12 = vector.broadcast %11 : vector<1x256xf32> to vector<256x256xf32>
    %13 = arith.addf %10, %12 : vector<256x256xf32>
    %cst_11 = arith.constant 0.000000e+00 : f32
    %14 = vector.broadcast %cst_11 : f32 to vector<256x256xf32>
    %15 = arith.maximumf %13, %14 : vector<256x256xf32>
    %16 = arith.truncf %15 : vector<256x256xf32> to vector<256x256xbf16>
    %c0_12 = arith.constant 0 : index
    %c0_13 = arith.constant 0 : index
    %17 = vector.load %arg6[%c0_12, %c0_13] : memref<256x1024xbf16, #tpu.memory_space<vmem>>, vector<256x1024xbf16>
    %cst_14 = arith.constant dense<0.000000e+00> : vector<256x1024xf32>
    %18 = tpu.matmul %16, %17, %cst_14 {dimension_numbers = #tpu.dot_dimension_numbers<[1], [0], [0], [1], [0, 0, 1, 1], [], []>} : vector<256x256xbf16>, vector<256x1024xbf16>, vector<256x1024xf32> -> vector<256x1024xf32>
    %c0_15 = arith.constant 0 : index
    %c0_16 = arith.constant 0 : index
    %19 = vector.load %arg7[%c0_15, %c0_16] : memref<1x1024xf32, #tpu.memory_space<vmem>>, vector<1x1024xf32>
    %20 = vector.broadcast %19 : vector<1x1024xf32> to vector<256x1024xf32>
    %21 = arith.addf %18, %20 : vector<256x1024xf32>
    %cst_17 = arith.constant 0.000000e+00 : f32
    %22 = vector.broadcast %cst_17 : f32 to vector<256x1024xf32>
    %23 = arith.maximumf %21, %22 : vector<256x1024xf32>
    %24 = arith.truncf %23 : vector<256x1024xf32> to vector<256x1024xbf16>
    %c0_18 = arith.constant 0 : index
    %c0_19 = arith.constant 0 : index
    %25 = vector.load %arg8[%c0_18, %c0_19] : memref<1024x128xbf16, #tpu.memory_space<vmem>>, vector<1024x128xbf16>
    %cst_20 = arith.constant dense<0.000000e+00> : vector<256x128xf32>
    %26 = tpu.matmul %24, %25, %cst_20 {dimension_numbers = #tpu.dot_dimension_numbers<[1], [0], [0], [1], [0, 0, 1, 1], [], []>} : vector<256x1024xbf16>, vector<1024x128xbf16>, vector<256x128xf32> -> vector<256x128xf32>
    %c0_21 = arith.constant 0 : index
    %c0_22 = arith.constant 0 : index
    %27 = vector.load %arg9[%c0_21, %c0_22] : memref<1x128xf32, #tpu.memory_space<vmem>>, vector<1x128xf32>
    %28 = vector.broadcast %27 : vector<1x128xf32> to vector<256x128xf32>
    %29 = arith.addf %26, %28 : vector<256x128xf32>
    %cst_23 = arith.constant 0.000000e+00 : f32
    %30 = vector.broadcast %cst_23 : f32 to vector<256x128xf32>
    %31 = arith.maximumf %29, %30 : vector<256x128xf32>
    %32 = arith.truncf %31 : vector<256x128xf32> to vector<256x128xbf16>
    %c0_24 = arith.constant 0 : index
    %c0_25 = arith.constant 0 : index
    %33 = vector.load %arg10[%c0_24, %c0_25] : memref<128x64xbf16, #tpu.memory_space<vmem>>, vector<128x64xbf16>
    %cst_26 = arith.constant dense<0.000000e+00> : vector<256x64xf32>
    %34 = tpu.matmul %32, %33, %cst_26 {dimension_numbers = #tpu.dot_dimension_numbers<[1], [0], [0], [1], [0, 0, 1, 1], [], []>} : vector<256x128xbf16>, vector<128x64xbf16>, vector<256x64xf32> -> vector<256x64xf32>
    %c0_27 = arith.constant 0 : index
    %c0_28 = arith.constant 0 : index
    %35 = vector.load %arg11[%c0_27, %c0_28] : memref<1x64xf32, #tpu.memory_space<vmem>>, vector<1x64xf32>
    %36 = vector.broadcast %35 : vector<1x64xf32> to vector<256x64xf32>
    %37 = arith.addf %34, %36 : vector<256x64xf32>
    %cst_29 = arith.constant 0.000000e+00 : f32
    %38 = vector.broadcast %cst_29 : f32 to vector<256x64xf32>
    %39 = arith.maximumf %37, %38 : vector<256x64xf32>
    %40 = arith.truncf %39 : vector<256x64xf32> to vector<256x64xbf16>
    %c0_30 = arith.constant 0 : index
    %c0_31 = arith.constant 0 : index
    %41 = vector.load %arg12[%c0_30, %c0_31] : memref<1x64xbf16, #tpu.memory_space<vmem>>, vector<1x64xbf16>
    %cst_32 = arith.constant dense<0.000000e+00> : vector<1x256xf32>
    %42 = tpu.matmul %41, %40, %cst_32 {dimension_numbers = #tpu.dot_dimension_numbers<[1], [1], [0], [0], [0, 0, 1, 0], [], []>} : vector<1x64xbf16>, vector<256x64xbf16>, vector<1x256xf32> -> vector<1x256xf32>
    %c0_33 = arith.constant 0 : index
    %c0_34 = arith.constant 0 : index
    %43 = vector.load %arg13[%c0_33, %c0_34] : memref<1x1xf32, #tpu.memory_space<vmem>>, vector<1x1xf32>
    %44 = vector.broadcast %43 : vector<1x1xf32> to vector<1x256xf32>
    %45 = arith.addf %42, %44 : vector<1x256xf32>
    %c0_35 = arith.constant 0 : index
    %c0_36 = arith.constant 0 : index
    %46 = vector.load %arg14[%c0_35, %c0_36] : memref<1x256xf32, #tpu.memory_space<vmem>>, vector<1x256xf32>
    tpu.vector_store %arg14[%c0_35, %c0_36], %45 {strides = array<i32>} : memref<1x256xf32, #tpu.memory_space<vmem>>, vector<1x256xf32>,
    return
  }
  func.func @transform_0(%arg0: i32) -> (i32, i32) {
    %c0_i32 = arith.constant 0 : i32
    %c0_i32_0 = arith.constant 0 : i32
    return %arg0, %c0_i32 : i32, i32
  }
  func.func @transform_1(%arg0: i32) -> (i32, i32) {
    %c0_i32 = arith.constant 0 : i32
    %c0_i32_0 = arith.constant 0 : i32
    %c0_i32_1 = arith.constant 0 : i32
    return %c0_i32, %c0_i32_0 : i32, i32
  }
  func.func @transform_2(%arg0: i32) -> (i32, i32) {
    %c0_i32 = arith.constant 0 : i32
    %c0_i32_0 = arith.constant 0 : i32
    %c0_i32_1 = arith.constant 0 : i32
    return %c0_i32, %c0_i32_0 : i32, i32
  }
  func.func @transform_3(%arg0: i32) -> (i32, i32) {
    %c0_i32 = arith.constant 0 : i32
    %c0_i32_0 = arith.constant 0 : i32
    %c0_i32_1 = arith.constant 0 : i32
    return %c0_i32, %c0_i32_0 : i32, i32
  }
  func.func @transform_4(%arg0: i32) -> (i32, i32) {
    %c0_i32 = arith.constant 0 : i32
    %c0_i32_0 = arith.constant 0 : i32
    %c0_i32_1 = arith.constant 0 : i32
    return %c0_i32, %c0_i32_0 : i32, i32
  }
  func.func @transform_5(%arg0: i32) -> (i32, i32) {
    %c0_i32 = arith.constant 0 : i32
    %c0_i32_0 = arith.constant 0 : i32
    %c0_i32_1 = arith.constant 0 : i32
    return %c0_i32, %c0_i32_0 : i32, i32
  }
  func.func @transform_6(%arg0: i32) -> (i32, i32) {
    %c0_i32 = arith.constant 0 : i32
    %c0_i32_0 = arith.constant 0 : i32
    %c0_i32_1 = arith.constant 0 : i32
    return %c0_i32, %c0_i32_0 : i32, i32
  }
  func.func @transform_7(%arg0: i32) -> (i32, i32) {
    %c0_i32 = arith.constant 0 : i32
    %c0_i32_0 = arith.constant 0 : i32
    %c0_i32_1 = arith.constant 0 : i32
    return %c0_i32, %c0_i32_0 : i32, i32
  }
  func.func @transform_8(%arg0: i32) -> (i32, i32) {
    %c0_i32 = arith.constant 0 : i32
    %c0_i32_0 = arith.constant 0 : i32
    %c0_i32_1 = arith.constant 0 : i32
    return %c0_i32, %c0_i32_0 : i32, i32
  }
  func.func @transform_9(%arg0: i32) -> (i32, i32) {
    %c0_i32 = arith.constant 0 : i32
    %c0_i32_0 = arith.constant 0 : i32
    %c0_i32_1 = arith.constant 0 : i32
    return %c0_i32, %c0_i32_0 : i32, i32
  }
  func.func @transform_10(%arg0: i32) -> (i32, i32) {
    %c0_i32 = arith.constant 0 : i32
    %c0_i32_0 = arith.constant 0 : i32
    %c0_i32_1 = arith.constant 0 : i32
    return %c0_i32, %c0_i32_0 : i32, i32
  }
  func.func @transform_11(%arg0: i32) -> (i32, i32) {
    %c0_i32 = arith.constant 0 : i32
    %c0_i32_0 = arith.constant 0 : i32
    %c0_i32_1 = arith.constant 0 : i32
    return %c0_i32, %c0_i32_0 : i32, i32
  }
  func.func @transform_12(%arg0: i32) -> (i32, i32) {
    %c0_i32 = arith.constant 0 : i32
    %c0_i32_0 = arith.constant 0 : i32
    %c0_i32_1 = arith.constant 0 : i32
    return %c0_i32, %c0_i32_0 : i32, i32
  }
  func.func @transform_13(%arg0: i32) -> (i32, i32) {
    %c0_i32 = arith.constant 0 : i32
    %c0_i32_0 = arith.constant 0 : i32
    return %c0_i32, %arg0 : i32, i32
  }
}

</mosaic_0001>

<bundles_post_ra>
// kernel: mymodel_forward.1
= control target key start
LH: loop header
LB: loop body
LE: loop exit
PB: predicated region body
PF: predicated region fallthrough
CT: control target
= control target key end

     0   :  { %s8233_s0 = inlined_call_operand.vmem [shape: bf16[512,32], index: 0, kind: input, shape index: {}]   ;;  %s8234_s1 = inlined_call_operand.vmem [shape: bf16[32,128], index: 1, kind: input, shape index: {}]   ;;  %s8235_s2 = inlined_call_operand.vmem [shape: f32[1,128], index: 2, kind: input, shape index: {}]   ;;  %s8236_s3 = inlined_call_operand.hbm [shape: bf16[128,256], index: 3, kind: input, shape index: {}]   ;;  %s8237_s4 = inlined_call_operand.vmem [shape: f32[1,256], index: 4, kind: input, shape index: {}]   ;;  %s8238_s5 = inlined_call_operand.hbm [shape: bf16[256,1024], index: 5, kind: input, shape index: {}]   ;;  %s8239_s6 = inlined_call_operand.vmem [shape: f32[1,1024], index: 6, kind: input, shape index: {}]   ;;  %s8240_s7 = inlined_call_operand.vmem [shape: bf16[1024,128], index: 7, kind: input, shape index: {}]   ;;  %s8241_s8 = inlined_call_operand.vmem [shape: f32[1,128], index: 8, kind: input, shape index: {}]   ;;  %s8242_s9 = inlined_call_operand.vmem [shape: bf16[128,64], index: 9, kind: input, shape index: {}]   ;;  %s8243_s10 = inlined_call_operand.vmem [shape: f32[1,64], index: 10, kind: input, shape index: {}]   ;;  %s8244_s11 = inlined_call_operand.vmem [shape: bf16[1,64], index: 11, kind: input, shape index: {}]   ;;  %s8245_s12 = inlined_call_operand.<no memory space> [shape: f32[1,1], index: 12, kind: input, shape index: {}]   ;;  %s8246_s13 = inlined_call_operand.hbm [shape: f32[1,512], index: 13, kind: output, shape index: {}]  }
   0x1   :  { %v18_v0 = vstv %s8245_s12 }
   0x2   :  { %19 = vst [vmem:[#allocation2] sm:$0x1] %v18_v0 }
   0x3   :  { %20 = vsyncpa [#allocation4], 0 }
   0x4   :  { %21 = vsyncpa [#allocation7], 0 }
   0x5   :  { %22 = vsyncpa [#allocation5], 0 }
   0x6   :  { %24 = vsyncpa [#allocation5 + $0x1], 0  ;;  %s6202_s27 = smov 0   ;;  %s6204_s28 = smov 0  }
   0x7   :  { %s6206_s29 = smov 0   ;;  %s6208_s30 = smov 0  }
   0x8 LB: > { %8257 = sst [smem:[#allocation12_spill]] %s6114_s29  ;;  %s6223_s12 = sadd.s32 4294967295, %s6118_s30   ;;  %s6118_s30 = sphi %s6208_s30, %s8369_s30   ;;  %s6114_s29 = sphi %s6206_s29, %s8371_s29   ;;  %s6110_s28 = sphi %s6204_s28, %s8373_s28   ;;  %s6106_s27 = sphi %s6202_s27, %s8372_s27  }
   0x9   : > { %s4945_s14 = sadd.s32 4294967294, %s6118_s30   ;;  %s6227_s15 = sadd.s32 1, %s6118_s30  }
   0xa   : > { %8258 = sst [smem:[#allocation13_spill]] %s6227_s15  ;;  %s315_s16 = sadd.s32 1, %s6114_s29 }
   0xb   : > { %s312_s17 = ssub.s32 %s6118_s30, %s6227_s15  ;;  %p325_p0 = scmp.ne.s32.totalorder %s6114_s29, %s6110_s28 }
   0xc   : > { %p313_p1 = scmp.eq.s32.totalorder %s312_s17, 0  ;;  %p326_p2 = scmp.eq.s32.totalorder %s6223_s12, 1 }
   0xd   : > { %p331_p3 = scmp.ne.s32.totalorder %s6110_s28, %s6106_s27  ;;  %p332_p4 = scmp.eq.s32.totalorder %s4945_s14, 1 }
   0xe   : > { %s6238_s18 = scalar_select %p313_p1, %s6114_s29, %s315_s16  }
   0xf   : > { %p6240_p5 = por %p326_p2, %p325_p0  ;;  %p6244_p6 = por %p332_p4, %p331_p3 }
  0x10   : > { %8259 = sst [smem:[#allocation14_spill]] %s6238_s18  ;;  %p4946_p7 = scmp.ge.s32.totalorder %s6118_s30, 1 }
  0x11   : > { %s8261_s20 = scalar_select %p6244_p6, 1, 0 }
  0x12   : > { %p339_p8 = scmp.lt.s32.totalorder %s6118_s30, 3  ;;  %p8247_p9 = scmp.eq.s32.totalorder %s6223_s12, 0 }
  0x13   : > { %8262 = sst [smem:[#allocation15_spill]] %s8261_s20  ;;  %s6120_s22 = smov [#allocation3]  }
  0x14   : > { %p6251_p10 = pnand %p4946_p7, %p339_p8  ;;  %s357_s23 = sshll.u32 %s6120_s22, 4  ;;  %s358_s23 = int_to_ptr.vmem [resolvable:$true] %s357_s23 }
  0x15   : > { %s6121_s25 = smov [#allocation6]   ;;  %s6009_s14 = scalar_lea.vmem %s358_s23, 2048 }
  0x16   : > { %p5826_p11 = pneg %p6251_p10  ;;  %s373_s26 = sshll.u32 %s6121_s25, 4  ;;  %s374_s26 = int_to_ptr.vmem [resolvable:$true] %s373_s26 }
  0x17   : > { %p6010_p0 = scmp.ne.s32.totalorder %s358_s23, %s6009_s14  ;;  %p6017_p3 = scmp.lt.s32.totalorder %s358_s23, %s358_s23 }
  0x18   : > { %p6259_p12 = pnand %p8247_p9, %p5826_p11  ;;  %p6018_p4 = scmp.lt.s32.totalorder %s6009_s14, %s6009_s14 }
  0x1a   : > { %p6000_p13 = pneg %p6259_p12  ;;  %p6019_p7 = por %p6018_p4, %p6017_p3 }
  0x1c   : > { %p6012_p1 = pnand %p6010_p0, %p6000_p13 }
  0x1e   : > { %p6013_p2 = pneg %p6012_p1 }
  0x20   : > { %p6020_p8 = pnand %p6019_p7, %p6013_p2 }
  0x22   : > { %6023 = shalt.err (!%p6020_p8)
}
  0x23   : > { %s6122_s16 = smov 128   ;;  %s6123_s17 = smov 8  }
  0x24   : > { %5829 = dma.hbm_to_vmem [thread:$0]  (!%p6259_p12), %s8236_s3, 2048, %s358_s23, [#allocation4], %s6122_s16, %s6122_s16, %s6123_s17  }
  0x25   : > { %s6035_s18 = scalar_lea.vmem %s374_s26, 16384  ;;  %p6043_p9 = scmp.lt.s32.totalorder %s374_s26, %s374_s26 }
  0x26   : > { %p6036_p11 = scmp.ne.s32.totalorder %s374_s26, %s6035_s18  ;;  %p6044_p6 = scmp.lt.s32.totalorder %s6035_s18, %s6035_s18 }
  0x28   : > { %p6038_p0 = pnand %p6036_p11, %p6000_p13  ;;  %p6045_p3 = por %p6044_p6, %p6043_p9 }
  0x2a   : > { %p6039_p1 = pneg %p6038_p0 }
  0x2c   : > { %p6046_p2 = pnand %p6045_p3, %p6039_p1 }
  0x2e   : > { %6049 = shalt.err (!%p6046_p2)
}
  0x2f   : > { %s6124_s14 = smov 512   ;;  %s6125_s29 = smov 32  }
  0x30   : > { %5832 = dma.hbm_to_vmem [thread:$0]  (!%p6259_p12), %s8238_s5, 16384, %s374_s26, [#allocation7], %s6124_s14, %s6124_s14, %s6125_s29  }
  0x31   : > { %419 = sbr.rel (%p6251_p10) target bundleno = 1676 (0x68c), region = 72 }
  0x36   : > { %p8265_p4 = scmp.eq.s32.totalorder %s6223_s12, 0 }
  0x38   : > { %6093 = dma.done.wait (%p8265_p4), [#allocation4], 2048   ;;  %p8266_p13 = pmov %p8265_p4 }
  0x39   : > { %p8267_p6 = pmov %p8265_p4 }
  0x3a   : > { %6095 = vsyncadd (%p8266_p13), [#allocation4], 4294965248 }
  0x3b   : > { %6097 = dma.done.wait (%p8267_p6), [#allocation7], 16384   ;;  %p8268_p9 = pmov %p8265_p4 }
  0x3c   : > { %s6292_s18 = sshll.u32 %s6223_s12, 5  ;;  %v5883_v1 = vld [vmem:[%s8234_s1 + $0x8] sm:$0xff]   ;;  %v5884_v2 = vld [vmem:[%s8234_s1] sm:$0xff]   ;;  %vm610_vm0 = vcmask 261120   ;;  %v5903_v9 = vld [vmem:[#allocation3 + $0x70] ss:$8 sps:$4 sm:$0xff]  }
  0x3d   : > { %6099 = vsyncadd (%p8268_p9), [#allocation7], 4294950912  ;;  %p468_p12 = scmp.lt.s32.totalorder %s6292_s18, 63  ;;  %5724 = vmatprep.subr.bf16.mxu0 %v5883_v1  ;;  %v5901_v8 = vld [vmem:[#allocation3 + $0x74] ss:$8 sps:$4 sm:$0xff]   ;;  %v6126_v35 = vmov 0  }
  0x3e   : > { %5725 = vmatpush3.bf16.msra.mxu0 %v5883_v1  ;;  %976 = vmatprep.subr.bf16.mxu1 %v5901_v8  ;;  %v5904_v10 = vld [vmem:[#allocation3 + $0x64] ss:$8 sps:$4 sm:$0xff]   ;;  %v5906_v12 = vld [vmem:[#allocation3 + $0x60] ss:$8 sps:$4 sm:$0xff]   ;;  %v5907_v13 = vld [vmem:[#allocation3 + $0x54] ss:$8 sps:$4 sm:$0xff]  }
  0x3f   : > { %s469_s29 = scalar_select %p468_p12, %s6292_s18, 63  ;;  %5726 = vmatprep.subr.bf16.mxu0 %v5884_v2  ;;  %977 = vmatpush1.bf16.msra.mxu1 %v5903_v9  ;;  %v5909_v15 = vld [vmem:[#allocation3 + $0x50] ss:$8 sps:$4 sm:$0xff]   ;;  %v5910_v16 = vld [vmem:[#allocation3 + $0x44] ss:$8 sps:$4 sm:$0xff]   ;;  %vm4733_vm1 = vcmask 523264  }
  0x40   : > { %978 = vmatprep.subr.bf16.mxu1 %v5904_v10  ;;  %v5912_v17 = vld [vmem:[#allocation3 + $0x40] ss:$8 sps:$4 sm:$0xff]   ;;  %v5913_v19 = vld [vmem:[#allocation3 + $0x34] ss:$8 sps:$4 sm:$0xff]   ;;  %v5915_v21 = vld [vmem:[#allocation3 + $0x30] ss:$8 sps:$4 sm:$0xff]   ;;  %1008 = vmatprep.mubr.bf16.mxu1 %v6126_v35 }
  0x41   : > { %s4955_s15 = sshll.u32 %s469_s29, 2  ;;  %v5916_v29 = vld [vmem:[#allocation3 + $0x24] ss:$8 sps:$4 sm:$0xff]   ;;  %v5918_v30 = vld [vmem:[#allocation3 + $0x20] ss:$8 sps:$4 sm:$0xff]   ;;  %5882 = vset.pattern.permute.xlu0 %v6126_v35  ;;  %s464_s25 = sand.u32 1, %s6110_s28  }
  0x42   : > { %s6299_s23 = scalar_lea.vmem %s8233_s0, %s4955_s15  ;;  %5727 = vmatpush3.bf16.msra.mxu0 %v5884_v2  ;;  %v5919_v31 = vld [vmem:[#allocation3 + $0x14] ss:$8 sps:$4 sm:$0xff]   ;;  %v5921_v32 = vld [vmem:[#allocation3 + $0x10] ss:$8 sps:$4 sm:$0xff]   ;;  %v5922_v33 = vld [vmem:[#allocation3 + $0x4] ss:$8 sps:$4 sm:$0xff]  }
  0x43   : > { %v5885_v3 = vld [vmem:[%s6299_s23] sm:$0xff]   ;;  %v5886_v4 = vld [vmem:[%s6299_s23 + $0x8] sm:$0xff]   ;;  %v5887_v5 = vld [vmem:[%s6299_s23 + $0x10] sm:$0xff]   ;;  %979 = vmatpush1.bf16.msra.mxu1 %v5906_v12  ;;  %s4953_s14 = sshll.u32 %s464_s25, 1  ;;  %s4850_s24 = scalar_lea.sflag [#allocation5], %s464_s25 }
  0x44   : > { %5728 = vmatprep.mubr.msk.bf16.mxu0 %vm610_vm0, %v5885_v3  ;;  %v5888_v6 = vld [vmem:[%s6299_s23 + $0x18] sm:$0xff]   ;;  %v5889_v7 = vld [vmem:[%s6299_s23 + $0x20] sm:$0xff]   ;;  %v5890_v11 = vld [vmem:[%s6299_s23 + $0x28] sm:$0xff]   ;;  %980 = vmatprep.subr.bf16.mxu1 %v5907_v13  ;;  %s466_s29 = scalar_lea.vmem [#allocation8], %s4953_s14  ;;  %s6128_s12 = smov [#allocation8]  }
  0x45   : > { %5729 = vmatmul.mubr.msk.bf16.vlgmr.msra.gmra.mxu0 %vm610_vm0, %v5886_v4  ;;  %v5891_v14 = vld [vmem:[%s6299_s23 + $0x30] sm:$0xff]   ;;  %v5892_v18 = vld [vmem:[%s6299_s23 + $0x38] sm:$0xff]   ;;  %v5893_v20 = vld [vmem:[%s6299_s23 + $0x40] sm:$0xff]   ;;  %s4864_s15 = sshll.u32 %s466_s29, 4  ;;  %s6054_s16 = sshll.u32 %s6128_s12, 4  ;;  %s4865_s15 = int_to_ptr.vmem [resolvable:$true] %s4864_s15  ;;  %s6055_s16 = int_to_ptr.vmem [resolvable:$false] %s6054_s16 }
  0x46   : > { %5732 = vmatprep.mubr.msk.bf16.mxu0 %vm610_vm0, %v5887_v5  ;;  %v5894_v22 = vld [vmem:[%s6299_s23 + $0x48] sm:$0xff]   ;;  %v5895_v23 = vld [vmem:[%s6299_s23 + $0x50] sm:$0xff]   ;;  %v5896_v24 = vld [vmem:[%s6299_s23 + $0x58] sm:$0xff]   ;;  %s6050_s26 = scalar_lea.vmem %s4865_s15, 32  ;;  %s6056_s17 = scalar_lea.vmem %s6055_s16, 64 }
  0x47   : > { %981 = vmatpush1.bf16.msra.mxu1 %v5909_v15  ;;  %v5897_v25 = vld [vmem:[%s6299_s23 + $0x60] sm:$0xff]   ;;  %v5898_v26 = vld [vmem:[%s6299_s23 + $0x68] sm:$0xff]   ;;  %v5899_v27 = vld [vmem:[%s6299_s23 + $0x70] sm:$0xff]   ;;  %p6051_p10 = scmp.ne.s32.totalorder %s4865_s15, %s6050_s26  ;;  %p6057_p11 = scmp.lt.s32.totalorder %s4865_s15, %s6055_s16 }
  0x48   : > { %982 = vmatprep.subr.bf16.mxu1 %v5910_v16  ;;  %v5900_v28 = vld [vmem:[%s6299_s23 + $0x78] sm:$0xff]   ;;  %v5924_v34 = vld [vmem:[#allocation3] ss:$8 sps:$4 sm:$0xff]   ;;  %v6344_v41 = vld [vmem:[%s8235_s2] ss:$0 sm:$0xff]  ;;  %s4862_s23 = scalar_lea.hbm %s8246_s13, %s6292_s18  ;;  %p6058_p0 = scmp.lt.s32.totalorder %s6056_s17, %s6050_s26 }
  0x49   : > { %v1322_v36 = vld [vmem:[#allocation6 + $0x1c8] sm:$0xff]  ;;  %v1321_v47 = vld [vmem:[#allocation6 + $0x1c0] sm:$0xff]  ;;  %p6052_p7 = pnand %p6051_p10, %p6240_p5 }
  0x4a   : > { %v1326_v37 = vld [vmem:[#allocation6 + $0x1e8] sm:$0xff]  ;;  %v1325_v48 = vld [vmem:[#allocation6 + $0x1e0] sm:$0xff]  ;;  %p6059_p1 = por %p6058_p0, %p6057_p11 }
  0x4b   : > { %983 = vmatpush1.bf16.msra.mxu1 %v5912_v17  ;;  %v5066_v38 = vcombine.high %v1322_v36, %v1326_v37  ;;  %v1314_v46 = vld [vmem:[#allocation6 + $0x188] sm:$0xff]  ;;  %v5063_v51 = vcombine.low %v1321_v47, %v1325_v48  ;;  %v5064_v52 = vcombine.high %v1321_v47, %v1325_v48  ;;  %v1313_v53 = vld [vmem:[#allocation6 + $0x180] sm:$0xff]  ;;  %v5065_v61 = vcombine.low %v1322_v36, %v1326_v37  ;;  %p6053_p8 = pneg %p6052_p7 }
  0x4c   : > { %984 = vmatprep.subr.bf16.mxu1 %v5913_v19  ;;  %v1318_v50 = vld [vmem:[#allocation6 + $0x1a8] sm:$0xff]  ;;  %v1317_v54 = vld [vmem:[#allocation6 + $0x1a0] sm:$0xff] }
  0x4d   : > { %5733 = vmatmul.mubr.msk.bf16.gmra.mxu0 %vm610_vm0, %v5888_v6  ;;  %v1305_v57 = vld [vmem:[#allocation6 + $0x140] sm:$0xff]  ;;  %2075 = vmatprep.subr.bf16.mxu0 %v5064_v52  ;;  %v5056_v62 = vcombine.high %v1313_v53, %v1317_v54  ;;  %v5058_v0 = vcombine.high %v1314_v46, %v1318_v50  ;;  %v5055_v1 = vcombine.low %v1313_v53, %v1317_v54  ;;  %v1306_v4 = vld [vmem:[#allocation6 + $0x148] sm:$0xff]  ;;  %p6060_p3 = pnand %p6059_p1, %p6053_p8 }
  0x4e   : > { %5736 = vmatprep.mubr.msk.bf16.mxu0 %vm610_vm0, %v5889_v7  ;;  %v1309_v58 = vld [vmem:[#allocation6 + $0x160] sm:$0xff]  ;;  %2076 = vmatpush1.bf16.msra.mxu0 %v5063_v51  ;;  %v1310_v5 = vld [vmem:[#allocation6 + $0x168] sm:$0xff]  ;;  %v5057_v10 = vcombine.low %v1314_v46, %v1318_v50 }
  0x4f   : > { %985 = vmatpush1.bf16.msra.mxu1 %v5915_v21  ;;  %2077 = vmatprep.subr.bf16.mxu0 %v5056_v62  ;;  %v5048_v6 = vcombine.high %v1305_v57, %v1309_v58  ;;  %v1297_v7 = vld [vmem:[#allocation6 + $0x100] sm:$0xff]  ;;  %v1298_v12 = vld [vmem:[#allocation6 + $0x108] sm:$0xff]  ;;  %v5049_v21 = vcombine.low %v1306_v4, %v1310_v5 }
  0x50   : > { %986 = vmatprep.subr.bf16.mxu1 %v5916_v29  ;;  %v1301_v8 = vld [vmem:[#allocation6 + $0x120] sm:$0xff]  ;;  %v1302_v13 = vld [vmem:[#allocation6 + $0x128] sm:$0xff] }
  0x51   : > { %v5040_v17 = vcombine.high %v1297_v7, %v1301_v8  ;;  %v1293_v19 = vld [vmem:[#allocation6 + $0xe0] sm:$0xff]  ;;  %v1282_v37 = vld [vmem:[#allocation6 + $0x88] sm:$0xff] }
  0x52   : > { %2078 = vmatpush1.bf16.msra.mxu0 %v5055_v1  ;;  %v1274_v53 = vld [vmem:[#allocation6 + $0x48] sm:$0xff] }
  0x53   : > { %987 = vmatpush1.bf16.msra.mxu1 %v5918_v30  ;;  %2079 = vmatprep.subr.bf16.mxu0 %v5048_v6  ;;  %v1281_v30 = vld [vmem:[#allocation6 + $0x80] sm:$0xff]  ;;  %v1278_v54 = vld [vmem:[#allocation6 + $0x68] sm:$0xff] }
  0x54   : > { %988 = vmatprep.subr.bf16.mxu1 %v5919_v31  ;;  %v1285_v31 = vld [vmem:[#allocation6 + $0xa0] sm:$0xff]  ;;  %v1270_v62 = vld [vmem:[#allocation6 + $0x28] sm:$0xff] }
  0x55   : > { %5737 = vmatmul.mubr.msk.bf16.gmra.mxu0 %vm610_vm0, %v5890_v11  ;;  %v5050_v11 = vcombine.high %v1306_v4, %v1310_v5  ;;  %v5023_v51 = vcombine.low %v1281_v30, %v1285_v31  ;;  %v5017_v4 = vcombine.low %v1274_v53, %v1278_v54 }
  0x56   : > { %5740 = vmatprep.mubr.msk.bf16.mxu0 %vm610_vm0, %v5891_v14  ;;  %v5047_v14 = vcombine.low %v1305_v57, %v1309_v58  ;;  %v1269_v57 = vld [vmem:[#allocation6 + $0x20] sm:$0xff] }
  0x57   : > { %989 = vmatpush1.bf16.msra.mxu1 %v5921_v32  ;;  %v5041_v32 = vcombine.low %v1298_v12, %v1302_v13 }
  0x58   : > { %990 = vmatprep.subr.bf16.mxu1 %v5922_v33  ;;  %2080 = vmatpush1.bf16.msra.mxu0 %v5047_v14  ;;  %v1377_v14 = vld [vmem:[#allocation6 + $0x380] sm:$0xff] }
  0x59   : > { %2081 = vmatprep.subr.bf16.mxu0 %v5040_v17 }
  0x5b   : > { %991 = vmatpush1.bf16.msra.mxu1 %v5924_v34 }
  0x5c   : > { %2268 = vmatprep.subr.bf16.mxu1 %v5066_v38  ;;  %v1286_v38 = vld [vmem:[#allocation6 + $0xa8] sm:$0xff] }
  0x5d   : > { %5741 = vmatmul.mubr.msk.bf16.gmra.mxu0 %vm610_vm0, %v5892_v18  ;;  %v1289_v18 = vld [vmem:[#allocation6 + $0xc0] sm:$0xff]  ;;  %v5026_v47 = vcombine.high %v1282_v37, %v1286_v38 }
  0x5e   : > { %5744 = vmatprep.mubr.msk.bf16.mxu0 %vm610_vm0, %v5893_v20  ;;  %v5032_v29 = vcombine.high %v1289_v18, %v1293_v19 }
  0x65   : > { %5745 = vmatmul.mubr.msk.bf16.gmra.mxu0 %vm610_vm0, %v5894_v22  ;;  %v5042_v22 = vcombine.high %v1298_v12, %v1302_v13  ;;  %v1390_v12 = vld [vmem:[#allocation6 + $0x3e8] sm:$0xff] }
  0x66   : > { %5748 = vmatprep.mubr.msk.bf16.mxu0 %vm610_vm0, %v5895_v23 }
  0x6d   : > { %5749 = vmatmul.mubr.msk.bf16.gmra.mxu0 %vm610_vm0, %v5896_v24 }
  0x6e   : > { %5752 = vmatprep.mubr.msk.bf16.mxu0 %vm610_vm0, %v5897_v25  ;;  %v5039_v25 = vcombine.low %v1297_v7, %v1301_v8 }
  0x70   : > { %2082 = vmatpush1.bf16.msra.mxu0 %v5039_v25  ;;  %v1369_v25 = vld [vmem:[#allocation6 + $0x340] sm:$0xff] }
  0x71   : > { %2083 = vmatprep.subr.bf16.mxu0 %v5032_v29 }
  0x75   : > { %5753 = vmatmul.mubr.msk.bf16.gmra.mxu0 %vm610_vm0, %v5898_v26 }
  0x76   : > { %5756 = vmatprep.mubr.msk.bf16.mxu0 %vm610_vm0, %v5899_v27  ;;  %v1290_v27 = vld [vmem:[#allocation6 + $0xc8] sm:$0xff] }
  0x7d   : > { %5757 = vmatmul.mubr.msk.bf16.gmra.mxu0 %vm610_vm0, %v5900_v28  ;;  %v1294_v28 = vld [vmem:[#allocation6 + $0xe8] sm:$0xff] }
  0x7e   : > { %v5034_v36 = vcombine.high %v1290_v27, %v1294_v28  ;;  %v5033_v46 = vcombine.low %v1290_v27, %v1294_v28  ;;  %v1373_v27 = vld [vmem:[#allocation6 + $0x360] sm:$0xff] }
 0x105   : > { %v5730_v39 = vpop.f32.mrf.mxu0 }
 0x106   : > { %v702_v2 = vadd.f32 %v5730_v39, %v6344_v41  ;;  %v5031_v39 = vcombine.low %v1289_v18, %v1293_v19 }
 0x107   : > { %v693_v40 = vpop.f32.mrf.mxu0 }
 0x108   : > { %v694_v43 = vadd.f32 %v6344_v41, %v693_v40  ;;  %v822_v15 = vmax.f32 %v702_v2, 0.0  ;;  %2084 = vmatpush1.bf16.msra.mxu0 %v5031_v39  ;;  %v1385_v2 = vld [vmem:[#allocation6 + $0x3c0] sm:$0xff] }
 0x109   : > { %v5731_v42 = vpop.f32.mrf.mxu0  ;;  %v1361_v39 = vld [vmem:[#allocation6 + $0x300] sm:$0xff] }
 0x10a   : > { %v820_v55 = vmax.f32 %v694_v43, 0.0  ;;  %v705_v59 = vadd.f32 %v5731_v42, %v6344_v41  ;;  %v5024_v42 = vcombine.high %v1281_v30, %v1285_v31  ;;  %v1273_v43 = vld [vmem:[#allocation6 + $0x40] sm:$0xff] }
 0x10b   : > { %v696_v44 = vpop.f32.mrf.mxu0 }
 0x10c   : > { %v697_v45 = vadd.f32 %v6344_v41, %v696_v44  ;;  %v823_v9 = vmax.f32 %v705_v59, 0.0  ;;  %v1277_v44 = vld [vmem:[#allocation6 + $0x60] sm:$0xff]  ;;  %2085 = vmatprep.subr.bf16.mxu0 %v5024_v42 }
 0x10d   : > { %v6348_v49 = vpop.f32.mrf.mxu0  ;;  %2086 = vmatpush1.bf16.msra.mxu0 %v5023_v51  ;;  %v1353_v51 = vld [vmem:[#allocation6 + $0x2c0] sm:$0xff] }
 0x10e   : > { %v821_v56 = vmax.f32 %v697_v45, 0.0  ;;  %v853_v20 = vpack.c.bf16 %v823_v9, %v822_v15  ;;  %v718_v45 = vadd.f32 %v6348_v49, %v6344_v41  ;;  %v5025_v49 = vcombine.low %v1282_v37, %v1286_v38  ;;  %v1381_v15 = vld [vmem:[#allocation6 + $0x3a0] sm:$0xff]  ;;  %v1374_v37 = vld [vmem:[#allocation6 + $0x368] sm:$0xff] }
 0x10f   : > { %v709_v60 = vpop.f32.mrf.mxu0  ;;  %v5112_v38 = vcombine.high %v1369_v25, %v1373_v27 }
 0x110   : > { %v852_v63 = vpack.c.bf16 %v821_v56, %v820_v55  ;;  %v710_v23 = vadd.f32 %v6344_v41, %v709_v60  ;;  %v5016_v55 = vcombine.high %v1273_v43, %v1277_v44  ;;  %v1265_v56 = vld [vmem:[#allocation6] sm:$0xff]  ;;  %v826_v58 = vmax.f32 %v718_v45, 0.0  ;;  %v1362_v45 = vld [vmem:[#allocation6 + $0x308] sm:$0xff] }
 0x111   : > { %v5735_v3 = vpop.f32.mrf.mxu0  ;;  %v5018_v60 = vcombine.high %v1274_v53, %v1278_v54  ;;  %v5008_v1 = vcombine.high %v1265_v56, %v1269_v57  ;;  %v5007_v6 = vcombine.low %v1265_v56, %v1269_v57 }
 0x112   : > { %1009 = vmatmul.mubr.bf16.vlgmr.msra.gmra.mxu1 %v852_v63  ;;  %v824_v33 = vmax.f32 %v710_v23, 0.0  ;;  %v721_v48 = vadd.f32 %v5735_v3, %v6344_v41  ;;  %v5015_v63 = vcombine.low %v1273_v43, %v1277_v44  ;;  %2087 = vmatprep.subr.bf16.mxu0 %v5016_v55  ;;  %v1389_v3 = vld [vmem:[#allocation6 + $0x3e0] sm:$0xff] }
 0x113   : > { %1018 = vmatprep.mubr.bf16.mxu1 %v6126_v35  ;;  %2269 = vmatpush1.bf16.msra.mxu1 %v5065_v61  ;;  %v712_v16 = vpop.f32.mrf.mxu0  ;;  %v1266_v61 = vld [vmem:[#allocation6 + $0x8] sm:$0xff]  ;;  %v5128_v13 = vcombine.high %v1385_v2, %v1389_v3 }
 0x114   : > { %2270 = vmatprep.subr.bf16.mxu1 %v5058_v0  ;;  %v713_v24 = vadd.f32 %v6344_v41, %v712_v16  ;;  %v827_v59 = vmax.f32 %v721_v48, 0.0  ;;  %v5010_v5 = vcombine.high %v1266_v61, %v1270_v62  ;;  %2088 = vmatpush1.bf16.msra.mxu0 %v5015_v63  ;;  %v5009_v16 = vcombine.low %v1266_v61, %v1270_v62 }
 0x115   : > { %v6355_v26 = vpop.f32.mrf.mxu0  ;;  %2089 = vmatprep.subr.bf16.mxu0 %v5008_v1 }
 0x116   : > { %v825_v34 = vmax.f32 %v713_v24, 0.0  ;;  %v855_v7 = vpack.c.bf16 %v827_v59, %v826_v58  ;;  %v5120_v24 = vcombine.high %v1377_v14, %v1381_v15  ;;  %v734_v28 = vadd.f32 %v6355_v26, %v6344_v41  ;;  %v1354_v59 = vld [vmem:[#allocation6 + $0x2c8] sm:$0xff] }
 0x117   : > { %2271 = vmatpush1.bf16.msra.mxu1 %v5057_v10  ;;  %v725_v40 = vpop.f32.mrf.mxu0 }
 0x118   : > { %2272 = vmatprep.subr.bf16.mxu1 %v5050_v11  ;;  %v854_v50 = vpack.c.bf16 %v825_v34, %v824_v33  ;;  %v726_v8 = vadd.f32 %v6344_v41, %v725_v40  ;;  %v1386_v11 = vld [vmem:[#allocation6 + $0x3c8] sm:$0xff]  ;;  %2090 = vmatpush1.bf16.msra.mxu0 %v5007_v6  ;;  %v5119_v33 = vcombine.low %v1377_v14, %v1381_v15  ;;  %v1365_v40 = vld [vmem:[#allocation6 + $0x320] sm:$0xff]  ;;  %v830_v42 = vmax.f32 %v734_v28, 0.0 }
 0x119   : > { %v5739_v52 = vpop.f32.mrf.mxu0  ;;  %v5130_v19 = vcombine.high %v1386_v11, %v1390_v12  ;;  %2091 = vmatprep.subr.bf16.mxu0 %v5128_v13  ;;  %v5129_v29 = vcombine.low %v1386_v11, %v1390_v12  ;;  %v5103_v55 = vcombine.low %v1361_v39, %v1365_v40  ;;  %v1345_v28 = vld [vmem:[#allocation6 + $0x280] sm:$0xff] }
 0x11a   : > { %1019 = vmatmul.mubr.bf16.gmra.mxu1 %v853_v20  ;;  %v828_v17 = vmax.f32 %v726_v8, 0.0  ;;  %v1378_v20 = vld [vmem:[#allocation6 + $0x388] sm:$0xff]  ;;  %v737_v31 = vadd.f32 %v5739_v52, %v6344_v41  ;;  %v1357_v52 = vld [vmem:[#allocation6 + $0x2e0] sm:$0xff] }
 0x11b   : > { %1028 = vmatprep.mubr.bf16.mxu1 %v6126_v35  ;;  %2273 = vmatpush1.bf16.msra.mxu1 %v5049_v21  ;;  %v728_v0 = vpop.f32.mrf.mxu0  ;;  %v1382_v21 = vld [vmem:[#allocation6 + $0x3a8] sm:$0xff]  ;;  %v5096_v61 = vcombine.high %v1353_v51, %v1357_v52 }
 0x11c   : > { %2274 = vmatprep.subr.bf16.mxu1 %v5042_v22  ;;  %v729_v9 = vadd.f32 %v6344_v41, %v728_v0  ;;  %v5127_v22 = vcombine.low %v1385_v2, %v1389_v3  ;;  %v5122_v30 = vcombine.high %v1378_v20, %v1382_v21  ;;  %v5121_v26 = vcombine.low %v1378_v20, %v1382_v21  ;;  %v1346_v2 = vld [vmem:[#allocation6 + $0x288] sm:$0xff] }
 0x11d   : > { %v6364_v10 = vpop.f32.mrf.mxu0  ;;  %v831_v43 = vmax.f32 %v737_v31, 0.0  ;;  %v1350_v3 = vld [vmem:[#allocation6 + $0x2a8] sm:$0xff] }
 0x11e   : > { %v829_v18 = vmax.f32 %v729_v9, 0.0  ;;  %2092 = vmatpush2.bf16.msra.mxu0 %v5127_v22  ;;  %v750_v8 = vadd.f32 %v6364_v10, %v6344_v41  ;;  %v5089_v13 = vcombine.low %v1346_v2, %v1350_v3 }
 0x11f   : > { %2275 = vmatpush1.bf16.msra.mxu1 %v5041_v32  ;;  %v741_v23 = vpop.f32.mrf.mxu0  ;;  %2093 = vmatprep.subr.bf16.mxu0 %v5120_v24  ;;  %v857_v56 = vpack.c.bf16 %v831_v43, %v830_v42 }
 0x120   : > { %2276 = vmatprep.subr.bf16.mxu1 %v5034_v36  ;;  %v856_v32 = vpack.c.bf16 %v829_v18, %v828_v17  ;;  %v1370_v36 = vld [vmem:[#allocation6 + $0x348] sm:$0xff]  ;;  %v742_v57 = vadd.f32 %v6344_v41, %v741_v23  ;;  %v834_v14 = vmax.f32 %v750_v8, 0.0 }
 0x121   : > { %v5743_v34 = vpop.f32.mrf.mxu0  ;;  %v5114_v44 = vcombine.high %v1370_v36, %v1374_v37  ;;  %v5113_v53 = vcombine.low %v1370_v36, %v1374_v37  ;;  %v1338_v36 = vld [vmem:[#allocation6 + $0x248] sm:$0xff] }
 0x122   : > { %1029 = vmatmul.mubr.bf16.gmra.mxu1 %v854_v50  ;;  %2094 = vmatpush2.bf16.msra.mxu0 %v5119_v33  ;;  %v5104_v50 = vcombine.high %v1361_v39, %v1365_v40  ;;  %v832_v63 = vmax.f32 %v742_v57, 0.0  ;;  %v753_v9 = vadd.f32 %v5743_v34, %v6344_v41  ;;  %v1342_v37 = vld [vmem:[#allocation6 + $0x268] sm:$0xff] }
 0x123   : > { %1038 = vmatprep.mubr.bf16.mxu1 %v6126_v35  ;;  %2277 = vmatpush1.bf16.msra.mxu1 %v5033_v46  ;;  %v1366_v46 = vld [vmem:[#allocation6 + $0x328] sm:$0xff]  ;;  %v744_v48 = vpop.f32.mrf.mxu0  ;;  %v5081_v39 = vcombine.low %v1338_v36, %v1342_v37  ;;  %v5082_v40 = vcombine.high %v1338_v36, %v1342_v37  ;;  %v8252_v37 = vlaneseq }
 0x124   : > { %2278 = vmatprep.subr.bf16.mxu1 %v5026_v47  ;;  %v5111_v47 = vcombine.low %v1369_v25, %v1373_v27  ;;  %2095 = vmatprep.subr.bf16.mxu0 %v5112_v38  ;;  %v5106_v54 = vcombine.high %v1362_v45, %v1366_v46  ;;  %v5105_v62 = vcombine.low %v1362_v45, %v1366_v46  ;;  %v835_v15 = vmax.f32 %v753_v9, 0.0  ;;  %v1337_v38 = vld [vmem:[#allocation6 + $0x240] sm:$0xff] }
 0x125   : > { %v5746_v58 = vpop.f32.mrf.mxu0 }
 0x126   : > { %2096 = vmatpush2.bf16.msra.mxu0 %v5111_v47  ;;  %v859_v17 = vpack.c.bf16 %v835_v15, %v834_v14  ;;  %v766_v23 = vadd.f32 %v5746_v58, %v6344_v41 }
 0x127   : > { %2279 = vmatpush1.bf16.msra.mxu1 %v5025_v49  ;;  %v745_v49 = vadd.f32 %v6344_v41, %v744_v48  ;;  %2097 = vmatprep.subr.bf16.mxu0 %v5104_v50  ;;  %v1330_v48 = vld [vmem:[#allocation6 + $0x208] sm:$0xff] }
 0x128   : > { %2280 = vmatprep.subr.bf16.mxu1 %v5018_v60  ;;  %v1358_v60 = vld [vmem:[#allocation6 + $0x2e8] sm:$0xff] }
 0x129   : > { %v833_v0 = vmax.f32 %v745_v49, 0.0  ;;  %v5098_v1 = vcombine.high %v1354_v59, %v1358_v60  ;;  %v5097_v6 = vcombine.low %v1354_v59, %v1358_v60  ;;  %v1334_v50 = vld [vmem:[#allocation6 + $0x228] sm:$0xff] }
 0x12a   : > { %1039 = vmatmul.mubr.bf16.gmra.mxu1 %v855_v7  ;;  %2098 = vmatpush2.bf16.msra.mxu0 %v5103_v55  ;;  %v5090_v7 = vcombine.high %v1346_v2, %v1350_v3  ;;  %v6390_v2 = vld [vmem:[#allocation6 + $0x1d0] sm:$0xff] }
 0x12b   : > { %1048 = vmatprep.mubr.bf16.mxu1 %v6126_v35  ;;  %2281 = vmatpush1.bf16.msra.mxu1 %v5017_v4  ;;  %v5095_v4 = vcombine.low %v1353_v51, %v1357_v52  ;;  %v858_v11 = vpack.c.bf16 %v833_v0, %v832_v63  ;;  %v1329_v51 = vld [vmem:[#allocation6 + $0x200] sm:$0xff]  ;;  %v5074_v52 = vcombine.high %v1330_v48, %v1334_v50  ;;  %v6392_v3 = vld [vmem:[#allocation6 + $0x1f0] sm:$0xff] }
 0x12c   : > { %2282 = vmatprep.subr.bf16.mxu1 %v5010_v5  ;;  %v757_v5 = vpop.f32.mrf.mxu0  ;;  %2099 = vmatprep.subr.bf16.mxu0 %v5096_v61 }
 0x12d   : > { %v758_v18 = vadd.f32 %v6344_v41, %v757_v5  ;;  %v5067_v5 = vcombine.low %v6390_v2, %v6392_v3 }
 0x12e   : > { %2100 = vmatpush2.bf16.msra.mxu0 %v5095_v4  ;;  %v5747_v12 = vpop.f32.mrf.mxu0  ;;  %v6394_v4 = vld [vmem:[#allocation6 + $0x1d8] sm:$0xff] }
 0x12f   : > { %2283 = vmatpush1.bf16.msra.mxu1 %v5009_v16  ;;  %v836_v20 = vmax.f32 %v758_v18, 0.0  ;;  %v769_v24 = vadd.f32 %v5747_v12, %v6344_v41 }
 0x130   : > { %2284 = vmatprep.subr.bf16.mxu1 %v5130_v19  ;;  %v760_v16 = vpop.f32.mrf.mxu0 }
 0x131   : > { %v761_v10 = vadd.f32 %v6344_v41, %v760_v16  ;;  %v839_v33 = vmax.f32 %v769_v24, 0.0 }
 0x132   : > { %1049 = vmatmul.mubr.bf16.gmra.mxu1 %v856_v32  ;;  %v5750_v19 = vpop.f32.mrf.mxu0  ;;  %v838_v32 = vmax.f32 %v766_v23, 0.0 }
 0x133   : > { %1058 = vmatprep.mubr.bf16.mxu1 %v6126_v35  ;;  %2285 = vmatpush2.bf16.msra.mxu1 %v5129_v29  ;;  %v837_v21 = vmax.f32 %v761_v10, 0.0  ;;  %v1349_v29 = vld [vmem:[#allocation6 + $0x2a0] sm:$0xff]  ;;  %v782_v59 = vadd.f32 %v5750_v19, %v6344_v41 }
 0x134   : > { %2286 = vmatprep.subr.bf16.mxu1 %v5122_v30  ;;  %v773_v22 = vpop.f32.mrf.mxu0  ;;  %v5088_v30 = vcombine.high %v1345_v28, %v1349_v29  ;;  %v5087_v31 = vcombine.low %v1345_v28, %v1349_v29 }
 0x135   : > { %v860_v25 = vpack.c.bf16 %v837_v21, %v836_v20  ;;  %v774_v45 = vadd.f32 %v6344_v41, %v773_v22  ;;  %v842_v63 = vmax.f32 %v782_v59, 0.0 }
 0x136   : > { %v5751_v27 = vpop.f32.mrf.mxu0  ;;  %2101 = vmatprep.subr.bf16.mxu0 %v5088_v30 }
 0x137   : > { %2287 = vmatpush2.bf16.msra.mxu1 %v5121_v26  ;;  %2102 = vmatpush2.bf16.msra.mxu0 %v5087_v31  ;;  %v1341_v26 = vld [vmem:[#allocation6 + $0x260] sm:$0xff]  ;;  %v840_v57 = vmax.f32 %v774_v45, 0.0  ;;  %v785_v60 = vadd.f32 %v5751_v27, %v6344_v41 }
 0x138   : > { %2288 = vmatprep.subr.bf16.mxu1 %v5114_v44  ;;  %v776_v34 = vpop.f32.mrf.mxu0  ;;  %v5079_v42 = vcombine.low %v1337_v38, %v1341_v26  ;;  %v5080_v43 = vcombine.high %v1337_v38, %v1341_v26  ;;  %v861_v44 = vpack.c.bf16 %v839_v33, %v838_v32  ;;  %v6419_v38 = vshrl.u32 %v8252_v37, 7 }
 0x139   : > { %v777_v46 = vadd.f32 %v6344_v41, %v776_v34  ;;  %v843_v0 = vmax.f32 %v785_v60, 0.0 }
 0x13a   : > { %1059 = vmatmul.mubr.bf16.gmra.mxu1 %v857_v56  ;;  %v5754_v47 = vpop.f32.mrf.mxu0  ;;  %2103 = vmatprep.subr.bf16.mxu0 %v5080_v43  ;;  %8269 = vst [vmem:[#allocation16_spill] sm:$0xff] %v6419_v38 }
 0x13b   : > { %1068 = vmatprep.mubr.bf16.mxu1 %v6126_v35  ;;  %2289 = vmatpush2.bf16.msra.mxu1 %v5113_v53  ;;  %v1333_v53 = vld [vmem:[#allocation6 + $0x220] sm:$0xff]  ;;  %v841_v49 = vmax.f32 %v777_v46, 0.0  ;;  %v798_v18 = vadd.f32 %v5754_v47, %v6344_v41 }
 0x13c   : > { %2290 = vmatprep.subr.bf16.mxu1 %v5106_v54  ;;  %2104 = vmatpush2.bf16.msra.mxu0 %v5079_v42  ;;  %v5073_v54 = vcombine.low %v1330_v48, %v1334_v50  ;;  %v5071_v55 = vcombine.low %v1329_v51, %v1333_v53  ;;  %v5072_v56 = vcombine.high %v1329_v51, %v1333_v53  ;;  %v789_v58 = vpop.f32.mrf.mxu0  ;;  %v1315_v53 = vld [vmem:[#allocation6 + $0x190] sm:$0xff] }
 0x13d   : > { %v862_v61 = vpack.c.bf16 %v841_v49, %v840_v57  ;;  %v790_v12 = vadd.f32 %v6344_v41, %v789_v58  ;;  %v846_v21 = vmax.f32 %v798_v18, 0.0  ;;  %v1316_v57 = vld [vmem:[#allocation6 + $0x198] sm:$0xff] }
 0x13e   : > { %2105 = vmatprep.subr.bf16.mxu0 %v5072_v56  ;;  %v1319_v56 = vld [vmem:[#allocation6 + $0x1b0] sm:$0xff]  ;;  %v1320_v49 = vld [vmem:[#allocation6 + $0x1b8] sm:$0xff] }
 0x13f   : > { %2291 = vmatpush2.bf16.msra.mxu1 %v5105_v62  ;;  %v5755_v62 = vpop.f32.mrf.mxu0  ;;  %v844_v15 = vmax.f32 %v790_v12, 0.0  ;;  %v1308_v12 = vld [vmem:[#allocation6 + $0x158] sm:$0xff]  ;;  %v5061_v18 = vcombine.low %v1316_v57, %v1320_v49 }
 0x140   : > { %2292 = vmatprep.subr.bf16.mxu1 %v5098_v1  ;;  %2106 = vmatpush2.bf16.msra.mxu0 %v5071_v55  ;;  %v801_v10 = vadd.f32 %v5755_v62, %v6344_v41 }
 0x141   : > { %v792_v1 = vpop.f32.mrf.mxu0 }
 0x142   : > { %1069 = vmatmul.mubr.bf16.gmra.mxu1 %v858_v11  ;;  %v863_v11 = vpack.c.bf16 %v843_v0, %v842_v63  ;;  %v847_v22 = vmax.f32 %v801_v10, 0.0  ;;  %v5060_v63 = vcombine.high %v1315_v53, %v1319_v56  ;;  %v5062_v0 = vcombine.high %v1316_v57, %v1320_v49  ;;  %v1284_v57 = vld [vmem:[#allocation6 + $0x98] sm:$0xff] }
 0x143   : > { %1078 = vmatprep.mubr.bf16.mxu1 %v6126_v35  ;;  %2293 = vmatpush2.bf16.msra.mxu1 %v5097_v6  ;;  %v5068_v6 = vcombine.high %v6390_v2, %v6392_v3  ;;  %v5758_v14 = vpop.f32.mrf.mxu0  ;;  %v1288_v49 = vld [vmem:[#allocation6 + $0xb8] sm:$0xff] }
 0x144   : > { %2294 = vmatprep.subr.bf16.mxu1 %v5090_v7  ;;  %v6400_v7 = vld [vmem:[#allocation6 + $0x1f8] sm:$0xff]  ;;  %v865_v24 = vpack.c.bf16 %v847_v22, %v846_v21  ;;  %v814_v30 = vadd.f32 %v5758_v14, %v6344_v41  ;;  %v1299_v22 = vld [vmem:[#allocation6 + $0x110] sm:$0xff] }
 0x145   : > { %v5069_v8 = vcombine.low %v6394_v4, %v6400_v7  ;;  %v5070_v9 = vcombine.high %v6394_v4, %v6400_v7  ;;  %2461 = vmatprep.subr.bf16.mxu0 %v5068_v6 }
 0x146   : > { %v850_v33 = vmax.f32 %v814_v30, 0.0 }
 0x147   : > { %2295 = vmatpush2.bf16.msra.mxu1 %v5089_v13  ;;  %v793_v13 = vadd.f32 %v6344_v41, %v792_v1  ;;  %v1307_v1 = vld [vmem:[#allocation6 + $0x150] sm:$0xff] }
 0x148   : > { %2296 = vmatprep.subr.bf16.mxu1 %v5082_v40  ;;  %v6423_v40 = vsub.s32 0, %v6419_v38 }
 0x149   : > { %v845_v16 = vmax.f32 %v793_v13, 0.0  ;;  %v1312_v13 = vld [vmem:[#allocation6 + $0x178] sm:$0xff] }
 0x14a   : > { %1079 = vmatmul.mubr.bf16.gmra.mxu1 %v859_v17  ;;  %v805_v17 = vpop.f32.mrf.mxu0  ;;  %8270 = vst [vmem:[#allocation17_spill] sm:$0xff] %v6423_v40  ;;  %v5054_v21 = vcombine.high %v1308_v12, %v1312_v13  ;;  %v5053_v7 = vcombine.low %v1308_v12, %v1312_v13  ;;  %v1275_v12 = vld [vmem:[#allocation6 + $0x50] sm:$0xff] }
 0x14b   : > { %1088 = vmatprep.mubr.bf16.mxu1 %v6126_v35  ;;  %2297 = vmatpush2.bf16.msra.mxu1 %v5081_v39  ;;  %v864_v19 = vpack.c.bf16 %v845_v16, %v844_v15  ;;  %v892_v39 = vsub.s32 1, %v6419_v38 }
 0x14c   : > { %2298 = vmatprep.subr.bf16.mxu1 %v5074_v52  ;;  %v5759_v20 = vpop.f32.mrf.mxu0 }
 0x14d   : > { %v817_v31 = vadd.f32 %v5759_v20, %v6344_v41 }
 0x14e   : > { %v808_v23 = vpop.f32.mrf.mxu0 }
 0x14f   : > { %2299 = vmatpush2.bf16.msra.mxu1 %v5073_v54  ;;  %v809_v27 = vadd.f32 %v6344_v41, %v808_v23  ;;  %v851_v34 = vmax.f32 %v817_v31, 0.0 }
 0x150   : > { %2654 = vmatprep.subr.bf16.mxu1 %v5070_v9 }
 0x151   : > { %v849_v29 = vmax.f32 %v809_v27, 0.0  ;;  %v867_v36 = vpack.c.bf16 %v851_v34, %v850_v33  ;;  %v1300_v27 = vld [vmem:[#allocation6 + $0x118] sm:$0xff] }
 0x152   : > { %1089 = vmatmul.mubr.bf16.gmra.mxu1 %v860_v25  ;;  %v806_v25 = vadd.f32 %v6344_v41, %v805_v17  ;;  %v884_v41 = vld [vmem:[%s8237_s4] sm:$0x3]  ;;  %v5059_v17 = vcombine.low %v1315_v53, %v1319_v56  ;;  %v1283_v53 = vld [vmem:[#allocation6 + $0x90] sm:$0xff] }
 0x153   : > { %1098 = vmatprep.mubr.bf16.mxu1 %v6126_v35  ;;  %v6433_v42 = vrot.slane %v884_v41, %v6423_v40  ;;  %v1287_v56 = vld [vmem:[#allocation6 + $0xb0] sm:$0xff] }
 0x154   : > { %v848_v28 = vmax.f32 %v806_v25, 0.0  ;;  %v1303_v25 = vld [vmem:[#allocation6 + $0x130] sm:$0xff] }
 0x155   : > { %v5044_v30 = vcombine.high %v1299_v22, %v1303_v25 }
 0x156   : > { %v866_v32 = vpack.c.bf16 %v849_v29, %v848_v28  ;;  %v1304_v28 = vld [vmem:[#allocation6 + $0x138] sm:$0xff] }
 0x157   : > { %v5046_v31 = vcombine.high %v1300_v27, %v1304_v28 }
 0x15a   : > { %1099 = vmatmul.mubr.bf16.gmra.mxu1 %v861_v44 }
 0x15b   : > { %1108 = vmatprep.mubr.bf16.mxu1 %v6126_v35 }
 0x162   : > { %1109 = vmatmul.mubr.bf16.gmra.mxu1 %v862_v61 }
 0x163   : > { %1118 = vmatprep.mubr.bf16.mxu1 %v6126_v35 }
 0x16a   : > { %1119 = vmatmul.mubr.bf16.gmra.mxu1 %v863_v11  ;;  %v1311_v11 = vld [vmem:[#allocation6 + $0x170] sm:$0xff] }
 0x16b   : > { %1128 = vmatprep.mubr.bf16.mxu1 %v6126_v35  ;;  %v5052_v20 = vcombine.high %v1307_v1, %v1311_v11  ;;  %v5051_v4 = vcombine.low %v1307_v1, %v1311_v11  ;;  %v5030_v11 = vcombine.high %v1284_v57, %v1288_v49 }
 0x172   : > { %1129 = vmatmul.mubr.bf16.gmra.mxu1 %v864_v19 }
 0x173   : > { %1138 = vmatprep.mubr.bf16.mxu1 %v6126_v35 }
 0x17a   : > { %1139 = vmatmul.mubr.bf16.gmra.mxu1 %v865_v24 }
 0x17b   : > { %1148 = vmatprep.mubr.bf16.mxu1 %v6126_v35 }
 0x182   : > { %1149 = vmatmul.mubr.bf16.gmra.mxu1 %v866_v32  ;;  %v1291_v32 = vld [vmem:[#allocation6 + $0xd0] sm:$0xff] }
 0x183   : > { %1158 = vmatprep.mubr.bf16.mxu1 %v6126_v35  ;;  %v6430_v35 = vrot.slane %v884_v41, %v892_v39  ;;  %v1292_v41 = vld [vmem:[#allocation6 + $0xd8] sm:$0xff] }
 0x18a   : > { %1159 = vmatmul.mubr.bf16.gmra.mxu1 %v867_v36  ;;  %v1295_v36 = vld [vmem:[#allocation6 + $0xf0] sm:$0xff] }
 0x1d2   : > { %v1010_v26 = vpop.f32.mrf.mxu1 }
 0x1d3   : > { %v1011_v47 = vadd.f32 %v1010_v26, %v6433_v42  ;;  %v1296_v26 = vld [vmem:[#allocation6 + $0xf8] sm:$0xff] }
 0x1d4   : > { %v1012_v43 = vpop.f32.mrf.mxu1 }
 0x1d5   : > { %v1013_v45 = vadd.f32 %v1012_v43, %v6430_v35  ;;  %v1169_v58 = vmax.f32 %v1011_v47, 0.0  ;;  %v5045_v47 = vcombine.low %v1300_v27, %v1304_v28  ;;  %v1267_v27 = vld [vmem:[#allocation6 + $0x10] sm:$0xff] }
 0x1d6   : > { %v1014_v44 = vpop.f32.mrf.mxu1 }
 0x1d7   : > { %v1015_v46 = vadd.f32 %v1014_v44, %v6433_v42  ;;  %v1170_v54 = vmax.f32 %v1013_v45, 0.0 }
 0x1d8   : > { %v1016_v48 = vpop.f32.mrf.mxu1 }
 0x1d9   : > { %v1017_v50 = vadd.f32 %v1016_v48, %v6430_v35  ;;  %v1171_v51 = vmax.f32 %v1015_v46, 0.0  ;;  %v5043_v46 = vcombine.low %v1299_v22, %v1303_v25 }
 0x1da   : > { %v1020_v52 = vpop.f32.mrf.mxu1 }
 0x1db   : > { %v1172_v55 = vmax.f32 %v1017_v50, 0.0  ;;  %v6441_v61 = vpack.c.bf16 %v1171_v51, %v1169_v58  ;;  %v1021_v14 = vadd.f32 %v1020_v52, %v6433_v42  ;;  %v5036_v51 = vcombine.high %v1291_v32, %v1295_v36 }
 0x1dc   : > { %v1022_v59 = vpop.f32.mrf.mxu1  ;;  %v5038_v52 = vcombine.high %v1292_v41, %v1296_v26 }
 0x1dd   : > { %v6439_v60 = vpack.c.bf16 %v1172_v55, %v1170_v54  ;;  %v1023_v6 = vadd.f32 %v1022_v59, %v6430_v35  ;;  %v1173_v2 = vmax.f32 %v1021_v14, 0.0 }
 0x1de   : > { %v1024_v62 = vpop.f32.mrf.mxu1 }
 0x1df   : > { %v1025_v9 = vadd.f32 %v1024_v62, %v6433_v42  ;;  %2107 = vmatprep.mubr.bf16.mxu0 %v6439_v60  ;;  %2300 = vmatprep.mubr.bf16.mxu1 %v6439_v60  ;;  %v1174_v23 = vmax.f32 %v1023_v6, 0.0 }
 0x1e0   : > { %v1026_v15 = vpop.f32.mrf.mxu1  ;;  %2108 = vmatmul.mubr.bf16.vlgmr.msra.gmra.mxu0 %v6441_v61  ;;  %2301 = vmatmul.mubr.bf16.vlgmr.msra.gmra.mxu1 %v6441_v61 }
 0x1e1   : > { %v1027_v16 = vadd.f32 %v1026_v15, %v6430_v35  ;;  %2462 = vmatpush1.bf16.msra.mxu0 %v5067_v5  ;;  %2655 = vmatpush1.bf16.msra.mxu1 %v5069_v8  ;;  %v1175_v10 = vmax.f32 %v1025_v9, 0.0  ;;  %v5028_v9 = vcombine.high %v1283_v53, %v1287_v56  ;;  %v1279_v15 = vld [vmem:[#allocation6 + $0x70] sm:$0xff] }
 0x1e2   : > { %v1030_v19 = vpop.f32.mrf.mxu1  ;;  %2463 = vmatprep.subr.bf16.mxu0 %v5060_v63  ;;  %2656 = vmatprep.subr.bf16.mxu1 %v5062_v0  ;;  %v5035_v63 = vcombine.low %v1291_v32, %v1295_v36  ;;  %v5037_v0 = vcombine.low %v1292_v41, %v1296_v26  ;;  %v5019_v32 = vcombine.low %v1275_v12, %v1279_v15 }
 0x1e3   : > { %v1176_v24 = vmax.f32 %v1027_v16, 0.0  ;;  %v6459_v8 = vpack.c.bf16 %v1175_v10, %v1173_v2  ;;  %v1031_v43 = vadd.f32 %v1030_v19, %v6433_v42  ;;  %v1276_v16 = vld [vmem:[#allocation6 + $0x58] sm:$0xff] }
 0x1e4   : > { %v1032_v3 = vpop.f32.mrf.mxu1 }
 0x1e5   : > { %v6457_v5 = vpack.c.bf16 %v1176_v24, %v1174_v23  ;;  %2464 = vmatpush1.bf16.msra.mxu0 %v5059_v17  ;;  %2657 = vmatpush1.bf16.msra.mxu1 %v5061_v18  ;;  %v1033_v33 = vadd.f32 %v1032_v3, %v6430_v35  ;;  %v1177_v58 = vmax.f32 %v1031_v43, 0.0  ;;  %v1280_v17 = vld [vmem:[#allocation6 + $0x78] sm:$0xff]  ;;  %v5020_v24 = vcombine.high %v1275_v12, %v1279_v15  ;;  %v1271_v3 = vld [vmem:[#allocation6 + $0x30] sm:$0xff] }
 0x1e6   : > { %v1034_v29 = vpop.f32.mrf.mxu1  ;;  %2465 = vmatprep.subr.bf16.mxu0 %v5052_v20  ;;  %2658 = vmatprep.subr.bf16.mxu1 %v5054_v21  ;;  %v5027_v20 = vcombine.low %v1283_v53, %v1287_v56  ;;  %v5029_v21 = vcombine.low %v1284_v57, %v1288_v49  ;;  %v5022_v25 = vcombine.high %v1276_v16, %v1280_v17  ;;  %v1387_v43 = vld [vmem:[#allocation6 + $0x3d0] sm:$0xff] }
 0x1e7   : > { %v1035_v34 = vadd.f32 %v1034_v29, %v6433_v42  ;;  %2117 = vmatprep.mubr.bf16.mxu0 %v6457_v5  ;;  %2310 = vmatprep.mubr.bf16.mxu1 %v6457_v5  ;;  %v1178_v54 = vmax.f32 %v1033_v33, 0.0  ;;  %v5021_v33 = vcombine.low %v1276_v16, %v1280_v17  ;;  %v5012_v41 = vcombine.high %v1267_v27, %v1271_v3 }
 0x1e8   : > { %v1036_v44 = vpop.f32.mrf.mxu1  ;;  %2118 = vmatmul.mubr.bf16.gmra.mxu0 %v6459_v8  ;;  %2311 = vmatmul.mubr.bf16.gmra.mxu1 %v6459_v8  ;;  %v5011_v53 = vcombine.low %v1267_v27, %v1271_v3 }
 0x1e9   : > { %v1037_v45 = vadd.f32 %v1036_v44, %v6430_v35  ;;  %2466 = vmatpush1.bf16.msra.mxu0 %v5051_v4  ;;  %2659 = vmatpush1.bf16.msra.mxu1 %v5053_v7  ;;  %v1179_v48 = vmax.f32 %v1035_v34, 0.0  ;;  %v1268_v4 = vld [vmem:[#allocation6 + $0x18] sm:$0xff] }
 0x1ea   : > { %v1040_v50 = vpop.f32.mrf.mxu1  ;;  %2467 = vmatprep.subr.bf16.mxu0 %v5044_v30  ;;  %2660 = vmatprep.subr.bf16.mxu1 %v5046_v31  ;;  %v1272_v7 = vld [vmem:[#allocation6 + $0x38] sm:$0xff] }
 0x1eb   : > { %v1180_v55 = vmax.f32 %v1037_v45, 0.0  ;;  %v6471_v1 = vpack.c.bf16 %v1179_v48, %v1177_v58  ;;  %v1041_v18 = vadd.f32 %v1040_v50, %v6433_v42  ;;  %v5014_v26 = vcombine.high %v1268_v4, %v1272_v7  ;;  %v1392_v48 = vld [vmem:[#allocation6 + $0x3f8] sm:$0xff]  ;;  %v1379_v58 = vld [vmem:[#allocation6 + $0x390] sm:$0xff] }
 0x1ec   : > { %v1042_v59 = vpop.f32.mrf.mxu1 }
 0x1ed   : > { %v6469_v62 = vpack.c.bf16 %v1180_v55, %v1178_v54  ;;  %2468 = vmatpush1.bf16.msra.mxu0 %v5043_v46  ;;  %2661 = vmatpush1.bf16.msra.mxu1 %v5045_v47  ;;  %v1043_v13 = vadd.f32 %v1042_v59, %v6430_v35  ;;  %v1181_v29 = vmax.f32 %v1041_v18, 0.0  ;;  %v1391_v46 = vld [vmem:[#allocation6 + $0x3f0] sm:$0xff]  ;;  %v1388_v47 = vld [vmem:[#allocation6 + $0x3d8] sm:$0xff]  ;;  %v5013_v54 = vcombine.low %v1268_v4, %v1272_v7 }
 0x1ee   : > { %v1044_v6 = vpop.f32.mrf.mxu1  ;;  %2469 = vmatprep.subr.bf16.mxu0 %v5036_v51  ;;  %2662 = vmatprep.subr.bf16.mxu1 %v5038_v52  ;;  %v5132_v57 = vcombine.high %v1387_v43, %v1391_v46  ;;  %v5134_v49 = vcombine.high %v1388_v47, %v1392_v48  ;;  %v5133_v15 = vcombine.low %v1388_v47, %v1392_v48 }
 0x1ef   : > { %v1045_v14 = vadd.f32 %v1044_v6, %v6433_v42  ;;  %2127 = vmatprep.mubr.bf16.mxu0 %v6469_v62  ;;  %2320 = vmatprep.mubr.bf16.mxu1 %v6469_v62  ;;  %v1182_v28 = vmax.f32 %v1043_v13, 0.0  ;;  %v1380_v6 = vld [vmem:[#allocation6 + $0x398] sm:$0xff] }
 0x1f0   : > { %v1046_v10 = vpop.f32.mrf.mxu1  ;;  %2128 = vmatmul.mubr.bf16.gmra.mxu0 %v6471_v1  ;;  %2321 = vmatmul.mubr.bf16.gmra.mxu1 %v6471_v1 }
 0x1f1   : > { %v1047_v19 = vadd.f32 %v1046_v10, %v6430_v35  ;;  %2470 = vmatpush1.bf16.msra.mxu0 %v5035_v63  ;;  %2663 = vmatpush1.bf16.msra.mxu1 %v5037_v0  ;;  %v1183_v22 = vmax.f32 %v1045_v14, 0.0  ;;  %v1383_v0 = vld [vmem:[#allocation6 + $0x3b0] sm:$0xff]  ;;  %v5131_v14 = vcombine.low %v1387_v43, %v1391_v46  ;;  %v1368_v43 = vld [vmem:[#allocation6 + $0x338] sm:$0xff] }
 0x1f2   : > { %v1050_v23 = vpop.f32.mrf.mxu1  ;;  %2471 = vmatprep.subr.bf16.mxu0 %v5028_v9  ;;  %2664 = vmatprep.subr.bf16.mxu1 %v5030_v11  ;;  %v1384_v9 = vld [vmem:[#allocation6 + $0x3b8] sm:$0xff]  ;;  %v5124_v18 = vcombine.high %v1379_v58, %v1383_v0 }
 0x1f3   : > { %v1184_v2 = vmax.f32 %v1047_v19, 0.0  ;;  %v6483_v34 = vpack.c.bf16 %v1183_v22, %v1181_v29  ;;  %v1051_v50 = vadd.f32 %v1050_v23, %v6433_v42  ;;  %v5126_v10 = vcombine.high %v1380_v6, %v1384_v9  ;;  %v1371_v19 = vld [vmem:[#allocation6 + $0x350] sm:$0xff]  ;;  %v1372_v23 = vld [vmem:[#allocation6 + $0x358] sm:$0xff] }
 0x1f4   : > { %v1052_v30 = vpop.f32.mrf.mxu1  ;;  %v1375_v22 = vld [vmem:[#allocation6 + $0x370] sm:$0xff]  ;;  %v5125_v3 = vcombine.low %v1380_v6, %v1384_v9 }
 0x1f5   : > { %v6481_v31 = vpack.c.bf16 %v1184_v2, %v1182_v28  ;;  %2472 = vmatpush1.bf16.msra.mxu0 %v5027_v20  ;;  %2665 = vmatpush1.bf16.msra.mxu1 %v5029_v21  ;;  %v1053_v44 = vadd.f32 %v1052_v30, %v6430_v35  ;;  %v1185_v11 = vmax.f32 %v1051_v50, 0.0  ;;  %v5123_v2 = vcombine.low %v1379_v58, %v1383_v0  ;;  %v1360_v58 = vld [vmem:[#allocation6 + $0x2f8] sm:$0xff] }
 0x1f6   : > { %v1054_v36 = vpop.f32.mrf.mxu1  ;;  %2473 = vmatprep.subr.bf16.mxu0 %v5020_v24  ;;  %2666 = vmatprep.subr.bf16.mxu1 %v5022_v25  ;;  %v1376_v24 = vld [vmem:[#allocation6 + $0x378] sm:$0xff]  ;;  %v5116_v29 = vcombine.high %v1371_v19, %v1375_v22  ;;  %v5115_v47 = vcombine.low %v1371_v19, %v1375_v22  ;;  %v1351_v19 = vld [vmem:[#allocation6 + $0x2b0] sm:$0xff] }
 0x1f7   : > { %v1055_v45 = vadd.f32 %v1054_v36, %v6433_v42  ;;  %2137 = vmatprep.mubr.bf16.mxu0 %v6481_v31  ;;  %2330 = vmatprep.mubr.bf16.mxu1 %v6481_v31  ;;  %v1186_v59 = vmax.f32 %v1053_v44, 0.0  ;;  %v5118_v30 = vcombine.high %v1372_v23, %v1376_v24  ;;  %v5117_v48 = vcombine.low %v1372_v23, %v1376_v24 }
 0x1f8   : > { %v1056_v51 = vpop.f32.mrf.mxu1  ;;  %2138 = vmatmul.mubr.bf16.gmra.mxu0 %v6483_v34  ;;  %2331 = vmatmul.mubr.bf16.gmra.mxu1 %v6483_v34 }
 0x1f9   : > { %v1057_v52 = vadd.f32 %v1056_v51, %v6430_v35  ;;  %2474 = vmatpush1.bf16.msra.mxu0 %v5019_v32  ;;  %2667 = vmatpush1.bf16.msra.mxu1 %v5021_v33  ;;  %v1187_v55 = vmax.f32 %v1055_v45, 0.0  ;;  %v1363_v32 = vld [vmem:[#allocation6 + $0x310] sm:$0xff] }
 0x1fa   : > { %v1060_v56 = vpop.f32.mrf.mxu1  ;;  %2475 = vmatprep.subr.bf16.mxu0 %v5012_v41  ;;  %2668 = vmatprep.subr.bf16.mxu1 %v5014_v26  ;;  %v1367_v41 = vld [vmem:[#allocation6 + $0x330] sm:$0xff]  ;;  %v1364_v26 = vld [vmem:[#allocation6 + $0x318] sm:$0xff] }
 0x1fb   : > { %v1188_v63 = vmax.f32 %v1057_v52, 0.0  ;;  %v6495_v16 = vpack.c.bf16 %v1187_v55, %v1185_v11  ;;  %v1061_v25 = vadd.f32 %v1060_v56, %v6433_v42  ;;  %v5108_v52 = vcombine.high %v1363_v32, %v1367_v41 }
 0x1fc   : > { %v1062_v12 = vpop.f32.mrf.mxu1  ;;  %v5107_v6 = vcombine.low %v1363_v32, %v1367_v41  ;;  %v5109_v9 = vcombine.low %v1364_v26, %v1368_v43  ;;  %v1343_v32 = vld [vmem:[#allocation6 + $0x270] sm:$0xff] }
 0x1fd   : > { %v6493_v13 = vpack.c.bf16 %v1188_v63, %v1186_v59  ;;  %2476 = vmatpush1.bf16.msra.mxu0 %v5011_v53  ;;  %2669 = vmatpush1.bf16.msra.mxu1 %v5013_v54  ;;  %v1063_v20 = vadd.f32 %v1062_v12, %v6430_v35  ;;  %v1189_v44 = vmax.f32 %v1061_v25, 0.0  ;;  %v5110_v53 = vcombine.high %v1364_v26, %v1368_v43  ;;  %v1355_v54 = vld [vmem:[#allocation6 + $0x2d0] sm:$0xff] }
 0x1fe   : > { %v1064_v17 = vpop.f32.mrf.mxu1  ;;  %2477 = vmatprep.subr.bf16.mxu0 %v5132_v57  ;;  %2670 = vmatprep.subr.bf16.mxu1 %v5134_v49  ;;  %v1359_v57 = vld [vmem:[#allocation6 + $0x2f0] sm:$0xff]  ;;  %v1356_v49 = vld [vmem:[#allocation6 + $0x2d8] sm:$0xff] }
 0x1ff   : > { %v1065_v21 = vadd.f32 %v1064_v17, %v6433_v42  ;;  %2147 = vmatprep.mubr.bf16.mxu0 %v6493_v13  ;;  %2340 = vmatprep.mubr.bf16.mxu1 %v6493_v13  ;;  %v1190_v33 = vmax.f32 %v1063_v20, 0.0  ;;  %v1347_v17 = vld [vmem:[#allocation6 + $0x290] sm:$0xff]  ;;  %v1348_v20 = vld [vmem:[#allocation6 + $0x298] sm:$0xff]  ;;  %v5099_v25 = vcombine.low %v1355_v54, %v1359_v57 }
 0x200   : > { %v1066_v27 = vpop.f32.mrf.mxu1  ;;  %2148 = vmatmul.mubr.bf16.gmra.mxu0 %v6495_v16  ;;  %2341 = vmatmul.mubr.bf16.gmra.mxu1 %v6495_v16 }
 0x201   : > { %v1067_v28 = vadd.f32 %v1066_v27, %v6430_v35  ;;  %2478 = vmatpush2.bf16.msra.mxu0 %v5131_v14  ;;  %2671 = vmatpush2.bf16.msra.mxu1 %v5133_v15  ;;  %v1191_v4 = vmax.f32 %v1065_v21, 0.0  ;;  %v5100_v14 = vcombine.high %v1355_v54, %v1359_v57  ;;  %v5102_v15 = vcombine.high %v1356_v49, %v1360_v58  ;;  %v1352_v21 = vld [vmem:[#allocation6 + $0x2b8] sm:$0xff] }
 0x202   : > { %v1070_v7 = vpop.f32.mrf.mxu1  ;;  %2479 = vmatprep.subr.bf16.mxu0 %v5124_v18  ;;  %2672 = vmatprep.subr.bf16.mxu1 %v5126_v10  ;;  %v5101_v27 = vcombine.low %v1356_v49, %v1360_v58  ;;  %v1332_v57 = vld [vmem:[#allocation6 + $0x218] sm:$0xff] }
 0x203   : > { %v1192_v36 = vmax.f32 %v1067_v28, 0.0  ;;  %v6507_v50 = vpack.c.bf16 %v1191_v4, %v1189_v44  ;;  %v1071_v59 = vadd.f32 %v1070_v7, %v6433_v42  ;;  %v5094_v4 = vcombine.high %v1348_v20, %v1352_v21  ;;  %v1339_v7 = vld [vmem:[#allocation6 + $0x250] sm:$0xff]  ;;  %v1336_v49 = vld [vmem:[#allocation6 + $0x238] sm:$0xff] }
 0x204   : > { %v1072_v45 = vpop.f32.mrf.mxu1  ;;  %v5091_v44 = vcombine.low %v1347_v17, %v1351_v19 }
 0x205   : > { %v6505_v46 = vpack.c.bf16 %v1192_v36, %v1190_v33  ;;  %2480 = vmatpush2.bf16.msra.mxu0 %v5123_v2  ;;  %2673 = vmatpush2.bf16.msra.mxu1 %v5125_v3  ;;  %v1073_v55 = vadd.f32 %v1072_v45, %v6430_v35  ;;  %v1193_v22 = vmax.f32 %v1071_v59, 0.0  ;;  %v5092_v3 = vcombine.high %v1347_v17, %v1351_v19  ;;  %v1340_v33 = vld [vmem:[#allocation6 + $0x258] sm:$0xff] }
 0x206   : > { %v1074_v51 = vpop.f32.mrf.mxu1  ;;  %2481 = vmatprep.subr.bf16.mxu0 %v5116_v29  ;;  %2674 = vmatprep.subr.bf16.mxu1 %v5118_v30  ;;  %v1344_v36 = vld [vmem:[#allocation6 + $0x278] sm:$0xff]  ;;  %v5093_v45 = vcombine.low %v1348_v20, %v1352_v21  ;;  %v5077_v21 = vcombine.low %v1332_v57, %v1336_v49 }
 0x207   : > { %v1075_v56 = vadd.f32 %v1074_v51, %v6433_v42  ;;  %2157 = vmatprep.mubr.bf16.mxu0 %v6505_v46  ;;  %2350 = vmatprep.mubr.bf16.mxu1 %v6505_v46  ;;  %v1194_v18 = vmax.f32 %v1073_v55, 0.0  ;;  %v5084_v51 = vcombine.high %v1339_v7, %v1343_v32 }
 0x208   : > { %v1076_v63 = vpop.f32.mrf.mxu1  ;;  %2158 = vmatmul.mubr.bf16.gmra.mxu0 %v6507_v50  ;;  %2351 = vmatmul.mubr.bf16.gmra.mxu1 %v6507_v50 }
 0x209   : > { %v1077_v0 = vadd.f32 %v1076_v63, %v6430_v35  ;;  %2482 = vmatpush2.bf16.msra.mxu0 %v5115_v47  ;;  %2675 = vmatpush2.bf16.msra.mxu1 %v5117_v48  ;;  %v1195_v11 = vmax.f32 %v1075_v56, 0.0  ;;  %v1335_v56 = vld [vmem:[#allocation6 + $0x230] sm:$0xff] }
 0x20a   : > { %v1080_v12 = vpop.f32.mrf.mxu1  ;;  %2483 = vmatprep.subr.bf16.mxu0 %v5108_v52  ;;  %2676 = vmatprep.subr.bf16.mxu1 %v5110_v53  ;;  %v5086_v52 = vcombine.high %v1340_v33, %v1344_v36  ;;  %v1331_v53 = vld [vmem:[#allocation6 + $0x210] sm:$0xff] }
 0x20b   : > { %v1196_v10 = vmax.f32 %v1077_v0, 0.0  ;;  %v6519_v28 = vpack.c.bf16 %v1195_v11, %v1193_v22  ;;  %v1081_v41 = vadd.f32 %v1080_v12, %v6433_v42  ;;  %v5083_v0 = vcombine.low %v1339_v7, %v1343_v32 }
 0x20c   : > { %v1082_v23 = vpop.f32.mrf.mxu1  ;;  %v5076_v12 = vcombine.high %v1331_v53, %v1335_v56  ;;  %v5075_v20 = vcombine.low %v1331_v53, %v1335_v56 }
 0x20d   : > { %v6517_v24 = vpack.c.bf16 %v1196_v10, %v1194_v18  ;;  %2484 = vmatpush2.bf16.msra.mxu0 %v5107_v6  ;;  %2677 = vmatpush2.bf16.msra.mxu1 %v5109_v9  ;;  %v1083_v29 = vadd.f32 %v1082_v23, %v6430_v35  ;;  %v1197_v58 = vmax.f32 %v1081_v41, 0.0  ;;  %v5085_v6 = vcombine.low %v1340_v33, %v1344_v36 }
 0x20e   : > { %v1084_v2 = vpop.f32.mrf.mxu1  ;;  %2485 = vmatprep.subr.bf16.mxu0 %v5100_v14  ;;  %2678 = vmatprep.subr.bf16.mxu1 %v5102_v15  ;;  %v5078_v14 = vcombine.high %v1332_v57, %v1336_v49 }
 0x20f   : > { %v1085_v30 = vadd.f32 %v1084_v2, %v6433_v42  ;;  %2167 = vmatprep.mubr.bf16.mxu0 %v6517_v24  ;;  %2360 = vmatprep.mubr.bf16.mxu1 %v6517_v24  ;;  %v1198_v54 = vmax.f32 %v1083_v29, 0.0 }
 0x210   : > { %v1086_v26 = vpop.f32.mrf.mxu1  ;;  %2168 = vmatmul.mubr.bf16.gmra.mxu0 %v6519_v28  ;;  %2361 = vmatmul.mubr.bf16.gmra.mxu1 %v6519_v28 }
 0x211   : > { %v1087_v43 = vadd.f32 %v1086_v26, %v6430_v35  ;;  %2486 = vmatpush2.bf16.msra.mxu0 %v5099_v25  ;;  %2679 = vmatpush2.bf16.msra.mxu1 %v5101_v27  ;;  %v1199_v47 = vmax.f32 %v1085_v30, 0.0  ;;  %v5925_v25 = vld [vmem:[%s8240_s7 + $0x78] sm:$0xff]  }
 0x212   : > { %v1090_v48 = vpop.f32.mrf.mxu1  ;;  %2487 = vmatprep.subr.bf16.mxu0 %v5092_v3  ;;  %2680 = vmatprep.subr.bf16.mxu1 %v5094_v4  ;;  %v5927_v27 = vld [vmem:[%s8240_s7 + $0xf8] sm:$0xff]  }
 0x213   : > { %v1200_v55 = vmax.f32 %v1087_v43, 0.0  ;;  %v6531_v9 = vpack.c.bf16 %v1199_v47, %v1197_v58  ;;  %v1091_v18 = vadd.f32 %v1090_v48, %v6433_v42 }
 0x214   : > { %v1092_v59 = vpop.f32.mrf.mxu1 }
 0x215   : > { %v6529_v63 = vpack.c.bf16 %v1200_v55, %v1198_v54  ;;  %2488 = vmatpush2.bf16.msra.mxu0 %v5091_v44  ;;  %2681 = vmatpush2.bf16.msra.mxu1 %v5093_v45  ;;  %v1093_v15 = vadd.f32 %v1092_v59, %v6430_v35  ;;  %v1201_v4 = vmax.f32 %v1091_v18, 0.0 }
 0x216   : > { %v1094_v11 = vpop.f32.mrf.mxu1  ;;  %2489 = vmatprep.subr.bf16.mxu0 %v5084_v51  ;;  %2682 = vmatprep.subr.bf16.mxu1 %v5086_v52 }
 0x217   : > { %v1095_v17 = vadd.f32 %v1094_v11, %v6433_v42  ;;  %2177 = vmatprep.mubr.bf16.mxu0 %v6529_v63  ;;  %2370 = vmatprep.mubr.bf16.mxu1 %v6529_v63  ;;  %v1202_v2 = vmax.f32 %v1093_v15, 0.0 }
 0x218   : > { %v1096_v10 = vpop.f32.mrf.mxu1  ;;  %2178 = vmatmul.mubr.bf16.gmra.mxu0 %v6531_v9  ;;  %2371 = vmatmul.mubr.bf16.gmra.mxu1 %v6531_v9 }
 0x219   : > { %v1097_v19 = vadd.f32 %v1096_v10, %v6430_v35  ;;  %2490 = vmatpush2.bf16.msra.mxu0 %v5083_v0  ;;  %2683 = vmatpush2.bf16.msra.mxu1 %v5085_v6  ;;  %v1203_v22 = vmax.f32 %v1095_v17, 0.0 }
 0x21a   : > { %v1100_v23 = vpop.f32.mrf.mxu1  ;;  %2491 = vmatprep.subr.bf16.mxu0 %v5076_v12  ;;  %2684 = vmatprep.subr.bf16.mxu1 %v5078_v14 }
 0x21b   : > { %v1204_v3 = vmax.f32 %v1097_v19, 0.0  ;;  %v6549_v30 = vpack.c.bf16 %v1203_v22, %v1201_v4  ;;  %v1101_v41 = vadd.f32 %v1100_v23, %v6433_v42 }
 0x21c   : > { %v1102_v7 = vpop.f32.mrf.mxu1 }
 0x21d   : > { %v6547_v29 = vpack.c.bf16 %v1204_v3, %v1202_v2  ;;  %2492 = vmatpush2.bf16.msra.mxu0 %v5075_v20  ;;  %2685 = vmatpush2.bf16.msra.mxu1 %v5077_v21  ;;  %v1103_v33 = vadd.f32 %v1102_v7, %v6430_v35  ;;  %v1205_v51 = vmax.f32 %v1101_v41, 0.0 }
 0x21e   : > { %v1104_v32 = vpop.f32.mrf.mxu1  ;;  %5234 = vmatprep.subr.bf16.mxu0 %v5925_v25  ;;  %5346 = vmatprep.subr.bf16.mxu1 %v5927_v27 }
 0x21f   : > { %v1105_v36 = vadd.f32 %v1104_v32, %v6433_v42  ;;  %2187 = vmatprep.mubr.bf16.mxu0 %v6547_v29  ;;  %2380 = vmatprep.mubr.bf16.mxu1 %v6547_v29  ;;  %v1206_v47 = vmax.f32 %v1103_v33, 0.0 }
 0x220   : > { %v1106_v26 = vpop.f32.mrf.mxu1  ;;  %2188 = vmatmul.mubr.bf16.gmra.mxu0 %v6549_v30  ;;  %2381 = vmatmul.mubr.bf16.gmra.mxu1 %v6549_v30 }
 0x221   : > { %v1107_v43 = vadd.f32 %v1106_v26, %v6430_v35  ;;  %v1207_v44 = vmax.f32 %v1105_v36, 0.0 }
 0x222   : > { %v1110_v45 = vpop.f32.mrf.mxu1 }
 0x223   : > { %v1208_v48 = vmax.f32 %v1107_v43, 0.0  ;;  %v6561_v54 = vpack.c.bf16 %v1207_v44, %v1205_v51  ;;  %v1111_v49 = vadd.f32 %v1110_v45, %v6433_v42 }
 0x224   : > { %v1112_v52 = vpop.f32.mrf.mxu1 }
 0x225   : > { %v6559_v53 = vpack.c.bf16 %v1208_v48, %v1206_v47  ;;  %v1113_v56 = vadd.f32 %v1112_v52, %v6430_v35  ;;  %v1209_v14 = vmax.f32 %v1111_v49, 0.0 }
 0x226   : > { %v1114_v55 = vpop.f32.mrf.mxu1 }
 0x227   : > { %v1115_v57 = vadd.f32 %v1114_v55, %v6433_v42  ;;  %2197 = vmatprep.mubr.bf16.mxu0 %v6559_v53  ;;  %2390 = vmatprep.mubr.bf16.mxu1 %v6559_v53  ;;  %v1210_v11 = vmax.f32 %v1113_v56, 0.0 }
 0x228   : > { %v1116_v58 = vpop.f32.mrf.mxu1  ;;  %2198 = vmatmul.mubr.bf16.gmra.mxu0 %v6561_v54  ;;  %2391 = vmatmul.mubr.bf16.gmra.mxu1 %v6561_v54 }
 0x229   : > { %v1117_v59 = vadd.f32 %v1116_v58, %v6430_v35  ;;  %v1211_v0 = vmax.f32 %v1115_v57, 0.0 }
 0x22a   : > { %v1120_v6 = vpop.f32.mrf.mxu1 }
 0x22b   : > { %v1212_v12 = vmax.f32 %v1117_v59, 0.0  ;;  %v6573_v18 = vpack.c.bf16 %v1211_v0, %v1209_v14  ;;  %v1121_v21 = vadd.f32 %v1120_v6, %v6433_v42 }
 0x22c   : > { %v1122_v15 = vpop.f32.mrf.mxu1 }
 0x22d   : > { %v6571_v17 = vpack.c.bf16 %v1212_v12, %v1210_v11  ;;  %v1123_v19 = vadd.f32 %v1122_v15, %v6430_v35  ;;  %v1213_v4 = vmax.f32 %v1121_v21, 0.0 }
 0x22e   : > { %v1124_v10 = vpop.f32.mrf.mxu1 }
 0x22f   : > { %v1125_v20 = vadd.f32 %v1124_v10, %v6433_v42  ;;  %2207 = vmatprep.mubr.bf16.mxu0 %v6571_v17  ;;  %2400 = vmatprep.mubr.bf16.mxu1 %v6571_v17  ;;  %v1214_v2 = vmax.f32 %v1123_v19, 0.0 }
 0x230   : > { %v1126_v22 = vpop.f32.mrf.mxu1  ;;  %2208 = vmatmul.mubr.bf16.gmra.mxu0 %v6573_v18  ;;  %2401 = vmatmul.mubr.bf16.gmra.mxu1 %v6573_v18 }
 0x231   : > { %v1127_v23 = vadd.f32 %v1126_v22, %v6430_v35  ;;  %v1215_v25 = vmax.f32 %v1125_v20, 0.0 }
 0x232   : > { %v1130_v27 = vpop.f32.mrf.mxu1 }
 0x233   : > { %v1216_v3 = vmax.f32 %v1127_v23, 0.0  ;;  %v6585_v33 = vpack.c.bf16 %v1215_v25, %v1213_v4  ;;  %v1131_v43 = vadd.f32 %v1130_v27, %v6433_v42 }
 0x234   : > { %v1132_v7 = vpop.f32.mrf.mxu1 }
 0x235   : > { %v6583_v32 = vpack.c.bf16 %v1216_v3, %v1214_v2  ;;  %v1133_v41 = vadd.f32 %v1132_v7, %v6430_v35  ;;  %v1217_v55 = vmax.f32 %v1131_v43, 0.0 }
 0x236   : > { %v1134_v36 = vpop.f32.mrf.mxu1 }
 0x237   : > { %v1135_v26 = vadd.f32 %v1134_v36, %v6433_v42  ;;  %2217 = vmatprep.mubr.bf16.mxu0 %v6583_v32  ;;  %2410 = vmatprep.mubr.bf16.mxu1 %v6583_v32  ;;  %v1218_v51 = vmax.f32 %v1133_v41, 0.0 }
 0x238   : > { %v1136_v44 = vpop.f32.mrf.mxu1  ;;  %2218 = vmatmul.mubr.bf16.gmra.mxu0 %v6585_v33  ;;  %2411 = vmatmul.mubr.bf16.gmra.mxu1 %v6585_v33 }
 0x239   : > { %v1137_v45 = vadd.f32 %v1136_v44, %v6430_v35  ;;  %v1219_v47 = vmax.f32 %v1135_v26, 0.0 }
 0x23a   : > { %v1140_v48 = vpop.f32.mrf.mxu1 }
 0x23b   : > { %v1220_v52 = vmax.f32 %v1137_v45, 0.0  ;;  %v6597_v49 = vpack.c.bf16 %v1219_v47, %v1217_v55  ;;  %v1141_v6 = vadd.f32 %v1140_v48, %v6433_v42 }
 0x23c   : > { %v1142_v56 = vpop.f32.mrf.mxu1 }
 0x23d   : > { %v6595_v57 = vpack.c.bf16 %v1220_v52, %v1218_v51  ;;  %v1143_v59 = vadd.f32 %v1142_v56, %v6430_v35  ;;  %v1221_v20 = vmax.f32 %v1141_v6, 0.0 }
 0x23e   : > { %v1144_v58 = vpop.f32.mrf.mxu1 }
 0x23f   : > { %v1145_v0 = vadd.f32 %v1144_v58, %v6433_v42  ;;  %2227 = vmatprep.mubr.bf16.mxu0 %v6595_v57  ;;  %2420 = vmatprep.mubr.bf16.mxu1 %v6595_v57  ;;  %v1222_v10 = vmax.f32 %v1143_v59, 0.0 }
 0x240   : > { %v1146_v11 = vpop.f32.mrf.mxu1  ;;  %2228 = vmatmul.mubr.bf16.gmra.mxu0 %v6597_v49  ;;  %2421 = vmatmul.mubr.bf16.gmra.mxu1 %v6597_v49 }
 0x241   : > { %v1147_v12 = vadd.f32 %v1146_v11, %v6430_v35  ;;  %v1223_v14 = vmax.f32 %v1145_v0, 0.0 }
 0x242   : > { %v1150_v15 = vpop.f32.mrf.mxu1 }
 0x243   : > { %v1224_v19 = vmax.f32 %v1147_v12, 0.0  ;;  %v6609_v23 = vpack.c.bf16 %v1223_v14, %v1221_v20  ;;  %v1151_v3 = vadd.f32 %v1150_v15, %v6433_v42  ;;  %v5932_v20 = vld [vmem:[%s8240_s7 + $0xb0] sm:$0xff]  }
 0x244   : > { %v1152_v21 = vpop.f32.mrf.mxu1 }
 0x245   : > { %v6607_v22 = vpack.c.bf16 %v1224_v19, %v1222_v10  ;;  %v1153_v27 = vadd.f32 %v1152_v21, %v6430_v35  ;;  %v1225_v44 = vmax.f32 %v1151_v3, 0.0  ;;  %v5929_v10 = vld [vmem:[%s8240_s7 + $0x70] sm:$0xff]   ;;  %v5934_v21 = vld [vmem:[%s8240_s7 + $0x28] sm:$0xff]   ;;  %v5938_v3 = vld [vmem:[%s8240_s7 + $0x20] sm:$0xff]  }
 0x246   : > { %v1154_v25 = vpop.f32.mrf.mxu1  ;;  %v5931_v19 = vld [vmem:[%s8240_s7 + $0xf0] sm:$0xff]  }
 0x247   : > { %v1155_v2 = vadd.f32 %v1154_v25, %v6433_v42  ;;  %2237 = vmatprep.mubr.bf16.mxu0 %v6607_v22  ;;  %2430 = vmatprep.mubr.bf16.mxu1 %v6607_v22  ;;  %v1226_v26 = vmax.f32 %v1153_v27, 0.0  ;;  %v5936_v25 = vld [vmem:[%s8240_s7 + $0xa8] sm:$0xff]   ;;  %v5937_v27 = vld [vmem:[%s8240_s7 + $0x60] sm:$0xff]  }
 0x248   : > { %v1156_v4 = vpop.f32.mrf.mxu1  ;;  %2238 = vmatmul.mubr.bf16.gmra.mxu0 %v6609_v23  ;;  %2431 = vmatmul.mubr.bf16.gmra.mxu1 %v6609_v23 }
 0x249   : > { %v1157_v7 = vadd.f32 %v1156_v4, %v6430_v35  ;;  %v1227_v36 = vmax.f32 %v1155_v2, 0.0  ;;  %v5939_v2 = vld [vmem:[%s8240_s7 + $0xe0] sm:$0xff]  }
 0x24a   : > { %v1160_v41 = vpop.f32.mrf.mxu1  ;;  %v5940_v4 = vld [vmem:[%s8240_s7 + $0xa0] sm:$0xff]  }
 0x24b   : > { %v1228_v43 = vmax.f32 %v1157_v7, 0.0  ;;  %v6621_v48 = vpack.c.bf16 %v1227_v36, %v1225_v44  ;;  %v1161_v56 = vadd.f32 %v1160_v41, %v6433_v42  ;;  %v5942_v7 = vld [vmem:[%s8240_s7 + $0x18] sm:$0xff]   ;;  %v5945_v41 = vld [vmem:[%s8240_s7 + $0x50] sm:$0xff]  }
 0x24c   : > { %v1162_v45 = vpop.f32.mrf.mxu1  ;;  %v5944_v36 = vld [vmem:[%s8240_s7 + $0x98] sm:$0xff]   ;;  %v5948_v44 = vld [vmem:[%s8240_s7 + $0x90] sm:$0xff]  }
 0x24d   : > { %v6619_v47 = vpack.c.bf16 %v1228_v43, %v1226_v26  ;;  %v1163_v52 = vadd.f32 %v1162_v45, %v6430_v35  ;;  %v1229_v12 = vmax.f32 %v1161_v56, 0.0  ;;  %v5947_v26 = vld [vmem:[%s8240_s7 + $0xd0] sm:$0xff]   ;;  %v5950_v45 = vld [vmem:[%s8240_s7 + $0x8] sm:$0xff]   ;;  %v5954_v56 = vld [vmem:[%s8240_s7] sm:$0xff]  }
 0x24e   : > { %v1164_v51 = vpop.f32.mrf.mxu1  ;;  %v5946_v43 = vld [vmem:[%s8240_s7 + $0x10] sm:$0xff]  }
 0x24f   : > { %v1165_v55 = vadd.f32 %v1164_v51, %v6433_v42  ;;  %2247 = vmatprep.mubr.bf16.mxu0 %v6619_v47  ;;  %2440 = vmatprep.mubr.bf16.mxu1 %v6619_v47  ;;  %v1230_v6 = vmax.f32 %v1163_v52, 0.0  ;;  %v5928_v42 = vld [vmem:[%s8240_s7 + $0xb8] sm:$0xff]   ;;  %v5952_v51 = vld [vmem:[%s8240_s7 + $0x88] sm:$0xff]   ;;  %v5953_v52 = vld [vmem:[%s8240_s7 + $0x40] sm:$0xff]  }
 0x250   : > { %v1166_v58 = vpop.f32.mrf.mxu1  ;;  %2248 = vmatmul.mubr.bf16.gmra.mxu0 %v6621_v48  ;;  %2441 = vmatmul.mubr.bf16.gmra.mxu1 %v6621_v48 }
 0x251   : > { %v1167_v59 = vadd.f32 %v1166_v58, %v6430_v35  ;;  %v1231_v0 = vmax.f32 %v1165_v55, 0.0  ;;  %v5926_v35 = vld [vmem:[%s8240_s7 + $0x38] sm:$0xff]   ;;  %v5955_v55 = vld [vmem:[%s8240_s7 + $0xc0] sm:$0xff]  }
 0x252   : > { %v5956_v58 = vld [vmem:[%s8240_s7 + $0x80] sm:$0xff]  }
 0x253   : > { %v1232_v11 = vmax.f32 %v1167_v59, 0.0  ;;  %v6633_v15 = vpack.c.bf16 %v1231_v0, %v1229_v12 }
 0x255   : > { %v6631_v14 = vpack.c.bf16 %v1232_v11, %v1230_v6 }
 0x257   : > { %2257 = vmatprep.mubr.bf16.mxu0 %v6631_v14  ;;  %2450 = vmatprep.mubr.bf16.mxu1 %v6631_v14 }
 0x258   : > { %2258 = vmatmul.mubr.bf16.gmra.mxu0 %v6633_v15  ;;  %2451 = vmatmul.mubr.bf16.gmra.mxu1 %v6633_v15 }
 0x259   : > { %2493 = vmatprep.mubr.bf16.mxu0 %v6439_v60  ;;  %2686 = vmatprep.mubr.bf16.mxu1 %v6439_v60  ;;  %v5930_v60 = vld [vmem:[%s8240_s7 + $0x30] sm:$0xff]  }
 0x260   : > { %2494 = vmatmul.mubr.bf16.vlgmr.msra.gmra.mxu0 %v6441_v61  ;;  %2687 = vmatmul.mubr.bf16.vlgmr.msra.gmra.mxu1 %v6441_v61  ;;  %v5933_v61 = vld [vmem:[%s8240_s7 + $0x68] sm:$0xff]  }
 0x261   : > { %2503 = vmatprep.mubr.bf16.mxu0 %v6457_v5  ;;  %2696 = vmatprep.mubr.bf16.mxu1 %v6457_v5  ;;  %v5935_v5 = vld [vmem:[%s8240_s7 + $0xe8] sm:$0xff]  }
 0x262   : > { %5235 = vmatpush3.bf16.msra.mxu0 %v5926_v35  ;;  %5347 = vmatpush3.bf16.msra.mxu1 %v5928_v42 }
 0x263   : > { %5236 = vmatprep.subr.bf16.mxu0 %v5929_v10  ;;  %5348 = vmatprep.subr.bf16.mxu1 %v5931_v19 }
 0x266   : > { %5237 = vmatpush3.bf16.msra.mxu0 %v5930_v60  ;;  %5349 = vmatpush3.bf16.msra.mxu1 %v5932_v20 }
 0x267   : > { %5238 = vmatprep.subr.bf16.mxu0 %v5933_v61  ;;  %5350 = vmatprep.subr.bf16.mxu1 %v5935_v5 }
 0x268   : > { %2504 = vmatmul.mubr.bf16.gmra.mxu0 %v6459_v8  ;;  %2697 = vmatmul.mubr.bf16.gmra.mxu1 %v6459_v8  ;;  %v5941_v8 = vld [vmem:[%s8240_s7 + $0x58] sm:$0xff]  }
 0x269   : > { %2513 = vmatprep.mubr.bf16.mxu0 %v6469_v62  ;;  %2706 = vmatprep.mubr.bf16.mxu1 %v6469_v62  ;;  %v5943_v62 = vld [vmem:[%s8240_s7 + $0xd8] sm:$0xff]  }
 0x26a   : > { %5239 = vmatpush3.bf16.msra.mxu0 %v5934_v21  ;;  %5351 = vmatpush3.bf16.msra.mxu1 %v5936_v25 }
 0x26b   : > { %5240 = vmatprep.subr.bf16.mxu0 %v5937_v27  ;;  %5352 = vmatprep.subr.bf16.mxu1 %v5939_v2 }
 0x26e   : > { %5241 = vmatpush3.bf16.msra.mxu0 %v5938_v3  ;;  %5353 = vmatpush3.bf16.msra.mxu1 %v5940_v4 }
 0x26f   : > { %5242 = vmatprep.subr.bf16.mxu0 %v5941_v8  ;;  %5354 = vmatprep.subr.bf16.mxu1 %v5943_v62 }
 0x270   : > { %2514 = vmatmul.mubr.bf16.gmra.mxu0 %v6471_v1  ;;  %2707 = vmatmul.mubr.bf16.gmra.mxu1 %v6471_v1  ;;  %v5949_v1 = vld [vmem:[%s8240_s7 + $0x48] sm:$0xff]  }
 0x271   : > { %2523 = vmatprep.mubr.bf16.mxu0 %v6481_v31  ;;  %2716 = vmatprep.mubr.bf16.mxu1 %v6481_v31  ;;  %v5951_v31 = vld [vmem:[%s8240_s7 + $0xc8] sm:$0xff]  }
 0x272   : > { %5243 = vmatpush3.bf16.msra.mxu0 %v5942_v7  ;;  %5355 = vmatpush3.bf16.msra.mxu1 %v5944_v36 }
 0x273   : > { %5244 = vmatprep.subr.bf16.mxu0 %v5945_v41  ;;  %5356 = vmatprep.subr.bf16.mxu1 %v5947_v26 }
 0x276   : > { %5245 = vmatpush3.bf16.msra.mxu0 %v5946_v43  ;;  %5357 = vmatpush3.bf16.msra.mxu1 %v5948_v44 }
 0x277   : > { %5246 = vmatprep.subr.bf16.mxu0 %v5949_v1  ;;  %5358 = vmatprep.subr.bf16.mxu1 %v5951_v31  ;;  %v1393_v1 = vld [vmem:[%s8239_s6] sm:$0xff] }
 0x278   : > { %2524 = vmatmul.mubr.bf16.gmra.mxu0 %v6483_v34  ;;  %2717 = vmatmul.mubr.bf16.gmra.mxu1 %v6483_v34  ;;  %v5957_v34 = vld [vmem:[%s8240_s7 + $0x178] sm:$0xff]  }
 0x279   : > { %2533 = vmatprep.mubr.bf16.mxu0 %v6493_v13  ;;  %2726 = vmatprep.mubr.bf16.mxu1 %v6493_v13  ;;  %v5959_v13 = vld [vmem:[%s8240_s7 + $0x1f8] sm:$0xff]  }
 0x27a   : > { %5247 = vmatpush3.bf16.msra.mxu0 %v5950_v45  ;;  %5359 = vmatpush3.bf16.msra.mxu1 %v5952_v51 }
 0x27b   : > { %5248 = vmatprep.subr.bf16.mxu0 %v5953_v52  ;;  %5360 = vmatprep.subr.bf16.mxu1 %v5955_v55 }
 0x27e   : > { %5249 = vmatpush3.bf16.msra.mxu0 %v5954_v56  ;;  %5361 = vmatpush3.bf16.msra.mxu1 %v5956_v58  ;;  %v1405_v58 = vsub.s32 2, %v6419_v38 }
 0x27f   : > { %5458 = vmatprep.subr.bf16.mxu0 %v5957_v34  ;;  %5570 = vmatprep.subr.bf16.mxu1 %v5959_v13 }
 0x280   : > { %2534 = vmatmul.mubr.bf16.gmra.mxu0 %v6495_v16  ;;  %2727 = vmatmul.mubr.bf16.gmra.mxu1 %v6495_v16 }
 0x281   : > { %2543 = vmatprep.mubr.bf16.mxu0 %v6505_v46  ;;  %2736 = vmatprep.mubr.bf16.mxu1 %v6505_v46 }
 0x288   : > { %2544 = vmatmul.mubr.bf16.gmra.mxu0 %v6507_v50  ;;  %2737 = vmatmul.mubr.bf16.gmra.mxu1 %v6507_v50 }
 0x289   : > { %2553 = vmatprep.mubr.bf16.mxu0 %v6517_v24  ;;  %2746 = vmatprep.mubr.bf16.mxu1 %v6517_v24 }
 0x290   : > { %2554 = vmatmul.mubr.bf16.gmra.mxu0 %v6519_v28  ;;  %2747 = vmatmul.mubr.bf16.gmra.mxu1 %v6519_v28 }
 0x291   : > { %2563 = vmatprep.mubr.bf16.mxu0 %v6529_v63  ;;  %2756 = vmatprep.mubr.bf16.mxu1 %v6529_v63 }
 0x298   : > { %2564 = vmatmul.mubr.bf16.gmra.mxu0 %v6531_v9  ;;  %2757 = vmatmul.mubr.bf16.gmra.mxu1 %v6531_v9 }
 0x299   : > { %2573 = vmatprep.mubr.bf16.mxu0 %v6547_v29  ;;  %2766 = vmatprep.mubr.bf16.mxu1 %v6547_v29 }
 0x2a0   : > { %v6769_v16 = vpop.f32.mrf.mxu0  ;;  %v6771_v46 = vpop.f32.mrf.mxu1  ;;  %2574 = vmatmul.mubr.bf16.gmra.mxu0 %v6549_v30  ;;  %2767 = vmatmul.mubr.bf16.gmra.mxu1 %v6549_v30 }
 0x2a1   : > { %2583 = vmatprep.mubr.bf16.mxu0 %v6559_v53  ;;  %2776 = vmatprep.mubr.bf16.mxu1 %v6559_v53 }
 0x2a2   : > { %v6777_v50 = vpop.f32.mrf.mxu0  ;;  %v6779_v24 = vpop.f32.mrf.mxu1 }
 0x2a4   : > { %v6781_v28 = vpop.f32.mrf.mxu0  ;;  %v6783_v63 = vpop.f32.mrf.mxu1 }
 0x2a6   : > { %v6785_v9 = vpop.f32.mrf.mxu0  ;;  %v6787_v29 = vpop.f32.mrf.mxu1 }
 0x2a8   : > { %v6789_v59 = vpop.f32.mrf.mxu0  ;;  %v6791_v0 = vpop.f32.mrf.mxu1  ;;  %2584 = vmatmul.mubr.bf16.gmra.mxu0 %v6561_v54  ;;  %2777 = vmatmul.mubr.bf16.gmra.mxu1 %v6561_v54 }
 0x2a9   : > { %2593 = vmatprep.mubr.bf16.mxu0 %v6571_v17  ;;  %2786 = vmatprep.mubr.bf16.mxu1 %v6571_v17 }
 0x2aa   : > { %v6797_v30 = vpop.f32.mrf.mxu0  ;;  %v6799_v53 = vpop.f32.mrf.mxu1 }
 0x2ac   : > { %v6801_v6 = vpop.f32.mrf.mxu0  ;;  %v6803_v11 = vpop.f32.mrf.mxu1 }
 0x2ae   : > { %v6805_v12 = vpop.f32.mrf.mxu0  ;;  %v6807_v35 = vpop.f32.mrf.mxu1 }
 0x2b0   : > { %v6809_v42 = vpop.f32.mrf.mxu0  ;;  %v6811_v10 = vpop.f32.mrf.mxu1  ;;  %2594 = vmatmul.mubr.bf16.gmra.mxu0 %v6573_v18  ;;  %2787 = vmatmul.mubr.bf16.gmra.mxu1 %v6573_v18 }
 0x2b1   : > { %2603 = vmatprep.mubr.bf16.mxu0 %v6583_v32  ;;  %2796 = vmatprep.mubr.bf16.mxu1 %v6583_v32 }
 0x2b2   : > { %v6817_v54 = vpop.f32.mrf.mxu0  ;;  %v6819_v17 = vpop.f32.mrf.mxu1 }
 0x2b4   : > { %v6821_v19 = vpop.f32.mrf.mxu0  ;;  %v6823_v60 = vpop.f32.mrf.mxu1 }
 0x2b6   : > { %v6825_v20 = vpop.f32.mrf.mxu0  ;;  %v6827_v61 = vpop.f32.mrf.mxu1 }
 0x2b8   : > { %v6829_v5 = vpop.f32.mrf.mxu0  ;;  %v6831_v21 = vpop.f32.mrf.mxu1  ;;  %2604 = vmatmul.mubr.bf16.gmra.mxu0 %v6585_v33  ;;  %2797 = vmatmul.mubr.bf16.gmra.mxu1 %v6585_v33 }
 0x2b9   : > { %2613 = vmatprep.mubr.bf16.mxu0 %v6595_v57  ;;  %2806 = vmatprep.mubr.bf16.mxu1 %v6595_v57 }
 0x2ba   : > { %v6837_v18 = vpop.f32.mrf.mxu0  ;;  %v6839_v32 = vpop.f32.mrf.mxu1 }
 0x2bc   : > { %v6841_v25 = vpop.f32.mrf.mxu0  ;;  %v6843_v27 = vpop.f32.mrf.mxu1 }
 0x2be   : > { %v6845_v2 = vpop.f32.mrf.mxu0  ;;  %v6847_v3 = vpop.f32.mrf.mxu1 }
 0x2c0   : > { %v6849_v4 = vpop.f32.mrf.mxu0  ;;  %v6851_v8 = vpop.f32.mrf.mxu1  ;;  %2614 = vmatmul.mubr.bf16.gmra.mxu0 %v6597_v49  ;;  %2807 = vmatmul.mubr.bf16.gmra.mxu1 %v6597_v49  ;;  %v1409_v49 = vsub.s32 3, %v6419_v38 }
 0x2c1   : > { %2623 = vmatprep.mubr.bf16.mxu0 %v6607_v22  ;;  %2816 = vmatprep.mubr.bf16.mxu1 %v6607_v22 }
 0x2c2   : > { %v6857_v33 = vpop.f32.mrf.mxu0  ;;  %v6859_v57 = vpop.f32.mrf.mxu1  ;;  %v6893_v51 = vrot.slane %v1393_v1, %v1409_v49 }
 0x2c4   : > { %v6861_v62 = vpop.f32.mrf.mxu0  ;;  %v6863_v7 = vpop.f32.mrf.mxu1  ;;  %v2309_v56 = vadd.f32 %v6787_v29, %v6893_v51  ;;  %v2305_v49 = vadd.f32 %v6779_v24, %v6893_v51 }
 0x2c6   : > { %v6865_v36 = vpop.f32.mrf.mxu0  ;;  %v6867_v41 = vpop.f32.mrf.mxu1  ;;  %v2858_v38 = vmax.f32 %v2309_v56, 0.0  ;;  %v2319_v56 = vadd.f32 %v6807_v35, %v6893_v51 }
 0x2c8   : > { %v6869_v26 = vpop.f32.mrf.mxu0  ;;  %v6871_v43 = vpop.f32.mrf.mxu1  ;;  %2624 = vmatmul.mubr.bf16.gmra.mxu0 %v6609_v23  ;;  %2817 = vmatmul.mubr.bf16.gmra.mxu1 %v6609_v23  ;;  %v6891_v23 = vrot.slane %v1393_v1, %v892_v39 }
 0x2c9   : > { %8271 = vst [vmem:[#allocation18_spill] sm:$0xff] %v6871_v43  ;;  %2633 = vmatprep.mubr.bf16.mxu0 %v6619_v47  ;;  %2826 = vmatprep.mubr.bf16.mxu1 %v6619_v47  ;;  %v2850_v43 = vmax.f32 %v2305_v49, 0.0 }
 0x2ca   : > { %v6878_v22 = vpop.f32.mrf.mxu0  ;;  %v6880_v44 = vpop.f32.mrf.mxu1  ;;  %v2116_v55 = vadd.f32 %v6785_v9, %v6891_v23  ;;  %v2112_v39 = vadd.f32 %v6777_v50, %v6891_v23 }
 0x2cc   : > { %v6885_v31 = vpop.f32.mrf.mxu0  ;;  %v6887_v45 = vpop.f32.mrf.mxu1  ;;  %v2856_v37 = vmax.f32 %v2116_v55, 0.0  ;;  %v2848_v24 = vmax.f32 %v2112_v39, 0.0 }
 0x2ce   : > { %v6895_v52 = vpop.f32.mrf.mxu0  ;;  %v6897_v47 = vpop.f32.mrf.mxu1 }
 0x2d0   : > { %v6904_v34 = vpop.f32.mrf.mxu0  ;;  %v6906_v13 = vpop.f32.mrf.mxu1  ;;  %2634 = vmatmul.mubr.bf16.gmra.mxu0 %v6621_v48  ;;  %2827 = vmatmul.mubr.bf16.gmra.mxu1 %v6621_v48  ;;  %v6923_v48 = vrot.slane %v1393_v1, %v1405_v58  ;;  %v3104_v58 = vpack.c.bf16 %v2856_v37, %v2848_v24  ;;  %v2315_v37 = vadd.f32 %v6799_v53, %v6893_v51  ;;  %v2874_v24 = vmax.f32 %v2319_v56, 0.0 }
 0x2d1   : > { %8272 = vst [vmem:[#allocation19_spill] sm:$0xff] %v6904_v34  ;;  %8273 = vst [vmem:[#allocation20_spill] sm:$0xff] %v6906_v13  ;;  %2643 = vmatprep.mubr.bf16.mxu0 %v6631_v14  ;;  %2836 = vmatprep.mubr.bf16.mxu1 %v6631_v14  ;;  %v6921_v13 = vrot.slane %v1393_v1, %v6423_v40  ;;  %v2126_v1 = vadd.f32 %v6805_v12, %v6891_v23 }
 0x2d2   : > { %v6916_v9 = vpop.f32.mrf.mxu0  ;;  %v6918_v29 = vpop.f32.mrf.mxu1  ;;  %v3106_v40 = vpack.c.bf16 %v2858_v38, %v2850_v43  ;;  %v2122_v12 = vadd.f32 %v6797_v30, %v6891_v23  ;;  %v2136_v56 = vadd.f32 %v6825_v20, %v6891_v23 }
 0x2d3   : > { %8274 = vst [vmem:[#allocation21_spill] sm:$0xff] %v6916_v9  ;;  %8275 = vst [vmem:[#allocation22_spill] sm:$0xff] %v6918_v29  ;;  %v2114_v14 = vadd.f32 %v6781_v28, %v6921_v13  ;;  %v2307_v9 = vadd.f32 %v6783_v63, %v6923_v48  ;;  %v2110_v39 = vadd.f32 %v6769_v16, %v6921_v13  ;;  %v2872_v43 = vmax.f32 %v2126_v1, 0.0 }
 0x2d4   : > { %v6925_v34 = vpop.f32.mrf.mxu0  ;;  %v6927_v50 = vpop.f32.mrf.mxu1  ;;  %v2303_v28 = vadd.f32 %v6771_v46, %v6923_v48  ;;  %v2864_v30 = vmax.f32 %v2122_v12, 0.0  ;;  %v2124_v53 = vadd.f32 %v6801_v6, %v6921_v13  ;;  %v2120_v1 = vadd.f32 %v6789_v59, %v6921_v13  ;;  %v5960_v6 = vld [vmem:[%s8240_s7 + $0x1b8] sm:$0xff]   ;;  %v5963_v12 = vld [vmem:[%s8240_s7 + $0x1f0] sm:$0xff]  }
 0x2d5   : > { %8276 = vst [vmem:[#allocation23_spill] sm:$0xff] %v6925_v34  ;;  %8277 = vst [vmem:[#allocation24_spill] sm:$0xff] %v6927_v50  ;;  %v2855_v38 = vmax.f32 %v2114_v14, 0.0  ;;  %v2857_v16 = vmax.f32 %v2307_v9, 0.0  ;;  %v2866_v34 = vmax.f32 %v2315_v37, 0.0  ;;  %v2329_v59 = vadd.f32 %v6827_v61, %v6893_v51 }
 0x2d6   : > { %v6933_v29 = vpop.f32.mrf.mxu0  ;;  %v6935_v55 = vpop.f32.mrf.mxu1  ;;  %v2132_v37 = vadd.f32 %v6817_v54, %v6891_v23  ;;  %v5962_v54 = vld [vmem:[%s8240_s7 + $0x130] sm:$0xff]  }
 0x2d7   : > { %v3114_v20 = vpack.c.bf16 %v2874_v24, %v2866_v34  ;;  %v2325_v34 = vadd.f32 %v6819_v17, %v6893_v51  ;;  %v2890_v17 = vmax.f32 %v2329_v59, 0.0 }
 0x2d8   : > { %v6945_v49 = vpop.f32.mrf.mxu0  ;;  %v6947_v63 = vpop.f32.mrf.mxu1  ;;  %2644 = vmatmul.mubr.bf16.gmra.mxu0 %v6633_v15  ;;  %2837 = vmatmul.mubr.bf16.gmra.mxu1 %v6633_v15 }
 0x2d9   : > { %8278 = vst [vmem:[#allocation25_spill] sm:$0xff] %v6945_v49  ;;  %8279 = vst [vmem:[#allocation26_spill] sm:$0xff] %v6947_v63  ;;  %3782 = vmatprep.mubr.bf16.mxu0 %v3104_v58  ;;  %3943 = vmatprep.mubr.bf16.mxu1 %v3106_v40  ;;  %v2847_v63 = vmax.f32 %v2110_v39, 0.0  ;;  %v2849_v49 = vmax.f32 %v2303_v28, 0.0  ;;  %v2317_v40 = vadd.f32 %v6803_v11, %v6923_v48  ;;  %v5958_v28 = vld [vmem:[%s8240_s7 + $0x138] sm:$0xff]  }
 0x2da   : > { %v6955_v35 = vpop.f32.mrf.mxu0  ;;  %v6957_v46 = vpop.f32.mrf.mxu1  ;;  %v2313_v11 = vadd.f32 %v6791_v0, %v6923_v48  ;;  %v2871_v0 = vmax.f32 %v2124_v53, 0.0  ;;  %v5964_v53 = vld [vmem:[%s8240_s7 + $0x1b0] sm:$0xff]  }
 0x2db   : > { %v3103_v9 = vpack.c.bf16 %v2855_v38, %v2847_v63  ;;  %v3105_v14 = vpack.c.bf16 %v2857_v16, %v2849_v49  ;;  %v3112_v49 = vpack.c.bf16 %v2872_v43, %v2864_v30  ;;  %v5961_v63 = vld [vmem:[%s8240_s7 + $0x170] sm:$0xff]   ;;  %v2873_v61 = vmax.f32 %v2317_v40, 0.0 }
 0x2dc   : > { %v6959_v50 = vpop.f32.mrf.mxu0  ;;  %v6961_v15 = vpop.f32.mrf.mxu1  ;;  %v2888_v43 = vmax.f32 %v2136_v56, 0.0  ;;  %v2863_v40 = vmax.f32 %v2120_v1, 0.0  ;;  %v5967_v56 = vld [vmem:[%s8240_s7 + $0x1e8] sm:$0xff]  }
 0x2de   : > { %v6971_v58 = vpop.f32.mrf.mxu0  ;;  %v6973_v39 = vpop.f32.mrf.mxu1  ;;  %v3111_v59 = vpack.c.bf16 %v2871_v0, %v2863_v40  ;;  %v5968_v0 = vld [vmem:[%s8240_s7 + $0x1a8] sm:$0xff]  }
 0x2e0   : > { %v6993_v38 = vpop.f32.mrf.mxu0  ;;  %v6995_v16 = vpop.f32.mrf.mxu1  ;;  %3783 = vmatmul.mubr.bf16.vlgmr.msra.gmra.mxu0 %v3103_v9  ;;  %3944 = vmatmul.mubr.bf16.vlgmr.msra.gmra.mxu1 %v3105_v14  ;;  %v2865_v9 = vmax.f32 %v2313_v11, 0.0  ;;  %v5965_v14 = vld [vmem:[%s8240_s7 + $0x168] sm:$0xff]  }
 0x2e1   : > { %8280 = vst [vmem:[#allocation27_spill] sm:$0xff] %v6993_v38  ;;  %8281 = vst [vmem:[#allocation28_spill] sm:$0xff] %v6995_v16  ;;  %3790 = vmatprep.mubr.bf16.mxu0 %v3112_v49  ;;  %3951 = vmatprep.mubr.bf16.mxu1 %v3114_v20  ;;  %v2327_v49 = vadd.f32 %v6823_v60, %v6923_v48  ;;  %v2323_v16 = vadd.f32 %v6811_v10, %v6923_v48  ;;  %v5966_v60 = vld [vmem:[%s8240_s7 + $0x128] sm:$0xff]  }
 0x2e2   : > { %5459 = vmatpush3.bf16.msra.mxu0 %v5958_v28  ;;  %v6999_v24 = vpop.f32.mrf.mxu0  ;;  %v7001_v30 = vpop.f32.mrf.mxu1  ;;  %5571 = vmatpush3.bf16.msra.mxu1 %v5960_v6  ;;  %v2880_v28 = vmax.f32 %v2132_v37, 0.0  ;;  %v2134_v6 = vadd.f32 %v6821_v19, %v6921_v13  ;;  %v3113_v20 = vpack.c.bf16 %v2873_v61, %v2865_v9  ;;  %v2339_v10 = vadd.f32 %v6847_v3, %v6893_v51 }
 0x2e3   : > { %5460 = vmatprep.subr.bf16.mxu0 %v5961_v63  ;;  %5572 = vmatprep.subr.bf16.mxu1 %v5963_v12  ;;  %v2882_v63 = vmax.f32 %v2325_v34, 0.0  ;;  %v2130_v12 = vadd.f32 %v6809_v42, %v6921_v13  ;;  %v2146_v42 = vadd.f32 %v6845_v2, %v6891_v23  ;;  %v5969_v34 = vld [vmem:[%s8240_s7 + $0x160] sm:$0xff]   ;;  %v2142_v2 = vadd.f32 %v6837_v18, %v6891_v23 }
 0x2e4   : > { %v7019_v1 = vpop.f32.mrf.mxu0  ;;  %v7021_v11 = vpop.f32.mrf.mxu1  ;;  %v3120_v19 = vpack.c.bf16 %v2888_v43, %v2880_v28  ;;  %v5971_v43 = vld [vmem:[%s8240_s7 + $0x1e0] sm:$0xff]   ;;  %v2335_v3 = vadd.f32 %v6839_v32, %v6893_v51  ;;  %v2906_v32 = vmax.f32 %v2339_v10, 0.0  ;;  %v2337_v10 = vadd.f32 %v6843_v27, %v6923_v48 }
 0x2e5   : > { %v3122_v61 = vpack.c.bf16 %v2890_v17, %v2882_v63  ;;  %v2879_v17 = vmax.f32 %v2130_v12, 0.0  ;;  %v5972_v18 = vld [vmem:[%s8240_s7 + $0x1a0] sm:$0xff]  }
 0x2e6   : > { %v7027_v37 = vpop.f32.mrf.mxu0  ;;  %v7029_v38 = vpop.f32.mrf.mxu1  ;;  %5461 = vmatpush3.bf16.msra.mxu0 %v5962_v54  ;;  %5573 = vmatpush3.bf16.msra.mxu1 %v5964_v53  ;;  %v2887_v54 = vmax.f32 %v2134_v6, 0.0  ;;  %v2889_v53 = vmax.f32 %v2327_v49, 0.0  ;;  %v5970_v6 = vld [vmem:[%s8240_s7 + $0x120] sm:$0xff]   ;;  %v2904_v49 = vmax.f32 %v2146_v42, 0.0  ;;  %v2144_v42 = vadd.f32 %v6841_v25, %v6921_v13  ;;  %v5974_v25 = vld [vmem:[%s8240_s7 + $0x118] sm:$0xff]  }
 0x2e7   : > { %5462 = vmatprep.subr.bf16.mxu0 %v5965_v14  ;;  %5574 = vmatprep.subr.bf16.mxu1 %v5967_v56  ;;  %v2881_v14 = vmax.f32 %v2323_v16, 0.0  ;;  %v5973_v16 = vld [vmem:[%s8240_s7 + $0x158] sm:$0xff]  }
 0x2e8   : > { %v7047_v40 = vpop.f32.mrf.mxu0  ;;  %v7049_v9 = vpop.f32.mrf.mxu1  ;;  %3791 = vmatmul.mubr.bf16.gmra.mxu0 %v3111_v59  ;;  %3952 = vmatmul.mubr.bf16.gmra.mxu1 %v3113_v20  ;;  %v5975_v59 = vld [vmem:[%s8240_s7 + $0x1d8] sm:$0xff]   ;;  %v3119_v20 = vpack.c.bf16 %v2887_v54, %v2879_v17 }
 0x2e9   : > { %3798 = vmatprep.mubr.bf16.mxu0 %v3120_v19  ;;  %3959 = vmatprep.mubr.bf16.mxu1 %v3122_v61  ;;  %v3121_v63 = vpack.c.bf16 %v2889_v53, %v2881_v14  ;;  %v2140_v61 = vadd.f32 %v6829_v5, %v6921_v13  ;;  %v5976_v5 = vld [vmem:[%s8240_s7 + $0x198] sm:$0xff]  }
 0x2ea   : > { %v7055_v56 = vpop.f32.mrf.mxu0  ;;  %v7057_v28 = vpop.f32.mrf.mxu1  ;;  %5463 = vmatpush3.bf16.msra.mxu0 %v5966_v60  ;;  %5575 = vmatpush3.bf16.msra.mxu1 %v5968_v0  ;;  %v2896_v60 = vmax.f32 %v2142_v2, 0.0  ;;  %v2898_v0 = vmax.f32 %v2335_v3, 0.0  ;;  %v2152_v3 = vadd.f32 %v6857_v33, %v6891_v23 }
 0x2eb   : > { %5464 = vmatprep.subr.bf16.mxu0 %v5969_v34  ;;  %5576 = vmatprep.subr.bf16.mxu1 %v5971_v43  ;;  %v2333_v34 = vadd.f32 %v6831_v21, %v6923_v48  ;;  %v2156_v43 = vadd.f32 %v6865_v36, %v6891_v23  ;;  %v2349_v21 = vadd.f32 %v6867_v41, %v6893_v51  ;;  %v5977_v36 = vld [vmem:[%s8240_s7 + $0x150] sm:$0xff]  }
 0x2ec   : > { %v7071_v12 = vpop.f32.mrf.mxu0  ;;  %v7073_v19 = vpop.f32.mrf.mxu1  ;;  %v3128_v27 = vpack.c.bf16 %v2904_v49, %v2896_v60  ;;  %v3130_v2 = vpack.c.bf16 %v2906_v32, %v2898_v0  ;;  %v5979_v41 = vld [vmem:[%s8240_s7 + $0x1d0] sm:$0xff]   ;;  %v2345_v49 = vadd.f32 %v6859_v57, %v6893_v51  ;;  %v5981_v0 = vld [vmem:[%s8240_s7 + $0x148] sm:$0xff]  }
 0x2ed   : > { %v2920_v32 = vmax.f32 %v2156_v43, 0.0  ;;  %v2897_v60 = vmax.f32 %v2333_v34, 0.0  ;;  %v2922_v57 = vmax.f32 %v2349_v21, 0.0  ;;  %v2154_v34 = vadd.f32 %v6861_v62, %v6921_v13  ;;  %v5984_v62 = vld [vmem:[%s8240_s7 + $0x188] sm:$0xff]  }
 0x2ee   : > { %v7085_v54 = vpop.f32.mrf.mxu0  ;;  %v7087_v53 = vpop.f32.mrf.mxu1  ;;  %5465 = vmatpush3.bf16.msra.mxu0 %v5970_v6  ;;  %5577 = vmatpush3.bf16.msra.mxu1 %v5972_v18  ;;  %v2903_v6 = vmax.f32 %v2144_v42, 0.0  ;;  %v2905_v18 = vmax.f32 %v2337_v10, 0.0  ;;  %v5983_v42 = vld [vmem:[%s8240_s7 + $0x1c8] sm:$0xff]   ;;  %v2912_v10 = vmax.f32 %v2152_v3, 0.0  ;;  %v2150_v21 = vadd.f32 %v6849_v4, %v6921_v13 }
 0x2ef   : > { %5466 = vmatprep.subr.bf16.mxu0 %v5973_v16  ;;  %5578 = vmatprep.subr.bf16.mxu1 %v5975_v59  ;;  %v5978_v59 = vld [vmem:[%s8240_s7 + $0x110] sm:$0xff]   ;;  %v2166_v4 = vadd.f32 %v6895_v52, %v6891_v23  ;;  %v5987_v52 = vld [vmem:[%s8240_s7 + $0x1c0] sm:$0xff]  }
 0x2f0   : > { %v7102_v17 = vpop.f32.mrf.mxu0  ;;  %v7104_v14 = vpop.f32.mrf.mxu1  ;;  %3799 = vmatmul.mubr.bf16.gmra.mxu0 %v3119_v20  ;;  %3960 = vmatmul.mubr.bf16.gmra.mxu1 %v3121_v63  ;;  %v5980_v20 = vld [vmem:[%s8240_s7 + $0x190] sm:$0xff]   ;;  %v2895_v63 = vmax.f32 %v2140_v61, 0.0  ;;  %v2914_v61 = vmax.f32 %v2345_v49, 0.0  ;;  %v2343_v49 = vadd.f32 %v6851_v8, %v6923_v48 }
 0x2f1   : > { %8282 = vst [vmem:[#allocation29_spill] sm:$0xff] %v7104_v14  ;;  %3806 = vmatprep.mubr.bf16.mxu0 %v3128_v27  ;;  %3967 = vmatprep.mubr.bf16.mxu1 %v3130_v2  ;;  %v3129_v27 = vpack.c.bf16 %v2905_v18, %v2897_v60  ;;  %v2347_v2 = vadd.f32 %v6863_v7, %v6923_v48  ;;  %v5985_v18 = vld [vmem:[%s8240_s7 + $0x140] sm:$0xff]  }
 0x2f2   : > { %v7111_v16 = vpop.f32.mrf.mxu0  ;;  %v7113_v33 = vpop.f32.mrf.mxu1  ;;  %5467 = vmatpush3.bf16.msra.mxu0 %v5974_v25  ;;  %5579 = vmatpush3.bf16.msra.mxu1 %v5976_v5  ;;  %v3127_v5 = vpack.c.bf16 %v2903_v6, %v2895_v63  ;;  %v3136_v14 = vpack.c.bf16 %v2920_v32, %v2912_v10  ;;  %v2359_v7 = vadd.f32 %v6897_v47, %v6893_v51  ;;  %v2919_v47 = vmax.f32 %v2154_v34, 0.0 }
 0x2f3   : > { %5468 = vmatprep.subr.bf16.mxu0 %v5977_v36  ;;  %5580 = vmatprep.subr.bf16.mxu1 %v5979_v41  ;;  %v5982_v41 = vld [vmem:[%s8240_s7 + $0x108] sm:$0xff]   ;;  %v3138_v6 = vpack.c.bf16 %v2922_v57, %v2914_v61  ;;  %v2355_v63 = vadd.f32 %v6880_v44, %v6893_v51  ;;  %v2921_v8 = vmax.f32 %v2347_v2, 0.0  ;;  %v2936_v10 = vmax.f32 %v2166_v4, 0.0 }
 0x2f4   : > { %v7127_v43 = vpop.f32.mrf.mxu0  ;;  %v7129_v25 = vpop.f32.mrf.mxu1  ;;  %v2938_v44 = vmax.f32 %v2359_v7, 0.0  ;;  %v2176_v7 = vadd.f32 %v6933_v29, %v6891_v23 }
 0x2f5   : > { %v2930_v2 = vmax.f32 %v2355_v63, 0.0 }
 0x2f6   : > { %v7137_v36 = vpop.f32.mrf.mxu0  ;;  %v7139_v3 = vpop.f32.mrf.mxu1  ;;  %5469 = vmatpush3.bf16.msra.mxu0 %v5978_v59  ;;  %5581 = vmatpush3.bf16.msra.mxu1 %v5980_v20  ;;  %v2162_v20 = vadd.f32 %v6878_v22, %v6891_v23  ;;  %v5988_v22 = vld [vmem:[%s8240_s7 + $0x180] sm:$0xff]  }
 0x2f7   : > { %5470 = vmatprep.subr.bf16.mxu0 %v5981_v0  ;;  %5582 = vmatprep.subr.bf16.mxu1 %v5983_v42  ;;  %v5986_v0 = vld [vmem:[%s8240_s7 + $0x100] sm:$0xff]   ;;  %v2911_v42 = vmax.f32 %v2150_v21, 0.0 }
 0x2f8   : > { %v7156_v32 = vpop.f32.mrf.mxu0  ;;  %v7158_v59 = vpop.f32.mrf.mxu1  ;;  %3807 = vmatmul.mubr.bf16.gmra.mxu0 %v3127_v5  ;;  %3968 = vmatmul.mubr.bf16.gmra.mxu1 %v3129_v27  ;;  %v2928_v34 = vmax.f32 %v2162_v20, 0.0 }
 0x2f9   : > { %3814 = vmatprep.mubr.bf16.mxu0 %v3136_v14  ;;  %3975 = vmatprep.mubr.bf16.mxu1 %v3138_v6  ;;  %v2913_v14 = vmax.f32 %v2343_v49, 0.0  ;;  %v3135_v61 = vpack.c.bf16 %v2919_v47, %v2911_v42  ;;  %v2357_v6 = vadd.f32 %v6887_v45, %v6923_v48  ;;  %v8283_v47 = vld [vmem:[#allocation18_spill] sm:$0xff] }
 0x2fa   : > { %v7167_v60 = vpop.f32.mrf.mxu0  ;;  %v7169_v57 = vpop.f32.mrf.mxu1  ;;  %5471 = vmatpush3.bf16.msra.mxu0 %v5982_v41  ;;  %5583 = vmatpush3.bf16.msra.mxu1 %v5984_v62  ;;  %v2164_v62 = vadd.f32 %v6885_v31, %v6921_v13  ;;  %v3144_v49 = vpack.c.bf16 %v2936_v10, %v2928_v34  ;;  %v2160_v31 = vadd.f32 %v6869_v26, %v6921_v13 }
 0x2fb   : > { %5472 = vmatprep.subr.bf16.mxu0 %v5985_v18  ;;  %5584 = vmatprep.subr.bf16.mxu1 %v5987_v52  ;;  %v3137_v41 = vpack.c.bf16 %v2921_v8, %v2913_v14  ;;  %v2369_v18 = vadd.f32 %v6935_v55, %v6893_v51  ;;  %v3146_v52 = vpack.c.bf16 %v2938_v44, %v2930_v2  ;;  %v8286_v8 = vld [vmem:[#allocation21_spill] sm:$0xff]  ;;  %v2937_v42 = vmax.f32 %v2357_v6, 0.0  ;;  %v8290_v6 = vld [vmem:[#allocation24_spill] sm:$0xff] }
 0x2fc   : > { %v7177_v5 = vpop.f32.mrf.mxu0  ;;  %v7179_v27 = vpop.f32.mrf.mxu1  ;;  %v2353_v45 = vadd.f32 %v8283_v47, %v6923_v48  ;;  %v2172_v29 = vadd.f32 %v8286_v8, %v6891_v23  ;;  %v2952_v44 = vmax.f32 %v2176_v7, 0.0  ;;  %v2927_v34 = vmax.f32 %v2160_v31, 0.0 }
 0x2fd   : > { %v2954_v14 = vmax.f32 %v2369_v18, 0.0  ;;  %v2186_v18 = vadd.f32 %v6971_v58, %v6891_v23  ;;  %v2379_v31 = vadd.f32 %v6973_v39, %v6893_v51  ;;  %v2182_v58 = vadd.f32 %v6955_v35, %v6891_v23 }
 0x2fe   : > { %v7185_v21 = vpop.f32.mrf.mxu0  ;;  %v7187_v4 = vpop.f32.mrf.mxu1  ;;  %5473 = vmatpush3.bf16.msra.mxu0 %v5986_v0  ;;  %5585 = vmatpush3.bf16.msra.mxu1 %v5988_v22  ;;  %v8287_v0 = vld [vmem:[#allocation22_spill] sm:$0xff]  ;;  %v2935_v22 = vmax.f32 %v2164_v62, 0.0  ;;  %v2929_v2 = vmax.f32 %v2353_v45, 0.0  ;;  %v2944_v47 = vmax.f32 %v2172_v29, 0.0  ;;  %v2375_v39 = vadd.f32 %v6957_v46, %v6893_v51 }
 0x2ff   : > { %v2365_v55 = vadd.f32 %v8287_v0, %v6893_v51  ;;  %v2960_v35 = vmax.f32 %v2182_v58, 0.0 }
 0x300   : > { %v7197_v20 = vpop.f32.mrf.mxu0  ;;  %v7199_v63 = vpop.f32.mrf.mxu1  ;;  %3815 = vmatmul.mubr.bf16.gmra.mxu0 %v3135_v61  ;;  %3976 = vmatmul.mubr.bf16.gmra.mxu1 %v3137_v41  ;;  %v3145_v0 = vpack.c.bf16 %v2937_v42, %v2929_v2  ;;  %v3152_v45 = vpack.c.bf16 %v2952_v44, %v2944_v47  ;;  %v8292_v42 = vld [vmem:[#allocation20_spill] sm:$0xff] }
 0x301   : > { %8284 = vst [vmem:[#allocation18_spill] sm:$0xff] %v7197_v20  ;;  %8285 = vst [vmem:[#allocation30_spill] sm:$0xff] %v7199_v63  ;;  %3822 = vmatprep.mubr.bf16.mxu0 %v3144_v49  ;;  %3983 = vmatprep.mubr.bf16.mxu1 %v3146_v52  ;;  %v2946_v8 = vmax.f32 %v2365_v55, 0.0  ;;  %v3143_v63 = vpack.c.bf16 %v2935_v22, %v2927_v34  ;;  %v8289_v49 = vld [vmem:[#allocation23_spill] sm:$0xff]  ;;  %v2367_v52 = vadd.f32 %v8290_v6, %v6923_v48 }
 0x302   : > { %v7205_v26 = vpop.f32.mrf.mxu0  ;;  %v7207_v10 = vpop.f32.mrf.mxu1  ;;  %v2174_v62 = vadd.f32 %v8289_v49, %v6921_v13  ;;  %v8291_v55 = vld [vmem:[#allocation19_spill] sm:$0xff]  ;;  %v2363_v34 = vadd.f32 %v8292_v42, %v6923_v48  ;;  %v2968_v6 = vmax.f32 %v2186_v18, 0.0 }
 0x303   : > { %v3154_v29 = vpack.c.bf16 %v2954_v14, %v2946_v8  ;;  %v2170_v22 = vadd.f32 %v8291_v55, %v6921_v13  ;;  %v2953_v14 = vmax.f32 %v2367_v52, 0.0  ;;  %v2970_v55 = vmax.f32 %v2379_v31, 0.0 }
 0x304   : > { %v7209_v61 = vpop.f32.mrf.mxu0  ;;  %v7211_v41 = vpop.f32.mrf.mxu1  ;;  %v2951_v44 = vmax.f32 %v2174_v62, 0.0  ;;  %v2184_v62 = vadd.f32 %v6959_v50, %v6921_v13  ;;  %v2377_v52 = vadd.f32 %v6961_v15, %v6923_v48  ;;  %v2196_v31 = vadd.f32 %v7027_v37, %v6891_v23  ;;  %v8296_v50 = vld [vmem:[#allocation26_spill] sm:$0xff] }
 0x305   : > { %8288 = vst [vmem:[#allocation21_spill] sm:$0xff] %v7211_v41  ;;  %v2943_v42 = vmax.f32 %v2170_v22, 0.0  ;;  %v3160_v22 = vpack.c.bf16 %v2968_v6, %v2960_v35  ;;  %v2192_v37 = vadd.f32 %v6999_v24, %v6891_v23 }
 0x306   : > { %v7217_v20 = vpop.f32.mrf.mxu0  ;;  %v7219_v7 = vpop.f32.mrf.mxu1 }
 0x307   : > { %v3151_v41 = vpack.c.bf16 %v2951_v44, %v2943_v42  ;;  %v2984_v42 = vmax.f32 %v2196_v31, 0.0  ;;  %v2976_v24 = vmax.f32 %v2192_v37, 0.0  ;;  %v8299_v37 = vld [vmem:[#allocation27_spill] sm:$0xff] }
 0x308   : > { %v7229_v2 = vpop.f32.mrf.mxu0  ;;  %v7231_v49 = vpop.f32.mrf.mxu1  ;;  %3823 = vmatmul.mubr.bf16.gmra.mxu0 %v3143_v63  ;;  %3984 = vmatmul.mubr.bf16.gmra.mxu1 %v3145_v0 }
 0x309   : > { %8293 = vst [vmem:[#allocation22_spill] sm:$0xff] %v7229_v2  ;;  %8294 = vst [vmem:[#allocation23_spill] sm:$0xff] %v7231_v49  ;;  %3830 = vmatprep.mubr.bf16.mxu0 %v3152_v45  ;;  %3991 = vmatprep.mubr.bf16.mxu1 %v3154_v29  ;;  %v2945_v49 = vmax.f32 %v2363_v34, 0.0  ;;  %v2962_v2 = vmax.f32 %v2375_v39, 0.0  ;;  %v2389_v29 = vadd.f32 %v7029_v38, %v6893_v51 }
 0x30a   : > { %v7237_v47 = vpop.f32.mrf.mxu0  ;;  %v7239_v8 = vpop.f32.mrf.mxu1  ;;  %v2373_v39 = vadd.f32 %v8296_v50, %v6923_v48  ;;  %v2385_v38 = vadd.f32 %v7001_v30, %v6893_v51 }
 0x30b   : > { %v3153_v46 = vpack.c.bf16 %v2953_v14, %v2945_v49  ;;  %v3162_v34 = vpack.c.bf16 %v2970_v55, %v2962_v2  ;;  %v8295_v49 = vld [vmem:[#allocation25_spill] sm:$0xff]  ;;  %v2967_v2 = vmax.f32 %v2184_v62, 0.0  ;;  %v2969_v14 = vmax.f32 %v2377_v52, 0.0 }
 0x30c   : > { %v7241_v63 = vpop.f32.mrf.mxu0  ;;  %v7243_v0 = vpop.f32.mrf.mxu1  ;;  %v2180_v58 = vadd.f32 %v8295_v49, %v6921_v13  ;;  %v2986_v35 = vmax.f32 %v2389_v29, 0.0  ;;  %v2961_v50 = vmax.f32 %v2373_v39, 0.0  ;;  %v2194_v62 = vadd.f32 %v7019_v1, %v6921_v13  ;;  %v8300_v1 = vld [vmem:[#allocation28_spill] sm:$0xff] }
 0x30d   : > { %v2387_v52 = vadd.f32 %v7021_v11, %v6923_v48  ;;  %v2206_v29 = vadd.f32 %v7085_v54, %v6891_v23  ;;  %v2202_v54 = vadd.f32 %v7055_v56, %v6891_v23 }
 0x30e   : > { %v7249_v45 = vpop.f32.mrf.mxu0  ;;  %v7251_v18 = vpop.f32.mrf.mxu1  ;;  %v2959_v49 = vmax.f32 %v2180_v58, 0.0  ;;  %v3161_v30 = vpack.c.bf16 %v2969_v14, %v2961_v50  ;;  %v3168_v58 = vpack.c.bf16 %v2984_v42, %v2976_v24 }
 0x30f   : > { %v2985_v42 = vmax.f32 %v2387_v52, 0.0  ;;  %v3000_v50 = vmax.f32 %v2206_v29, 0.0  ;;  %v2992_v56 = vmax.f32 %v2202_v54, 0.0  ;;  %v2397_v52 = vadd.f32 %v7073_v19, %v6923_v48 }
 0x310   : > { %v7261_v44 = vpop.f32.mrf.mxu0  ;;  %v7263_v15 = vpop.f32.mrf.mxu1  ;;  %3831 = vmatmul.mubr.bf16.gmra.mxu0 %v3151_v41  ;;  %3992 = vmatmul.mubr.bf16.gmra.mxu1 %v3153_v46  ;;  %v2200_v54 = vadd.f32 %v7047_v40, %v6921_v13 }
 0x311   : > { %8297 = vst [vmem:[#allocation24_spill] sm:$0xff] %v7261_v44  ;;  %8298 = vst [vmem:[#allocation19_spill] sm:$0xff] %v7263_v15  ;;  %3838 = vmatprep.mubr.bf16.mxu0 %v3160_v22  ;;  %3999 = vmatprep.mubr.bf16.mxu1 %v3162_v34  ;;  %v2978_v15 = vmax.f32 %v2385_v38, 0.0  ;;  %v3159_v44 = vpack.c.bf16 %v2967_v2, %v2959_v49  ;;  %v2399_v34 = vadd.f32 %v7087_v53, %v6893_v51 }
 0x312   : > { %v7269_v6 = vpop.f32.mrf.mxu0  ;;  %v7271_v55 = vpop.f32.mrf.mxu1  ;;  %v2190_v38 = vadd.f32 %v8299_v37, %v6921_v13  ;;  %v2383_v2 = vadd.f32 %v8300_v1, %v6923_v48  ;;  %v2395_v53 = vadd.f32 %v7057_v28, %v6893_v51 }
 0x313   : > { %v3170_v39 = vpack.c.bf16 %v2986_v35, %v2978_v15  ;;  %v2983_v15 = vmax.f32 %v2194_v62, 0.0  ;;  %v3002_v24 = vmax.f32 %v2399_v34, 0.0  ;;  %v2204_v62 = vadd.f32 %v7071_v12, %v6921_v13 }
 0x314   : > { %v7273_v41 = vpop.f32.mrf.mxu0  ;;  %v7275_v46 = vpop.f32.mrf.mxu1  ;;  %v2975_v37 = vmax.f32 %v2190_v38, 0.0  ;;  %v2977_v1 = vmax.f32 %v2383_v2, 0.0  ;;  %v2216_v34 = vadd.f32 %v7137_v36, %v6891_v23  ;;  %v3176_v38 = vpack.c.bf16 %v3000_v50, %v2992_v56 }
 0x315   : > { %v2393_v12 = vadd.f32 %v7049_v9, %v6923_v48  ;;  %v2212_v36 = vadd.f32 %v7111_v16, %v6891_v23 }
 0x316   : > { %v7281_v22 = vpop.f32.mrf.mxu0  ;;  %v7283_v31 = vpop.f32.mrf.mxu1  ;;  %v3169_v28 = vpack.c.bf16 %v2985_v42, %v2977_v1  ;;  %v3016_v9 = vmax.f32 %v2216_v34, 0.0 }
 0x317   : > { %v3008_v16 = vmax.f32 %v2212_v36, 0.0  ;;  %v2210_v36 = vadd.f32 %v7102_v17, %v6921_v13 }
 0x318   : > { %v7293_v14 = vpop.f32.mrf.mxu0  ;;  %v7295_v11 = vpop.f32.mrf.mxu1  ;;  %3839 = vmatmul.mubr.bf16.gmra.mxu0 %v3159_v44  ;;  %4000 = vmatmul.mubr.bf16.gmra.mxu1 %v3161_v30 }
 0x319   : > { %8301 = vst [vmem:[#allocation20_spill] sm:$0xff] %v7293_v14  ;;  %8302 = vst [vmem:[#allocation25_spill] sm:$0xff] %v7295_v11  ;;  %3846 = vmatprep.mubr.bf16.mxu0 %v3168_v58  ;;  %4007 = vmatprep.mubr.bf16.mxu1 %v3170_v39  ;;  %v2994_v11 = vmax.f32 %v2395_v53, 0.0  ;;  %v3167_v14 = vpack.c.bf16 %v2983_v15, %v2975_v37  ;;  %v2409_v39 = vadd.f32 %v7139_v3, %v6893_v51 }
 0x31a   : > { %v7301_v35 = vpop.f32.mrf.mxu0  ;;  %v7303_v49 = vpop.f32.mrf.mxu1  ;;  %v2405_v3 = vadd.f32 %v7113_v33, %v6893_v51  ;;  %v3001_v15 = vmax.f32 %v2397_v52, 0.0  ;;  %v2993_v37 = vmax.f32 %v2393_v12, 0.0  ;;  %v2407_v52 = vadd.f32 %v7129_v25, %v6923_v48 }
 0x31b   : > { %v3178_v2 = vpack.c.bf16 %v3002_v24, %v2994_v11  ;;  %v2999_v11 = vmax.f32 %v2204_v62, 0.0  ;;  %v3018_v50 = vmax.f32 %v2409_v39, 0.0  ;;  %v2991_v24 = vmax.f32 %v2200_v54, 0.0 }
 0x31c   : > { %v7305_v44 = vpop.f32.mrf.mxu0  ;;  %v7307_v30 = vpop.f32.mrf.mxu1  ;;  %v3010_v56 = vmax.f32 %v2405_v3, 0.0  ;;  %v3177_v33 = vpack.c.bf16 %v3001_v15, %v2993_v37  ;;  %v2214_v62 = vadd.f32 %v7127_v43, %v6921_v13  ;;  %v2226_v39 = vadd.f32 %v7185_v21, %v6891_v23  ;;  %v8303_v43 = vld [vmem:[#allocation29_spill] sm:$0xff] }
 0x31d   : > { %v3184_v54 = vpack.c.bf16 %v3016_v9, %v3008_v16  ;;  %v2403_v3 = vadd.f32 %v8303_v43, %v6923_v48  ;;  %v2222_v21 = vadd.f32 %v7167_v60, %v6891_v23  ;;  %v3017_v9 = vmax.f32 %v2407_v52, 0.0 }
 0x31e   : > { %v7313_v58 = vpop.f32.mrf.mxu0  ;;  %v7315_v29 = vpop.f32.mrf.mxu1  ;;  %v3186_v12 = vpack.c.bf16 %v3018_v50, %v3010_v56  ;;  %v3015_v15 = vmax.f32 %v2214_v62, 0.0  ;;  %v3007_v16 = vmax.f32 %v2210_v36, 0.0  ;;  %v2224_v62 = vadd.f32 %v7177_v5, %v6921_v13 }
 0x31f   : > { %v3009_v56 = vmax.f32 %v2403_v3, 0.0  ;;  %v3024_v60 = vmax.f32 %v2222_v21, 0.0  ;;  %v2417_v52 = vadd.f32 %v7179_v27, %v6923_v48  ;;  %v2220_v21 = vadd.f32 %v7156_v32, %v6921_v13 }
 0x320   : > { %v7325_v53 = vpop.f32.mrf.mxu0  ;;  %v7327_v19 = vpop.f32.mrf.mxu1  ;;  %3847 = vmatmul.mubr.bf16.gmra.mxu0 %v3167_v14  ;;  %4008 = vmatmul.mubr.bf16.gmra.mxu1 %v3169_v28  ;;  %v3175_v28 = vpack.c.bf16 %v2999_v11, %v2991_v24  ;;  %v3032_v24 = vmax.f32 %v2226_v39, 0.0  ;;  %v2413_v5 = vadd.f32 %v7158_v59, %v6923_v48 }
 0x321   : > { %3854 = vmatprep.mubr.bf16.mxu0 %v3176_v38  ;;  %4015 = vmatprep.mubr.bf16.mxu1 %v3178_v2  ;;  %v2419_v2 = vadd.f32 %v7187_v4, %v6893_v51  ;;  %v2415_v4 = vadd.f32 %v7169_v57, %v6893_v51  ;;  %v3185_v57 = vpack.c.bf16 %v3017_v9, %v3009_v56  ;;  %v3033_v9 = vmax.f32 %v2417_v52, 0.0  ;;  %v8306_v52 = vld [vmem:[#allocation21_spill] sm:$0xff] }
 0x322   : > { %v7333_v40 = vpop.f32.mrf.mxu0  ;;  %v7335_v42 = vpop.f32.mrf.mxu1  ;;  %v3192_v36 = vpack.c.bf16 %v3032_v24, %v3024_v60  ;;  %v3025_v56 = vmax.f32 %v2413_v5, 0.0 }
 0x323   : > { %v3034_v37 = vmax.f32 %v2419_v2, 0.0  ;;  %v3026_v43 = vmax.f32 %v2415_v4, 0.0  ;;  %v2236_v2 = vadd.f32 %v7217_v20, %v6891_v23  ;;  %v2232_v20 = vadd.f32 %v7205_v26, %v6891_v23 }
 0x324   : > { %v7337_v14 = vpop.f32.mrf.mxu0  ;;  %v7339_v1 = vpop.f32.mrf.mxu1 }
 0x325   : > { %v3194_v3 = vpack.c.bf16 %v3034_v37, %v3026_v43  ;;  %v3048_v59 = vmax.f32 %v2236_v2, 0.0  ;;  %v3040_v26 = vmax.f32 %v2232_v20, 0.0 }
 0x326   : > { %v7345_v38 = vpop.f32.mrf.mxu0  ;;  %v7347_v34 = vpop.f32.mrf.mxu1 }
 0x327   : > { %v3200_v5 = vpack.c.bf16 %v3048_v59, %v3040_v26 }
 0x328   : > { %v7357_v11 = vpop.f32.mrf.mxu0  ;;  %v7359_v25 = vpop.f32.mrf.mxu1  ;;  %3855 = vmatmul.mubr.bf16.gmra.mxu0 %v3175_v28  ;;  %4016 = vmatmul.mubr.bf16.gmra.mxu1 %v3177_v33 }
 0x329   : > { %8304 = vst [vmem:[#allocation26_spill] sm:$0xff] %v7359_v25  ;;  %3862 = vmatprep.mubr.bf16.mxu0 %v3184_v54  ;;  %4023 = vmatprep.mubr.bf16.mxu1 %v3186_v12  ;;  %v3183_v25 = vpack.c.bf16 %v3015_v15, %v3007_v16  ;;  %v2429_v12 = vadd.f32 %v7219_v7, %v6893_v51  ;;  %v3031_v15 = vmax.f32 %v2224_v62, 0.0  ;;  %v3023_v16 = vmax.f32 %v2220_v21, 0.0 }
 0x32a   : > { %v7365_v17 = vpop.f32.mrf.mxu0  ;;  %v7367_v50 = vpop.f32.mrf.mxu1  ;;  %v2425_v7 = vadd.f32 %v7207_v10, %v6893_v51  ;;  %v3193_v10 = vpack.c.bf16 %v3033_v9, %v3025_v56  ;;  %v2234_v62 = vadd.f32 %v7209_v61, %v6921_v13  ;;  %v2439_v21 = vadd.f32 %v7251_v18, %v6893_v51  ;;  %v8308_v61 = vld [vmem:[#allocation30_spill] sm:$0xff] }
 0x32b   : > { %v3050_v37 = vmax.f32 %v2429_v12, 0.0  ;;  %v2246_v12 = vadd.f32 %v7249_v45, %v6891_v23  ;;  %v2423_v9 = vadd.f32 %v8308_v61, %v6923_v48  ;;  %v2242_v45 = vadd.f32 %v7237_v47, %v6891_v23 }
 0x32c   : > { %v7369_v28 = vpop.f32.mrf.mxu0  ;;  %v7371_v33 = vpop.f32.mrf.mxu1  ;;  %v3042_v43 = vmax.f32 %v2425_v7, 0.0  ;;  %v8307_v7 = vld [vmem:[#allocation18_spill] sm:$0xff]  ;;  %v2435_v18 = vadd.f32 %v7239_v8, %v6893_v51  ;;  %v3047_v59 = vmax.f32 %v2234_v62, 0.0  ;;  %v2244_v62 = vadd.f32 %v7241_v63, %v6921_v13  ;;  %v8312_v63 = vld [vmem:[#allocation23_spill] sm:$0xff] }
 0x32d   : > { %v3056_v47 = vmax.f32 %v2242_v45, 0.0 }
 0x32e   : > { %v7377_v54 = vpop.f32.mrf.mxu0  ;;  %v7379_v39 = vpop.f32.mrf.mxu1  ;;  %v3202_v20 = vpack.c.bf16 %v3050_v37, %v3042_v43 }
 0x330   : > { %v7389_v4 = vpop.f32.mrf.mxu0  ;;  %v7391_v27 = vpop.f32.mrf.mxu1  ;;  %3863 = vmatmul.mubr.bf16.gmra.mxu0 %v3183_v25  ;;  %4024 = vmatmul.mubr.bf16.gmra.mxu1 %v3185_v57  ;;  %v3191_v57 = vpack.c.bf16 %v3031_v15, %v3023_v16  ;;  %v2230_v15 = vadd.f32 %v8307_v7, %v6921_v13  ;;  %v3066_v7 = vmax.f32 %v2439_v21, 0.0  ;;  %v2256_v21 = vadd.f32 %v7281_v22, %v6891_v23 }
 0x331   : > { %8305 = vst [vmem:[#allocation27_spill] sm:$0xff] %v7391_v27  ;;  %3870 = vmatprep.mubr.bf16.mxu0 %v3192_v36  ;;  %4031 = vmatprep.mubr.bf16.mxu1 %v3194_v3  ;;  %v2427_v36 = vadd.f32 %v8306_v52, %v6923_v48  ;;  %v3064_v52 = vmax.f32 %v2246_v12, 0.0  ;;  %v2252_v22 = vadd.f32 %v7269_v6, %v6891_v23 }
 0x332   : > { %v7397_v32 = vpop.f32.mrf.mxu0  ;;  %v7399_v24 = vpop.f32.mrf.mxu1  ;;  %v3039_v61 = vmax.f32 %v2230_v15, 0.0 }
 0x333   : > { %v3049_v37 = vmax.f32 %v2427_v36, 0.0  ;;  %v2437_v36 = vadd.f32 %v7243_v0, %v6923_v48  ;;  %v3208_v15 = vpack.c.bf16 %v3064_v52, %v3056_v47  ;;  %v3072_v6 = vmax.f32 %v2252_v22, 0.0  ;;  %v8315_v22 = vld [vmem:[#allocation24_spill] sm:$0xff] }
 0x334   : > { %v7401_v25 = vpop.f32.mrf.mxu0  ;;  %v7403_v60 = vpop.f32.mrf.mxu1  ;;  %v3199_v27 = vpack.c.bf16 %v3047_v59, %v3039_v61  ;;  %v3080_v61 = vmax.f32 %v2256_v21, 0.0 }
 0x336   : > { %v7409_v3 = vpop.f32.mrf.mxu0  ;;  %v7411_v2 = vpop.f32.mrf.mxu1 }
 0x338   : > { %v7421_v16 = vpop.f32.mrf.mxu0  ;;  %v7423_v56 = vpop.f32.mrf.mxu1  ;;  %3871 = vmatmul.mubr.bf16.gmra.mxu0 %v3191_v57  ;;  %4032 = vmatmul.mubr.bf16.gmra.mxu1 %v3193_v10 }
 0x339   : > { %8309 = vst [vmem:[#allocation28_spill] sm:$0xff] %v7421_v16  ;;  %8310 = vst [vmem:[#allocation29_spill] sm:$0xff] %v7423_v56  ;;  %3878 = vmatprep.mubr.bf16.mxu0 %v3200_v5  ;;  %4039 = vmatprep.mubr.bf16.mxu1 %v3202_v20  ;;  %v3041_v56 = vmax.f32 %v2423_v9, 0.0  ;;  %v3058_v16 = vmax.f32 %v2435_v18, 0.0  ;;  %v2449_v20 = vadd.f32 %v7283_v31, %v6893_v51 }
 0x33a   : > { %v7429_v26 = vpop.f32.mrf.mxu0  ;;  %v7431_v43 = vpop.f32.mrf.mxu1  ;;  %v2433_v18 = vadd.f32 %v8312_v63, %v6923_v48  ;;  %v2445_v31 = vadd.f32 %v7271_v55, %v6893_v51 }
 0x33b   : > { %v3201_v8 = vpack.c.bf16 %v3049_v37, %v3041_v56  ;;  %v3210_v9 = vpack.c.bf16 %v3066_v7, %v3058_v16  ;;  %v8311_v56 = vld [vmem:[#allocation22_spill] sm:$0xff]  ;;  %v3063_v16 = vmax.f32 %v2244_v62, 0.0  ;;  %v3065_v37 = vmax.f32 %v2437_v36, 0.0 }
 0x33c   : > { %v7433_v57 = vpop.f32.mrf.mxu0  ;;  %v7435_v10 = vpop.f32.mrf.mxu1  ;;  %v2240_v45 = vadd.f32 %v8311_v56, %v6921_v13  ;;  %v3082_v47 = vmax.f32 %v2449_v20, 0.0  ;;  %v3057_v63 = vmax.f32 %v2433_v18, 0.0  ;;  %v2254_v62 = vadd.f32 %v7273_v41, %v6921_v13  ;;  %v8316_v41 = vld [vmem:[#allocation19_spill] sm:$0xff] }
 0x33d   : > { %v2447_v36 = vadd.f32 %v7275_v46, %v6923_v48  ;;  %v2266_v20 = vadd.f32 %v7313_v58, %v6891_v23  ;;  %v2262_v58 = vadd.f32 %v7301_v35, %v6891_v23 }
 0x33e   : > { %v7441_v5 = vpop.f32.mrf.mxu0  ;;  %v7443_v12 = vpop.f32.mrf.mxu1  ;;  %v3055_v56 = vmax.f32 %v2240_v45, 0.0  ;;  %v3209_v55 = vpack.c.bf16 %v3065_v37, %v3057_v63  ;;  %v3216_v45 = vpack.c.bf16 %v3080_v61, %v3072_v6  ;;  %v8319_v61 = vld [vmem:[#allocation16_spill] sm:$0xff] }
 0x33f   : > { %v3081_v63 = vmax.f32 %v2447_v36, 0.0 }
 0x340   : > { %v7453_v59 = vpop.f32.mrf.mxu0  ;;  %v7455_v0 = vpop.f32.mrf.mxu1  ;;  %3879 = vmatmul.mubr.bf16.gmra.mxu0 %v3199_v27  ;;  %4040 = vmatmul.mubr.bf16.gmra.mxu1 %v3201_v8 }
 0x341   : > { %8313 = vst [vmem:[#allocation21_spill] sm:$0xff] %v7453_v59  ;;  %8314 = vst [vmem:[#allocation18_spill] sm:$0xff] %v7455_v0  ;;  %3886 = vmatprep.mubr.bf16.mxu0 %v3208_v15  ;;  %4047 = vmatprep.mubr.bf16.mxu1 %v3210_v9  ;;  %v3074_v0 = vmax.f32 %v2445_v31, 0.0  ;;  %v3207_v59 = vpack.c.bf16 %v3063_v16, %v3055_v56  ;;  %v2459_v9 = vadd.f32 %v7315_v29, %v6893_v51 }
 0x342   : > { %v7461_v52 = vpop.f32.mrf.mxu0  ;;  %v7463_v7 = vpop.f32.mrf.mxu1  ;;  %v2250_v31 = vadd.f32 %v8315_v22, %v6921_v13  ;;  %v2443_v16 = vadd.f32 %v8316_v41, %v6923_v48  ;;  %v2455_v29 = vadd.f32 %v7303_v49, %v6893_v51  ;;  %v3079_v56 = vmax.f32 %v2254_v62, 0.0 }
 0x343   : > { %v3218_v18 = vpack.c.bf16 %v3082_v47, %v3074_v0  ;;  %v1417_v0 = vsub.s32 5, %v8319_v61  ;;  %v1425_v47 = vsub.s32 7, %v8319_v61  ;;  %v3088_v51 = vmax.f32 %v2262_v58, 0.0 }
 0x344   : > { %v7465_v27 = vpop.f32.mrf.mxu0  ;;  %v7467_v8 = vpop.f32.mrf.mxu1  ;;  %v3071_v41 = vmax.f32 %v2250_v31, 0.0  ;;  %v3090_v49 = vmax.f32 %v2455_v29, 0.0 }
 0x346   : > { %v7473_v15 = vpop.f32.mrf.mxu0  ;;  %v7475_v21 = vpop.f32.mrf.mxu1 }
 0x348   : > { %v7485_v37 = vpop.f32.mrf.mxu0  ;;  %v7487_v46 = vpop.f32.mrf.mxu1  ;;  %3887 = vmatmul.mubr.bf16.gmra.mxu0 %v3207_v59  ;;  %4048 = vmatmul.mubr.bf16.gmra.mxu1 %v3209_v55  ;;  %v3096_v59 = vmax.f32 %v2266_v20, 0.0  ;;  %v3098_v55 = vmax.f32 %v2459_v9, 0.0  ;;  %v2264_v20 = vadd.f32 %v7305_v44, %v6921_v13  ;;  %v2457_v9 = vadd.f32 %v7307_v30, %v6923_v48  ;;  %v8323_v44 = vld [vmem:[#allocation25_spill] sm:$0xff] }
 0x349   : > { %8317 = vst [vmem:[#allocation30_spill] sm:$0xff] %v7485_v37  ;;  %8318 = vst [vmem:[#allocation22_spill] sm:$0xff] %v7487_v46  ;;  %3894 = vmatprep.mubr.bf16.mxu0 %v3216_v45  ;;  %4055 = vmatprep.mubr.bf16.mxu1 %v3218_v18  ;;  %v3073_v46 = vmax.f32 %v2443_v16, 0.0  ;;  %v5997_v45 = vld [vmem:[%s8239_s6] sm:$0xff]  ;;  %v3215_v18 = vpack.c.bf16 %v3079_v56, %v3071_v41  ;;  %v1413_v30 = vsub.s32 4, %v8319_v61  ;;  %v1421_v41 = vsub.s32 6, %v8319_v61 }
 0x34a   : > { %v7495_v6 = vpop.f32.mrf.mxu0  ;;  %v7497_v22 = vpop.f32.mrf.mxu1  ;;  %v7506_v62 = vrot.slane %v5997_v45, %v1417_v0  ;;  %v7508_v36 = vrot.slane %v5997_v45, %v1425_v47  ;;  %v3224_v0 = vpack.c.bf16 %v3096_v59, %v3088_v51  ;;  %v3226_v47 = vpack.c.bf16 %v3098_v55, %v3090_v49 }
 0x34b   : > { %v3217_v37 = vpack.c.bf16 %v3081_v63, %v3073_v46  ;;  %v8322_v46 = vld [vmem:[#allocation20_spill] sm:$0xff]  ;;  %v2453_v63 = vadd.f32 %v8323_v44, %v6923_v48  ;;  %v3097_v48 = vmax.f32 %v2457_v9, 0.0 }
 0x34c   : > { %v7499_v23 = vpop.f32.mrf.mxu0  ;;  %v7501_v35 = vpop.f32.mrf.mxu1  ;;  %v2502_v58 = vadd.f32 %v7345_v38, %v7506_v62  ;;  %v2695_v29 = vadd.f32 %v7347_v34, %v7508_v36  ;;  %v2260_v56 = vadd.f32 %v8322_v46, %v6921_v13  ;;  %v2498_v38 = vadd.f32 %v7333_v40, %v7506_v62 }
 0x34d   : > { %8320 = vst [vmem:[#allocation23_spill] sm:$0xff] %v7499_v23  ;;  %8321 = vst [vmem:[#allocation24_spill] sm:$0xff] %v7501_v35  ;;  %v2691_v34 = vadd.f32 %v7335_v42, %v7508_v36  ;;  %v3095_v13 = vmax.f32 %v2264_v20, 0.0  ;;  %v3089_v44 = vmax.f32 %v2453_v63, 0.0  ;;  %v2705_v63 = vadd.f32 %v7379_v39, %v7508_v36 }
 0x34e   : > { %v7514_v31 = vpop.f32.mrf.mxu0  ;;  %v7516_v16 = vpop.f32.mrf.mxu1  ;;  %v2860_v51 = vmax.f32 %v2502_v58, 0.0  ;;  %v2862_v49 = vmax.f32 %v2695_v29, 0.0  ;;  %v3087_v46 = vmax.f32 %v2260_v56, 0.0  ;;  %v2852_v42 = vmax.f32 %v2498_v38, 0.0 }
 0x34f   : > { %v3225_v9 = vpack.c.bf16 %v3097_v48, %v3089_v44  ;;  %v2701_v39 = vadd.f32 %v7367_v50, %v7508_v36 }
 0x350   : > { %v7528_v35 = vpop.f32.mrf.mxu0  ;;  %v7530_v23 = vpop.f32.mrf.mxu1  ;;  %3895 = vmatmul.mubr.bf16.gmra.mxu0 %v3215_v18  ;;  %4056 = vmatmul.mubr.bf16.gmra.mxu1 %v3217_v37  ;;  %v7540_v18 = vrot.slane %v5997_v45, %v1413_v30  ;;  %v7542_v37 = vrot.slane %v5997_v45, %v1421_v41  ;;  %v3223_v20 = vpack.c.bf16 %v3095_v13, %v3087_v46 }
 0x351   : > { %3902 = vmatprep.mubr.bf16.mxu0 %v3224_v0  ;;  %4063 = vmatprep.mubr.bf16.mxu1 %v3226_v47  ;;  %v2854_v0 = vmax.f32 %v2691_v34, 0.0  ;;  %v2512_v45 = vadd.f32 %v7377_v54, %v7506_v62  ;;  %v3108_v30 = vpack.c.bf16 %v2860_v51, %v2852_v42  ;;  %v2508_v54 = vadd.f32 %v7365_v17, %v7506_v62 }
 0x352   : > { %v7536_v59 = vpop.f32.mrf.mxu0  ;;  %v7538_v55 = vpop.f32.mrf.mxu1  ;;  %v2500_v47 = vadd.f32 %v7337_v14, %v7540_v18  ;;  %v2693_v58 = vadd.f32 %v7339_v1, %v7542_v37  ;;  %v2496_v38 = vadd.f32 %v7325_v53, %v7540_v18  ;;  %v2689_v14 = vadd.f32 %v7327_v19, %v7542_v37 }
 0x353   : > { %v3110_v41 = vpack.c.bf16 %v2862_v49, %v2854_v0  ;;  %v2876_v19 = vmax.f32 %v2512_v45, 0.0  ;;  %v2878_v49 = vmax.f32 %v2705_v63, 0.0  ;;  %v2868_v17 = vmax.f32 %v2508_v54, 0.0 }
 0x354   : > { %v7544_v40 = vpop.f32.mrf.mxu0  ;;  %v7546_v61 = vpop.f32.mrf.mxu1  ;;  %v2859_v13 = vmax.f32 %v2500_v47, 0.0  ;;  %v2861_v48 = vmax.f32 %v2693_v58, 0.0  ;;  %v2851_v46 = vmax.f32 %v2496_v38, 0.0  ;;  %v2853_v44 = vmax.f32 %v2689_v14, 0.0 }
 0x355   : > { %v2510_v47 = vadd.f32 %v7369_v28, %v7540_v18  ;;  %v2703_v58 = vadd.f32 %v7371_v33, %v7542_v37  ;;  %v2522_v63 = vadd.f32 %v7409_v3, %v7506_v62  ;;  %v3116_v38 = vpack.c.bf16 %v2876_v19, %v2868_v17  ;;  %v8324_v28 = vld [vmem:[#allocation26_spill] sm:$0xff] }
 0x356   : > { %v7552_v29 = vpop.f32.mrf.mxu0  ;;  %v7554_v56 = vpop.f32.mrf.mxu1  ;;  %v3109_v50 = vpack.c.bf16 %v2861_v48, %v2853_v44  ;;  %v2506_v54 = vadd.f32 %v7357_v11, %v7540_v18  ;;  %v2518_v3 = vadd.f32 %v7397_v32, %v7506_v62 }
 0x357   : > { %v2875_v48 = vmax.f32 %v2510_v47, 0.0  ;;  %v2877_v19 = vmax.f32 %v2703_v58, 0.0  ;;  %v2520_v47 = vadd.f32 %v7401_v25, %v7540_v18  ;;  %v2713_v58 = vadd.f32 %v7403_v60, %v7542_v37  ;;  %v8326_v25 = vld [vmem:[#allocation27_spill] sm:$0xff] }
 0x358   : > { %v7564_v34 = vpop.f32.mrf.mxu0  ;;  %v7566_v1 = vpop.f32.mrf.mxu1  ;;  %3903 = vmatmul.mubr.bf16.gmra.mxu0 %v3223_v20  ;;  %4064 = vmatmul.mubr.bf16.gmra.mxu1 %v3225_v9  ;;  %v2870_v20 = vmax.f32 %v2701_v39, 0.0  ;;  %v3107_v9 = vpack.c.bf16 %v2859_v13, %v2851_v46  ;;  %v2699_v39 = vadd.f32 %v8324_v28, %v7542_v37  ;;  %v2892_v46 = vmax.f32 %v2522_v63, 0.0 }
 0x359   : > { %4104 = vmatprep.mubr.bf16.mxu0 %v3108_v30  ;;  %4265 = vmatprep.mubr.bf16.mxu1 %v3110_v41  ;;  %v2715_v41 = vadd.f32 %v7411_v2, %v7508_v36  ;;  %v2711_v2 = vadd.f32 %v7399_v24, %v7508_v36  ;;  %v2867_v17 = vmax.f32 %v2506_v54, 0.0  ;;  %v2884_v32 = vmax.f32 %v2518_v3, 0.0 }
 0x35a   : > { %v7572_v53 = vpop.f32.mrf.mxu0  ;;  %v7574_v51 = vpop.f32.mrf.mxu1  ;;  %v3118_v14 = vpack.c.bf16 %v2878_v49, %v2870_v20  ;;  %v2869_v20 = vmax.f32 %v2699_v39, 0.0  ;;  %v2516_v3 = vadd.f32 %v7389_v4, %v7540_v18 }
 0x35b   : > { %v2894_v44 = vmax.f32 %v2715_v41, 0.0  ;;  %v2886_v28 = vmax.f32 %v2711_v2, 0.0  ;;  %v2532_v41 = vadd.f32 %v7441_v5, %v7506_v62  ;;  %v3124_v54 = vpack.c.bf16 %v2892_v46, %v2884_v32 }
 0x35c   : > { %v7576_v42 = vpop.f32.mrf.mxu0  ;;  %v7578_v0 = vpop.f32.mrf.mxu1  ;;  %v3117_v24 = vpack.c.bf16 %v2877_v19, %v2869_v20  ;;  %v2709_v2 = vadd.f32 %v8326_v25, %v7542_v37  ;;  %v2528_v5 = vadd.f32 %v7429_v26, %v7506_v62  ;;  %v2891_v19 = vmax.f32 %v2520_v47, 0.0 }
 0x35d   : > { %v3126_v39 = vpack.c.bf16 %v2894_v44, %v2886_v28  ;;  %v2893_v46 = vmax.f32 %v2713_v58, 0.0  ;;  %v2883_v32 = vmax.f32 %v2516_v3, 0.0  ;;  %v2530_v47 = vadd.f32 %v7433_v57, %v7540_v18  ;;  %v8329_v57 = vld [vmem:[#allocation29_spill] sm:$0xff] }
 0x35e   : > { %v7584_v30 = vpop.f32.mrf.mxu0  ;;  %v7586_v45 = vpop.f32.mrf.mxu1  ;;  %v2885_v28 = vmax.f32 %v2709_v2, 0.0  ;;  %v2900_v26 = vmax.f32 %v2528_v5, 0.0  ;;  %v2723_v58 = vadd.f32 %v7435_v10, %v7542_v37  ;;  %v8328_v5 = vld [vmem:[#allocation28_spill] sm:$0xff] }
 0x360   : > { %v7596_v13 = vpop.f32.mrf.mxu0  ;;  %v7598_v33 = vpop.f32.mrf.mxu1  ;;  %4105 = vmatmul.mubr.bf16.vlgmr.msra.gmra.mxu0 %v3107_v9  ;;  %4266 = vmatmul.mubr.bf16.vlgmr.msra.gmra.mxu1 %v3109_v50 }
 0x361   : > { %8325 = vst [vmem:[#allocation19_spill] sm:$0xff] %v7598_v33  ;;  %4112 = vmatprep.mubr.bf16.mxu0 %v3116_v38  ;;  %4273 = vmatprep.mubr.bf16.mxu1 %v3118_v14  ;;  %v3115_v33 = vpack.c.bf16 %v2875_v48, %v2867_v17  ;;  %v2725_v14 = vadd.f32 %v7443_v12, %v7508_v36  ;;  %v2908_v17 = vmax.f32 %v2532_v41, 0.0 }
 0x362   : > { %v7604_v11 = vpop.f32.mrf.mxu0  ;;  %v7606_v49 = vpop.f32.mrf.mxu1  ;;  %v2721_v12 = vadd.f32 %v7431_v43, %v7508_v36  ;;  %v3125_v43 = vpack.c.bf16 %v2893_v46, %v2885_v28 }
 0x363   : > { %v2910_v20 = vmax.f32 %v2725_v14, 0.0  ;;  %v2542_v14 = vadd.f32 %v7473_v15, %v7506_v62  ;;  %v3132_v3 = vpack.c.bf16 %v2908_v17, %v2900_v26  ;;  %v2538_v15 = vadd.f32 %v7461_v52, %v7506_v62 }
 0x364   : > { %v7608_v9 = vpop.f32.mrf.mxu0  ;;  %v7610_v50 = vpop.f32.mrf.mxu1  ;;  %v2902_v25 = vmax.f32 %v2721_v12, 0.0  ;;  %v2526_v12 = vadd.f32 %v8328_v5, %v7540_v18  ;;  %v2907_v17 = vmax.f32 %v2530_v47, 0.0 }
 0x365   : > { %v2924_v26 = vmax.f32 %v2542_v14, 0.0  ;;  %v2733_v14 = vadd.f32 %v7467_v8, %v7542_v37 }
 0x366   : > { %v7616_v38 = vpop.f32.mrf.mxu0  ;;  %v7618_v63 = vpop.f32.mrf.mxu1  ;;  %v3134_v2 = vpack.c.bf16 %v2910_v20, %v2902_v25  ;;  %v2909_v20 = vmax.f32 %v2723_v58, 0.0 }
 0x368   : > { %v7628_v48 = vpop.f32.mrf.mxu0  ;;  %v7630_v60 = vpop.f32.mrf.mxu1  ;;  %4113 = vmatmul.mubr.bf16.gmra.mxu0 %v3115_v33  ;;  %4274 = vmatmul.mubr.bf16.gmra.mxu1 %v3117_v24 }
 0x369   : > { %8327 = vst [vmem:[#allocation20_spill] sm:$0xff] %v7630_v60  ;;  %4120 = vmatprep.mubr.bf16.mxu0 %v3124_v54  ;;  %4281 = vmatprep.mubr.bf16.mxu1 %v3126_v39  ;;  %v3123_v60 = vpack.c.bf16 %v2891_v19, %v2883_v32  ;;  %v2735_v39 = vadd.f32 %v7475_v21, %v7508_v36 }
 0x36a   : > { %v7636_v4 = vpop.f32.mrf.mxu0  ;;  %v7638_v44 = vpop.f32.mrf.mxu1  ;;  %v2719_v19 = vadd.f32 %v8329_v57, %v7542_v37  ;;  %v2731_v21 = vadd.f32 %v7463_v7, %v7508_v36  ;;  %v2916_v7 = vmax.f32 %v2538_v15, 0.0 }
 0x36b   : > { %v2926_v25 = vmax.f32 %v2735_v39, 0.0 }
 0x36c   : > { %v7640_v33 = vpop.f32.mrf.mxu0  ;;  %v7642_v24 = vpop.f32.mrf.mxu1  ;;  %v2901_v5 = vmax.f32 %v2719_v19, 0.0  ;;  %v2745_v19 = vadd.f32 %v7516_v16, %v7508_v36  ;;  %v3140_v15 = vpack.c.bf16 %v2924_v26, %v2916_v7  ;;  %v2741_v16 = vadd.f32 %v7497_v22, %v7508_v36 }
 0x36e   : > { %v7648_v54 = vpop.f32.mrf.mxu0  ;;  %v7650_v41 = vpop.f32.mrf.mxu1  ;;  %v3133_v58 = vpack.c.bf16 %v2909_v20, %v2901_v5 }
 0x370   : > { %v7660_v46 = vpop.f32.mrf.mxu0  ;;  %v7662_v10 = vpop.f32.mrf.mxu1  ;;  %4121 = vmatmul.mubr.bf16.gmra.mxu0 %v3123_v60  ;;  %4282 = vmatmul.mubr.bf16.gmra.mxu1 %v3125_v43  ;;  %v5989_v60 = vld [vmem:[%s8242_s9 + $0x38] sm:$0xff]   ;;  %v2899_v43 = vmax.f32 %v2526_v12, 0.0  ;;  %v2552_v12 = vadd.f32 %v7514_v31, %v7506_v62  ;;  %v2548_v31 = vadd.f32 %v7495_v6, %v7506_v62 }
 0x371   : > { %8330 = vst [vmem:[#allocation25_spill] sm:$0xff] %v7660_v46  ;;  %8331 = vst [vmem:[#allocation26_spill] sm:$0xff] %v7662_v10  ;;  %4128 = vmatprep.mubr.bf16.mxu0 %v3132_v3  ;;  %4289 = vmatprep.mubr.bf16.mxu1 %v3134_v2  ;;  %v2918_v3 = vmax.f32 %v2731_v21, 0.0  ;;  %v2540_v2 = vadd.f32 %v7465_v27, %v7540_v18  ;;  %v8333_v27 = vld [vmem:[#allocation18_spill] sm:$0xff] }
 0x372   : > { %v7668_v32 = vpop.f32.mrf.mxu0  ;;  %v7670_v28 = vpop.f32.mrf.mxu1  ;;  %5760 = vmatprep.subr.bf16.mxu0 %v5989_v60  ;;  %v3131_v47 = vpack.c.bf16 %v2907_v17, %v2899_v43  ;;  %v8332_v17 = vld [vmem:[#allocation21_spill] sm:$0xff]  ;;  %v2729_v43 = vadd.f32 %v8333_v27, %v7542_v37  ;;  %v2932_v6 = vmax.f32 %v2548_v31, 0.0 }
 0x373   : > { %5761 = vmatpush3.bf16.msra.mxu0 %v5989_v60  ;;  %v3142_v21 = vpack.c.bf16 %v2926_v25, %v2918_v3  ;;  %v2536_v20 = vadd.f32 %v8332_v17, %v7540_v18  ;;  %v2923_v26 = vmax.f32 %v2540_v2, 0.0  ;;  %v2925_v25 = vmax.f32 %v2733_v14, 0.0  ;;  %v8338_v14 = vld [vmem:[#allocation24_spill] sm:$0xff] }
 0x374   : > { %v7675_v52 = vpop.f32.mrf.mxu0  ;;  %v7677_v57 = vpop.f32.mrf.mxu1  ;;  %v2940_v3 = vmax.f32 %v2552_v12, 0.0  ;;  %v2942_v17 = vmax.f32 %v2745_v19, 0.0  ;;  %v2562_v19 = vadd.f32 %v7552_v29, %v7506_v62  ;;  %v2558_v29 = vadd.f32 %v7536_v59, %v7506_v62 }
 0x375   : > { %v2915_v27 = vmax.f32 %v2536_v20, 0.0  ;;  %v2755_v20 = vadd.f32 %v7554_v56, %v7508_v36  ;;  %v2751_v56 = vadd.f32 %v7538_v55, %v7508_v36 }
 0x376   : > { %v7683_v39 = vpop.f32.mrf.mxu0  ;;  %v7685_v10 = vpop.f32.mrf.mxu1  ;;  %v2948_v55 = vmax.f32 %v2558_v29, 0.0 }
 0x377   : > { %v3139_v46 = vpack.c.bf16 %v2923_v26, %v2915_v27  ;;  %v8340_v26 = vld [vmem:[#allocation22_spill] sm:$0xff] }
 0x378   : > { %v7695_v8 = vpop.f32.mrf.mxu0  ;;  %v7697_v5 = vpop.f32.mrf.mxu1  ;;  %4129 = vmatmul.mubr.bf16.gmra.mxu0 %v3131_v47  ;;  %4290 = vmatmul.mubr.bf16.gmra.mxu1 %v3133_v58 }
 0x379   : > { %8334 = vst [vmem:[#allocation27_spill] sm:$0xff] %v7695_v8  ;;  %8335 = vst [vmem:[#allocation28_spill] sm:$0xff] %v7697_v5  ;;  %4136 = vmatprep.mubr.bf16.mxu0 %v3140_v15  ;;  %4297 = vmatprep.mubr.bf16.mxu1 %v3142_v21  ;;  %v2917_v5 = vmax.f32 %v2729_v43, 0.0  ;;  %v2934_v8 = vmax.f32 %v2741_v16, 0.0  ;;  %v8337_v15 = vld [vmem:[#allocation23_spill] sm:$0xff]  ;;  %v2743_v21 = vadd.f32 %v8338_v14, %v7542_v37  ;;  %v2956_v14 = vmax.f32 %v2562_v19, 0.0 }
 0x37a   : > { %v7703_v60 = vpop.f32.mrf.mxu0  ;;  %v7705_v7 = vpop.f32.mrf.mxu1  ;;  %v2550_v2 = vadd.f32 %v8337_v15, %v7540_v18  ;;  %v3148_v43 = vpack.c.bf16 %v2940_v3, %v2932_v6  ;;  %v2753_v19 = vadd.f32 %v7546_v61, %v7542_v37 }
 0x37b   : > { %8336 = vst [vmem:[#allocation29_spill] sm:$0xff] %v7703_v60  ;;  %v3141_v22 = vpack.c.bf16 %v2925_v25, %v2917_v5  ;;  %v3150_v31 = vpack.c.bf16 %v2942_v17, %v2934_v8  ;;  %v8339_v5 = vld [vmem:[#allocation30_spill] sm:$0xff]  ;;  %v2739_v25 = vadd.f32 %v8340_v26, %v7542_v37  ;;  %v2941_v3 = vmax.f32 %v2743_v21, 0.0 }
 0x37c   : > { %v7707_v47 = vpop.f32.mrf.mxu0  ;;  %v7709_v58 = vpop.f32.mrf.mxu1  ;;  %v2546_v16 = vadd.f32 %v8339_v5, %v7540_v18  ;;  %v2939_v8 = vmax.f32 %v2550_v2, 0.0  ;;  %v2958_v5 = vmax.f32 %v2755_v20, 0.0  ;;  %v3156_v29 = vpack.c.bf16 %v2956_v14, %v2948_v55 }
 0x37d   : > { %v2933_v26 = vmax.f32 %v2739_v25, 0.0  ;;  %v2765_v25 = vadd.f32 %v7586_v45, %v7508_v36  ;;  %v2761_v45 = vadd.f32 %v7574_v51, %v7508_v36 }
 0x37e   : > { %v7715_v60 = vpop.f32.mrf.mxu0  ;;  %v7717_v12 = vpop.f32.mrf.mxu1 }
 0x37f   : > { %v3149_v21 = vpack.c.bf16 %v2941_v3, %v2933_v26 }
 0x380   : > { %v7727_v27 = vpop.f32.mrf.mxu0  ;;  %v7729_v15 = vpop.f32.mrf.mxu1  ;;  %4137 = vmatmul.mubr.bf16.gmra.mxu0 %v3139_v46  ;;  %4298 = vmatmul.mubr.bf16.gmra.mxu1 %v3141_v22  ;;  %v5990_v46 = vld [vmem:[%s8242_s9 + $0x30] sm:$0xff]   ;;  %v2931_v22 = vmax.f32 %v2546_v16, 0.0  ;;  %v2572_v16 = vadd.f32 %v7584_v30, %v7506_v62  ;;  %v2568_v30 = vadd.f32 %v7572_v53, %v7506_v62 }
 0x381   : > { %8341 = vst [vmem:[#allocation21_spill] sm:$0xff] %v7727_v27  ;;  %8342 = vst [vmem:[#allocation18_spill] sm:$0xff] %v7729_v15  ;;  %4144 = vmatprep.mubr.bf16.mxu0 %v3148_v43  ;;  %4305 = vmatprep.mubr.bf16.mxu1 %v3150_v31  ;;  %v2950_v43 = vmax.f32 %v2751_v56, 0.0  ;;  %v2560_v31 = vadd.f32 %v7544_v40, %v7540_v18  ;;  %v2749_v40 = vadd.f32 %v7530_v23, %v7542_v37 }
 0x382   : > { %v7735_v17 = vpop.f32.mrf.mxu0  ;;  %v7737_v6 = vpop.f32.mrf.mxu1  ;;  %5762 = vmatprep.subr.bf16.mxu0 %v5990_v46  ;;  %v3147_v2 = vpack.c.bf16 %v2939_v8, %v2931_v22  ;;  %v2556_v8 = vadd.f32 %v7528_v35, %v7540_v18  ;;  %v2972_v23 = vmax.f32 %v2572_v16, 0.0  ;;  %v2974_v22 = vmax.f32 %v2765_v25, 0.0 }
 0x383   : > { %5763 = vmatpush3.bf16.msra.mxu0 %v5990_v46  ;;  %v3158_v56 = vpack.c.bf16 %v2958_v5, %v2950_v43  ;;  %v2955_v14 = vmax.f32 %v2560_v31, 0.0  ;;  %v2957_v5 = vmax.f32 %v2753_v19, 0.0  ;;  %v2949_v55 = vmax.f32 %v2749_v40, 0.0 }
 0x384   : > { %v7742_v59 = vpop.f32.mrf.mxu0  ;;  %v7744_v15 = vpop.f32.mrf.mxu1  ;;  %v2947_v26 = vmax.f32 %v2556_v8, 0.0  ;;  %v2964_v53 = vmax.f32 %v2568_v30, 0.0  ;;  %v2570_v31 = vadd.f32 %v7576_v42, %v7540_v18  ;;  %v2763_v19 = vadd.f32 %v7578_v0, %v7542_v37 }
 0x385   : > { %v3157_v51 = vpack.c.bf16 %v2957_v5, %v2949_v55  ;;  %v2582_v25 = vadd.f32 %v7616_v38, %v7506_v62  ;;  %v2566_v30 = vadd.f32 %v7564_v34, %v7540_v18  ;;  %v2759_v42 = vadd.f32 %v7566_v1, %v7542_v37 }
 0x386   : > { %v7750_v20 = vpop.f32.mrf.mxu0  ;;  %v7752_v27 = vpop.f32.mrf.mxu1  ;;  %v3164_v8 = vpack.c.bf16 %v2972_v23, %v2964_v53  ;;  %v2578_v38 = vadd.f32 %v7604_v11, %v7506_v62  ;;  %v2973_v5 = vmax.f32 %v2763_v19, 0.0  ;;  %v2580_v19 = vadd.f32 %v7608_v9, %v7540_v18  ;;  %v8344_v9 = vld [vmem:[#allocation19_spill] sm:$0xff] }
 0x387   : > { %v2988_v1 = vmax.f32 %v2582_v25, 0.0  ;;  %v2965_v55 = vmax.f32 %v2759_v42, 0.0  ;;  %v2773_v25 = vadd.f32 %v7610_v50, %v7542_v37 }
 0x388   : > { %v7762_v61 = vpop.f32.mrf.mxu0  ;;  %v7764_v3 = vpop.f32.mrf.mxu1  ;;  %4145 = vmatmul.mubr.bf16.gmra.mxu0 %v3147_v2  ;;  %4306 = vmatmul.mubr.bf16.gmra.mxu1 %v3149_v21  ;;  %v2966_v21 = vmax.f32 %v2761_v45, 0.0 }
 0x389   : > { %8343 = vst [vmem:[#allocation23_spill] sm:$0xff] %v7764_v3  ;;  %4152 = vmatprep.mubr.bf16.mxu0 %v3156_v29  ;;  %4313 = vmatprep.mubr.bf16.mxu1 %v3158_v56  ;;  %v3155_v3 = vpack.c.bf16 %v2955_v14, %v2947_v26  ;;  %v2775_v56 = vadd.f32 %v7618_v63, %v7508_v36  ;;  %v2971_v14 = vmax.f32 %v2570_v31, 0.0  ;;  %v2963_v26 = vmax.f32 %v2566_v30, 0.0 }
 0x38a   : > { %v7770_v35 = vpop.f32.mrf.mxu0  ;;  %v7772_v46 = vpop.f32.mrf.mxu1  ;;  %v3166_v40 = vpack.c.bf16 %v2974_v22, %v2966_v21  ;;  %v2771_v63 = vadd.f32 %v7606_v49, %v7508_v36  ;;  %v2980_v49 = vmax.f32 %v2578_v38, 0.0  ;;  %v3165_v31 = vpack.c.bf16 %v2973_v5, %v2965_v55 }
 0x38b   : > { %v2990_v22 = vmax.f32 %v2775_v56, 0.0  ;;  %v2785_v30 = vadd.f32 %v7650_v41, %v7508_v36  ;;  %v2781_v41 = vadd.f32 %v7638_v44, %v7508_v36  ;;  %v2590_v44 = vadd.f32 %v7640_v33, %v7540_v18  ;;  %v8350_v33 = vld [vmem:[#allocation20_spill] sm:$0xff] }
 0x38c   : > { %v7774_v43 = vpop.f32.mrf.mxu0  ;;  %v7776_v2 = vpop.f32.mrf.mxu1  ;;  %v2982_v21 = vmax.f32 %v2771_v63, 0.0  ;;  %v3172_v42 = vpack.c.bf16 %v2988_v1, %v2980_v49  ;;  %v2576_v63 = vadd.f32 %v7596_v13, %v7540_v18  ;;  %v2987_v1 = vmax.f32 %v2580_v19, 0.0 }
 0x38d   : > { %v3006_v55 = vmax.f32 %v2785_v30, 0.0  ;;  %v2783_v19 = vadd.f32 %v7642_v24, %v7542_v37  ;;  %v2795_v30 = vadd.f32 %v7685_v10, %v7508_v36 }
 0x38e   : > { %v7782_v29 = vpop.f32.mrf.mxu0  ;;  %v7784_v16 = vpop.f32.mrf.mxu1  ;;  %v3174_v38 = vpack.c.bf16 %v2990_v22, %v2982_v21  ;;  %v2989_v22 = vmax.f32 %v2773_v25, 0.0  ;;  %v2979_v49 = vmax.f32 %v2576_v63, 0.0 }
 0x390   : > { %v7794_v45 = vpop.f32.mrf.mxu0  ;;  %v7796_v0 = vpop.f32.mrf.mxu1  ;;  %4153 = vmatmul.mubr.bf16.gmra.mxu0 %v3155_v3  ;;  %4314 = vmatmul.mubr.bf16.gmra.mxu1 %v3157_v51  ;;  %v5991_v3 = vld [vmem:[%s8242_s9 + $0x28] sm:$0xff]   ;;  %v3163_v51 = vpack.c.bf16 %v2971_v14, %v2963_v26  ;;  %v2769_v14 = vadd.f32 %v8344_v9, %v7542_v37  ;;  %v2998_v9 = vmax.f32 %v2781_v41, 0.0  ;;  %v3171_v25 = vpack.c.bf16 %v2987_v1, %v2979_v49 }
 0x391   : > { %4160 = vmatprep.mubr.bf16.mxu0 %v3164_v8  ;;  %4321 = vmatprep.mubr.bf16.mxu1 %v3166_v40  ;;  %v2592_v40 = vadd.f32 %v7648_v54, %v7506_v62  ;;  %v2588_v54 = vadd.f32 %v7636_v4, %v7506_v62  ;;  %v2598_v1 = vadd.f32 %v7668_v32, %v7506_v62  ;;  %v3003_v49 = vmax.f32 %v2590_v44, 0.0  ;;  %v5992_v44 = vld [vmem:[%s8242_s9 + $0x20] sm:$0xff]  }
 0x392   : > { %v7802_v34 = vpop.f32.mrf.mxu0  ;;  %v7804_v23 = vpop.f32.mrf.mxu1  ;;  %5764 = vmatprep.subr.bf16.mxu0 %v5991_v3  ;;  %v2981_v21 = vmax.f32 %v2769_v14, 0.0  ;;  %v2586_v14 = vadd.f32 %v7628_v48, %v7540_v18  ;;  %v3182_v24 = vpack.c.bf16 %v3006_v55, %v2998_v9 }
 0x393   : > { %5765 = vmatpush3.bf16.msra.mxu0 %v5991_v3  ;;  %v3004_v26 = vmax.f32 %v2592_v40, 0.0  ;;  %v2996_v4 = vmax.f32 %v2588_v54, 0.0  ;;  %v2602_v40 = vadd.f32 %v7683_v39, %v7506_v62  ;;  %v2779_v54 = vadd.f32 %v8350_v33, %v7542_v37 }
 0x394   : > { %v7809_v11 = vpop.f32.mrf.mxu0  ;;  %v7811_v53 = vpop.f32.mrf.mxu1  ;;  %v2791_v39 = vadd.f32 %v7670_v28, %v7508_v36  ;;  %5766 = vmatprep.subr.bf16.mxu0 %v5992_v44 }
 0x395   : > { %v3180_v41 = vpack.c.bf16 %v3004_v26, %v2996_v4  ;;  %v3020_v48 = vmax.f32 %v2602_v40, 0.0  ;;  %v7868_v26 = vld [vmem:[%s8241_s8] ss:$0 sm:$0xff]  ;;  %v2995_v4 = vmax.f32 %v2586_v14, 0.0  ;;  %v2997_v9 = vmax.f32 %v2779_v54, 0.0  ;;  %v8351_v14 = vld [vmem:[#allocation25_spill] sm:$0xff] }
 0x396   : > { %v7817_v56 = vpop.f32.mrf.mxu0  ;;  %v7819_v8 = vpop.f32.mrf.mxu1  ;;  %v2793_v40 = vadd.f32 %v7677_v57, %v7542_v37  ;;  %v2596_v54 = vadd.f32 %v8351_v14, %v7540_v18 }
 0x397   : > { %5767 = vmatpush3.bf16.msra.mxu0 %v5992_v44 }
 0x398   : > { %v7829_v50 = vpop.f32.mrf.mxu0  ;;  %v7831_v5 = vpop.f32.mrf.mxu1  ;;  %4161 = vmatmul.mubr.bf16.gmra.mxu0 %v3163_v51  ;;  %4322 = vmatmul.mubr.bf16.gmra.mxu1 %v3165_v31  ;;  %v3021_v14 = vmax.f32 %v2793_v40, 0.0 }
 0x399   : > { %8345 = vst [vmem:[#allocation24_spill] sm:$0xff] %v7829_v50  ;;  %8346 = vst [vmem:[#allocation30_spill] sm:$0xff] %v7831_v5  ;;  %4168 = vmatprep.mubr.bf16.mxu0 %v3172_v42  ;;  %4329 = vmatprep.mubr.bf16.mxu1 %v3174_v38  ;;  %v3173_v42 = vpack.c.bf16 %v2989_v22, %v2981_v21  ;;  %v3005_v21 = vmax.f32 %v2783_v19, 0.0  ;;  %v3022_v5 = vmax.f32 %v2795_v30, 0.0  ;;  %v3012_v19 = vmax.f32 %v2598_v1, 0.0 }
 0x39a   : > { %v7837_v13 = vpop.f32.mrf.mxu0  ;;  %v7839_v3 = vpop.f32.mrf.mxu1 }
 0x39b   : > { %8347 = vst [vmem:[#allocation22_spill] sm:$0xff] %v7839_v3  ;;  %v3181_v50 = vpack.c.bf16 %v3005_v21, %v2997_v9 }
 0x39c   : > { %v7841_v51 = vpop.f32.mrf.mxu0  ;;  %v7843_v31 = vpop.f32.mrf.mxu1 }
 0x39d   : > { %8348 = vst [vmem:[#allocation19_spill] sm:$0xff] %v7841_v51  ;;  %8349 = vst [vmem:[#allocation31_spill] sm:$0xff] %v7843_v31  ;;  %v8353_v31 = vld [vmem:[#allocation29_spill] sm:$0xff] }
 0x39e   : > { %v7853_v38 = vpop.f32.mrf.mxu0  ;;  %v7855_v63 = vpop.f32.mrf.mxu1 }
 0x3a0   : > { %v5250_v22 = vpop.f32.mrf.mxu0  ;;  %v5362_v10 = vpop.f32.mrf.mxu1  ;;  %4169 = vmatmul.mubr.bf16.gmra.mxu0 %v3171_v25  ;;  %4330 = vmatmul.mubr.bf16.gmra.mxu1 %v3173_v42  ;;  %v3014_v25 = vmax.f32 %v2791_v39, 0.0  ;;  %v2600_v42 = vadd.f32 %v7675_v52, %v7540_v18  ;;  %v2612_v39 = vadd.f32 %v7715_v60, %v7506_v62  ;;  %v5993_v60 = vld [vmem:[%s8242_s9 + $0x18] sm:$0xff]  }
 0x3a1   : > { %4176 = vmatprep.mubr.bf16.mxu0 %v3180_v41  ;;  %4337 = vmatprep.mubr.bf16.mxu1 %v3182_v24  ;;  %v3179_v24 = vpack.c.bf16 %v3003_v49, %v2995_v4  ;;  %v2805_v49 = vadd.f32 %v7717_v12, %v7508_v36  ;;  %v2801_v12 = vadd.f32 %v7705_v7, %v7508_v36  ;;  %v8354_v7 = vld [vmem:[#allocation27_spill] sm:$0xff] }
 0x3a2   : > { %v5251_v55 = vpop.f32.mrf.mxu0  ;;  %v5363_v32 = vpop.f32.mrf.mxu1  ;;  %v3190_v57 = vpack.c.bf16 %v3022_v5, %v3014_v25  ;;  %v3036_v44 = vmax.f32 %v2612_v39, 0.0  ;;  %5768 = vmatprep.subr.bf16.mxu0 %v5993_v60  ;;  %v2610_v39 = vadd.f32 %v7707_v47, %v7540_v18 }
 0x3a3   : > { %v5252_v28 = vadd.f32 %v5251_v55, %v5250_v22  ;;  %v5364_v33 = vadd.f32 %v5363_v32, %v5362_v10  ;;  %v8352_v10 = vld [vmem:[#allocation26_spill] sm:$0xff]  ;;  %v3188_v32 = vpack.c.bf16 %v3020_v48, %v3012_v19  ;;  %v3011_v48 = vmax.f32 %v2596_v54, 0.0  ;;  %5769 = vmatpush3.bf16.msra.mxu0 %v5993_v60 }
 0x3a4   : > { %v5253_v30 = vpop.f32.mrf.mxu0  ;;  %v5365_v41 = vpop.f32.mrf.mxu1  ;;  %v2789_v1 = vadd.f32 %v8352_v10, %v7542_v37  ;;  %v2608_v10 = vadd.f32 %v8353_v31, %v7506_v62  ;;  %v3038_v25 = vmax.f32 %v2805_v49, 0.0  ;;  %v5994_v54 = vld [vmem:[%s8242_s9 + $0x10] sm:$0xff]   ;;  %v2622_v49 = vadd.f32 %v7750_v20, %v7506_v62 }
 0x3a5   : > { %v3785_v22 = vadd.f32 %v5252_v28, %v7868_v26  ;;  %v3019_v28 = vmax.f32 %v2600_v42, 0.0  ;;  %5770 = vmatprep.subr.bf16.mxu0 %v5994_v54 }
 0x3a6   : > { %v5254_v52 = vpop.f32.mrf.mxu0  ;;  %v5366_v55 = vpop.f32.mrf.mxu1 }
 0x3a7   : > { %v7886_v21 = vadd.f32 %v5364_v33, %v3785_v22  ;;  %v5255_v4 = vadd.f32 %v5254_v52, %v5253_v30  ;;  %v5367_v9 = vadd.f32 %v5366_v55, %v5365_v41  ;;  %v3013_v33 = vmax.f32 %v2789_v1, 0.0  ;;  %5771 = vmatpush3.bf16.msra.mxu0 %v5994_v54 }
 0x3a8   : > { %v5256_v51 = vpop.f32.mrf.mxu0  ;;  %v5368_v3 = vpop.f32.mrf.mxu1  ;;  %4177 = vmatmul.mubr.bf16.gmra.mxu0 %v3179_v24  ;;  %4338 = vmatmul.mubr.bf16.gmra.mxu1 %v3181_v50  ;;  %v3187_v30 = vpack.c.bf16 %v3019_v28, %v3011_v48  ;;  %v2606_v24 = vadd.f32 %v8354_v7, %v7540_v18  ;;  %v3028_v22 = vmax.f32 %v2608_v10, 0.0  ;;  %v3030_v1 = vmax.f32 %v2801_v12, 0.0 }
 0x3a9   : > { %v3788_v5 = vadd.f32 %v5255_v4, %v7868_v26  ;;  %4184 = vmatprep.mubr.bf16.mxu0 %v3188_v32  ;;  %4345 = vmatprep.mubr.bf16.mxu1 %v3190_v57  ;;  %v3189_v41 = vpack.c.bf16 %v3021_v14, %v3013_v33  ;;  %v8355_v32 = vld [vmem:[#allocation28_spill] sm:$0xff]  ;;  %v2815_v4 = vadd.f32 %v7752_v27, %v7508_v36  ;;  %v3035_v33 = vmax.f32 %v2610_v39, 0.0 }
 0x3aa   : > { %v5257_v19 = vpop.f32.mrf.mxu0  ;;  %v5369_v31 = vpop.f32.mrf.mxu1  ;;  %v2799_v57 = vadd.f32 %v8355_v32, %v7542_v37  ;;  %v3196_v14 = vpack.c.bf16 %v3036_v44, %v3028_v22  ;;  %v2618_v12 = vadd.f32 %v7735_v17, %v7506_v62  ;;  %v5995_v27 = vld [vmem:[%s8242_s9 + $0x8] sm:$0xff]   ;;  %v2813_v54 = vadd.f32 %v7744_v15, %v7542_v37  ;;  %v5996_v39 = vld [vmem:[%s8242_s9] sm:$0xff]  }
 0x3ab   : > { %v7896_v42 = vadd.f32 %v5367_v9, %v3788_v5  ;;  %v5258_v50 = vadd.f32 %v5257_v19, %v5256_v51  ;;  %v5370_v40 = vadd.f32 %v5369_v31, %v5368_v3  ;;  %v2803_v3 = vadd.f32 %v7709_v58, %v7542_v37  ;;  %5772 = vmatprep.subr.bf16.mxu0 %v5995_v27  ;;  %v8356_v32 = vld [vmem:[#allocation21_spill] sm:$0xff] }
 0x3ac   : > { %v5259_v52 = vpop.f32.mrf.mxu0  ;;  %v5371_v55 = vpop.f32.mrf.mxu1  ;;  %v3198_v58 = vpack.c.bf16 %v3038_v25, %v3030_v1  ;;  %v2811_v5 = vadd.f32 %v7737_v6, %v7508_v36  ;;  %v3027_v31 = vmax.f32 %v2606_v24, 0.0  ;;  %v3052_v25 = vmax.f32 %v2622_v49, 0.0  ;;  %5773 = vmatpush3.bf16.msra.mxu0 %v5995_v27 }
 0x3ad   : > { %v3793_v51 = vadd.f32 %v5258_v50, %v7868_v26  ;;  %v3037_v44 = vmax.f32 %v2803_v3, 0.0  ;;  %v3054_v17 = vmax.f32 %v2815_v4, 0.0  ;;  %v3029_v6 = vmax.f32 %v2799_v57, 0.0  ;;  %v8357_v4 = vld [vmem:[#allocation18_spill] sm:$0xff]  ;;  %5774 = vmatprep.subr.bf16.mxu0 %v5996_v39 }
 0x3ae   : > { %v5260_v9 = vpop.f32.mrf.mxu0  ;;  %v5372_v28 = vpop.f32.mrf.mxu1  ;;  %v3044_v22 = vmax.f32 %v2618_v12, 0.0  ;;  %v3195_v3 = vpack.c.bf16 %v3035_v33, %v3027_v31  ;;  %v2616_v57 = vadd.f32 %v8356_v32, %v7540_v18  ;;  %v2628_v27 = vadd.f32 %v7770_v35, %v7506_v62 }
 0x3af   : > { %v7914_v10 = vadd.f32 %v5370_v40, %v3793_v51  ;;  %v5261_v47 = vadd.f32 %v5260_v9, %v5259_v52  ;;  %v5373_v60 = vadd.f32 %v5372_v28, %v5371_v55  ;;  %v3046_v52 = vmax.f32 %v2811_v5, 0.0 }
 0x3b0   : > { %v5262_v20 = vpop.f32.mrf.mxu0  ;;  %v5374_v48 = vpop.f32.mrf.mxu1  ;;  %4185 = vmatmul.mubr.bf16.gmra.mxu0 %v3187_v30  ;;  %4346 = vmatmul.mubr.bf16.gmra.mxu1 %v3189_v41  ;;  %v2620_v55 = vadd.f32 %v7742_v59, %v7540_v18  ;;  %v3197_v51 = vpack.c.bf16 %v3037_v44, %v3029_v6  ;;  %v2809_v9 = vadd.f32 %v8357_v4, %v7542_v37 }
 0x3b1   : > { %v3796_v19 = vadd.f32 %v5261_v47, %v7868_v26  ;;  %4192 = vmatprep.mubr.bf16.mxu0 %v3196_v14  ;;  %4353 = vmatprep.mubr.bf16.mxu1 %v3198_v58  ;;  %v2632_v59 = vadd.f32 %v7782_v29, %v7506_v62  ;;  %v3204_v14 = vpack.c.bf16 %v3052_v25, %v3044_v22 }
 0x3b2   : > { %v5263_v50 = vpop.f32.mrf.mxu0  ;;  %v5375_v40 = vpop.f32.mrf.mxu1  ;;  %v3206_v47 = vpack.c.bf16 %v3054_v17, %v3046_v52  ;;  %5775 = vmatpush3.bf16.msra.mxu0 %v5996_v39  ;;  %v2821_v44 = vadd.f32 %v7772_v46, %v7508_v36  ;;  %v3045_v31 = vmax.f32 %v2809_v9, 0.0  ;;  %v3060_v52 = vmax.f32 %v2628_v27, 0.0 }
 0x3b3   : > { %v7924_v7 = vadd.f32 %v5373_v60, %v3796_v19  ;;  %v5264_v30 = vadd.f32 %v5263_v50, %v5262_v20  ;;  %v5376_v41 = vadd.f32 %v5375_v40, %v5374_v48  ;;  %v2825_v60 = vadd.f32 %v7784_v16, %v7508_v36 }
 0x3b4   : > { %v5265_v24 = vpop.f32.mrf.mxu0  ;;  %v5377_v1 = vpop.f32.mrf.mxu1  ;;  %v3051_v20 = vmax.f32 %v2620_v55, 0.0  ;;  %v3053_v48 = vmax.f32 %v2813_v54, 0.0  ;;  %v3043_v16 = vmax.f32 %v2616_v57, 0.0  ;;  %v3068_v25 = vmax.f32 %v2632_v59, 0.0 }
 0x3b5   : > { %v3801_v49 = vadd.f32 %v5264_v30, %v7868_v26  ;;  %v3070_v40 = vmax.f32 %v2825_v60, 0.0  ;;  %v2630_v46 = vadd.f32 %v7774_v43, %v7540_v18  ;;  %v2823_v39 = vadd.f32 %v7776_v2, %v7542_v37 }
 0x3b6   : > { %v5266_v15 = vpop.f32.mrf.mxu0  ;;  %v5378_v28 = vpop.f32.mrf.mxu1  ;;  %v3205_v22 = vpack.c.bf16 %v3053_v48, %v3045_v31  ;;  %v2642_v57 = vadd.f32 %v7817_v56, %v7506_v62  ;;  %v2835_v43 = vadd.f32 %v7819_v8, %v7508_v36  ;;  %v3212_v9 = vpack.c.bf16 %v3068_v25, %v3060_v52 }
 0x3b7   : > { %v7942_v58 = vadd.f32 %v5376_v41, %v3801_v49  ;;  %v5267_v12 = vadd.f32 %v5266_v15, %v5265_v24  ;;  %v5379_v5 = vadd.f32 %v5378_v28, %v5377_v1  ;;  %v3203_v41 = vpack.c.bf16 %v3051_v20, %v3043_v16 }
 0x3b8   : > { %v5268_v33 = vpop.f32.mrf.mxu0  ;;  %v5380_v29 = vpop.f32.mrf.mxu1  ;;  %4193 = vmatmul.mubr.bf16.gmra.mxu0 %v3195_v3  ;;  %4354 = vmatmul.mubr.bf16.gmra.mxu1 %v3197_v51  ;;  %v2626_v24 = vadd.f32 %v7762_v61, %v7540_v18  ;;  %v3062_v1 = vmax.f32 %v2821_v44, 0.0  ;;  %v8358_v51 = vld [vmem:[#allocation23_spill] sm:$0xff]  ;;  %v3067_v2 = vmax.f32 %v2630_v46, 0.0  ;;  %v3069_v8 = vmax.f32 %v2823_v39, 0.0 }
 0x3b9   : > { %v3804_v19 = vadd.f32 %v5267_v12, %v7868_v26  ;;  %4200 = vmatprep.mubr.bf16.mxu0 %v3204_v14  ;;  %4361 = vmatprep.mubr.bf16.mxu1 %v3206_v47  ;;  %v2819_v32 = vadd.f32 %v8358_v51, %v7542_v37  ;;  %v2638_v14 = vadd.f32 %v7802_v34, %v7506_v62  ;;  %v3084_v20 = vmax.f32 %v2642_v57, 0.0 }
 0x3ba   : > { %v5269_v17 = vpop.f32.mrf.mxu0  ;;  %v5381_v50 = vpop.f32.mrf.mxu1  ;;  %v3214_v28 = vpack.c.bf16 %v3070_v40, %v3062_v1  ;;  %v2831_v47 = vadd.f32 %v7804_v23, %v7508_v36  ;;  %v3086_v48 = vmax.f32 %v2835_v43, 0.0  ;;  %v2636_v40 = vadd.f32 %v7794_v45, %v7540_v18 }
 0x3bb   : > { %v7949_v6 = vadd.f32 %v5379_v5, %v3804_v19  ;;  %v5270_v35 = vadd.f32 %v5269_v17, %v5268_v33  ;;  %v5382_v30 = vadd.f32 %v5381_v50, %v5380_v29  ;;  %v3059_v5 = vmax.f32 %v2626_v24, 0.0 }
 0x3bc   : > { %v5271_v55 = vpop.f32.mrf.mxu0  ;;  %v5383_v54 = vpop.f32.mrf.mxu1  ;;  %v3061_v29 = vmax.f32 %v2819_v32, 0.0  ;;  %v3076_v16 = vmax.f32 %v2638_v14, 0.0  ;;  %v3078_v31 = vmax.f32 %v2831_v47, 0.0  ;;  %v2845_v24 = vadd.f32 %v7855_v63, %v7508_v36  ;;  %v8359_v32 = vld [vmem:[#allocation22_spill] sm:$0xff] }
 0x3bd   : > { %v3809_v3 = vadd.f32 %v5270_v35, %v7868_v26  ;;  %v3211_v23 = vpack.c.bf16 %v3067_v2, %v3059_v5  ;;  %v2640_v35 = vadd.f32 %v7809_v11, %v7540_v18  ;;  %v2829_v11 = vadd.f32 %v7796_v0, %v7542_v37 }
 0x3be   : > { %v5272_v49 = vpop.f32.mrf.mxu0  ;;  %v5384_v4 = vpop.f32.mrf.mxu1  ;;  %v3213_v50 = vpack.c.bf16 %v3069_v8, %v3061_v29  ;;  %v2841_v57 = vadd.f32 %v8359_v32, %v7508_v36  ;;  %v3075_v43 = vmax.f32 %v2636_v40, 0.0 }
 0x3bf   : > { %v7964_v59 = vadd.f32 %v5382_v30, %v3809_v3  ;;  %v5273_v61 = vadd.f32 %v5272_v49, %v5271_v55  ;;  %v5385_v15 = vadd.f32 %v5384_v4, %v5383_v54  ;;  %v3220_v55 = vpack.c.bf16 %v3084_v20, %v3076_v16  ;;  %v8361_v20 = vld [vmem:[#allocation31_spill] sm:$0xff] }
 0x3c0   : > { %v5274_v60 = vpop.f32.mrf.mxu0  ;;  %v5386_v56 = vpop.f32.mrf.mxu1  ;;  %4201 = vmatmul.mubr.bf16.gmra.mxu0 %v3203_v41  ;;  %4362 = vmatmul.mubr.bf16.gmra.mxu1 %v3205_v22  ;;  %v2833_v41 = vadd.f32 %v7811_v53, %v7542_v37  ;;  %v2652_v22 = vadd.f32 %v7853_v38, %v7506_v62  ;;  %v3222_v54 = vpack.c.bf16 %v3086_v48, %v3078_v31  ;;  %v3083_v38 = vmax.f32 %v2640_v35, 0.0  ;;  %v8362_v31 = vld [vmem:[#allocation24_spill] sm:$0xff] }
 0x3c1   : > { %v3812_v12 = vadd.f32 %v5273_v61, %v7868_v26  ;;  %4208 = vmatprep.mubr.bf16.mxu0 %v3212_v9  ;;  %4369 = vmatprep.mubr.bf16.mxu1 %v3214_v28  ;;  %v2648_v53 = vadd.f32 %v7837_v13, %v7506_v62  ;;  %v3102_v61 = vmax.f32 %v2845_v24, 0.0  ;;  %v3077_v28 = vmax.f32 %v2829_v11, 0.0 }
 0x3c2   : > { %v5275_v27 = vpop.f32.mrf.mxu0  ;;  %v5387_v33 = vpop.f32.mrf.mxu1  ;;  %v3085_v49 = vmax.f32 %v2833_v41, 0.0  ;;  %v3100_v4 = vmax.f32 %v2652_v22, 0.0  ;;  %v3094_v36 = vmax.f32 %v2841_v57, 0.0  ;;  %v2843_v48 = vadd.f32 %v8361_v20, %v7542_v37 }
 0x3c3   : > { %v7971_v44 = vadd.f32 %v5385_v15, %v3812_v12  ;;  %v5276_v34 = vadd.f32 %v5275_v27, %v5274_v60  ;;  %v5388_v19 = vadd.f32 %v5387_v33, %v5386_v56  ;;  %v3092_v2 = vmax.f32 %v2648_v53, 0.0  ;;  %v8360_v12 = vld [vmem:[#allocation19_spill] sm:$0xff] }
 0x3c4   : > { %v5277_v25 = vpop.f32.mrf.mxu0  ;;  %v5389_v17 = vpop.f32.mrf.mxu1  ;;  %v3219_v60 = vpack.c.bf16 %v3083_v38, %v3075_v43  ;;  %v3221_v8 = vpack.c.bf16 %v3085_v49, %v3077_v28  ;;  %v2650_v5 = vadd.f32 %v8360_v12, %v7540_v18  ;;  %v3230_v16 = vpack.c.bf16 %v3102_v61, %v3094_v36 }
 0x3c5   : > { %v3817_v30 = vadd.f32 %v5276_v34, %v7868_v26  ;;  %v3228_v29 = vpack.c.bf16 %v3100_v4, %v3092_v2  ;;  %v3101_v22 = vmax.f32 %v2843_v48, 0.0 }
 0x3c6   : > { %v5278_v52 = vpop.f32.mrf.mxu0  ;;  %v5390_v46 = vpop.f32.mrf.mxu1  ;;  %v3099_v41 = vmax.f32 %v2650_v5, 0.0 }
 0x3c7   : > { %v7984_v1 = vadd.f32 %v5388_v19, %v3817_v30  ;;  %v5279_v45 = vadd.f32 %v5278_v52, %v5277_v25  ;;  %v5391_v39 = vadd.f32 %v5390_v46, %v5389_v17  ;;  %v2646_v25 = vadd.f32 %v8362_v31, %v7540_v18  ;;  %v8363_v17 = vld [vmem:[#allocation30_spill] sm:$0xff] }
 0x3c8   : > { %v5280_v3 = vpop.f32.mrf.mxu0  ;;  %v5392_v51 = vpop.f32.mrf.mxu1  ;;  %4209 = vmatmul.mubr.bf16.gmra.mxu0 %v3211_v23  ;;  %4370 = vmatmul.mubr.bf16.gmra.mxu1 %v3213_v50  ;;  %v2839_v50 = vadd.f32 %v8363_v17, %v7542_v37 }
 0x3c9   : > { %v3820_v63 = vadd.f32 %v5279_v45, %v7868_v26  ;;  %4216 = vmatprep.mubr.bf16.mxu0 %v3220_v55  ;;  %4377 = vmatprep.mubr.bf16.mxu1 %v3222_v54  ;;  %v3091_v18 = vmax.f32 %v2646_v25, 0.0 }
 0x3ca   : > { %v5281_v9 = vpop.f32.mrf.mxu0  ;;  %v5393_v0 = vpop.f32.mrf.mxu1  ;;  %v3093_v45 = vmax.f32 %v2839_v50, 0.0 }
 0x3cb   : > { %v7993_v15 = vadd.f32 %v5391_v39, %v3820_v63  ;;  %v5282_v62 = vadd.f32 %v5281_v9, %v5280_v3  ;;  %v5394_v13 = vadd.f32 %v5393_v0, %v5392_v51  ;;  %v3227_v53 = vpack.c.bf16 %v3099_v41, %v3091_v18 }
 0x3cc   : > { %v5283_v14 = vpop.f32.mrf.mxu0  ;;  %v5395_v47 = vpop.f32.mrf.mxu1  ;;  %v3229_v3 = vpack.c.bf16 %v3101_v22, %v3093_v45 }
 0x3cd   : > { %v3825_v56 = vadd.f32 %v5282_v62, %v7868_v26 }
 0x3ce   : > { %v5284_v27 = vpop.f32.mrf.mxu0  ;;  %v5396_v33 = vpop.f32.mrf.mxu1 }
 0x3cf   : > { %v8000_v34 = vadd.f32 %v5394_v13, %v3825_v56  ;;  %v5285_v19 = vadd.f32 %v5284_v27, %v5283_v14  ;;  %v5397_v23 = vadd.f32 %v5396_v33, %v5395_v47 }
 0x3d0   : > { %v5286_v40 = vpop.f32.mrf.mxu0  ;;  %v5398_v35 = vpop.f32.mrf.mxu1  ;;  %4217 = vmatmul.mubr.bf16.gmra.mxu0 %v3219_v60  ;;  %4378 = vmatmul.mubr.bf16.gmra.mxu1 %v3221_v8 }
 0x3d1   : > { %v3828_v30 = vadd.f32 %v5285_v19, %v7868_v26  ;;  %4224 = vmatprep.mubr.bf16.mxu0 %v3228_v29  ;;  %4385 = vmatprep.mubr.bf16.mxu1 %v3230_v16 }
 0x3d2   : > { %v5287_v52 = vpop.f32.mrf.mxu0  ;;  %v5399_v46 = vpop.f32.mrf.mxu1 }
 0x3d3   : > { %v8007_v55 = vadd.f32 %v5397_v23, %v3828_v30  ;;  %v5288_v54 = vadd.f32 %v5287_v52, %v5286_v40  ;;  %v5400_v24 = vadd.f32 %v5399_v46, %v5398_v35 }
 0x3d4   : > { %v5289_v39 = vpop.f32.mrf.mxu0  ;;  %v5401_v37 = vpop.f32.mrf.mxu1 }
 0x3d5   : > { %v3833_v11 = vadd.f32 %v5288_v54, %v7868_v26 }
 0x3d6   : > { %v5290_v51 = vpop.f32.mrf.mxu0  ;;  %v5402_v38 = vpop.f32.mrf.mxu1 }
 0x3d7   : > { %v8010_v32 = vadd.f32 %v5400_v24, %v3833_v11  ;;  %v5291_v57 = vadd.f32 %v5290_v51, %v5289_v39  ;;  %v5403_v63 = vadd.f32 %v5402_v38, %v5401_v37 }
 0x3d8   : > { %v5292_v43 = vpop.f32.mrf.mxu0  ;;  %v5404_v49 = vpop.f32.mrf.mxu1  ;;  %4225 = vmatmul.mubr.bf16.gmra.mxu0 %v3227_v53  ;;  %4386 = vmatmul.mubr.bf16.gmra.mxu1 %v3229_v3 }
 0x3d9   : > { %v3836_v4 = vadd.f32 %v5291_v57, %v7868_v26 }
 0x3da   : > { %v5293_v9 = vpop.f32.mrf.mxu0  ;;  %v5405_v0 = vpop.f32.mrf.mxu1 }
 0x3db   : > { %v8013_v61 = vadd.f32 %v5403_v63, %v3836_v4  ;;  %v5294_v62 = vadd.f32 %v5293_v9, %v5292_v43  ;;  %v5406_v13 = vadd.f32 %v5405_v0, %v5404_v49 }
 0x3dc   : > { %v5295_v28 = vpop.f32.mrf.mxu0  ;;  %v5407_v2 = vpop.f32.mrf.mxu1 }
 0x3dd   : > { %v3841_v14 = vadd.f32 %v5294_v62, %v7868_v26 }
 0x3de   : > { %v5296_v47 = vpop.f32.mrf.mxu0  ;;  %v5408_v60 = vpop.f32.mrf.mxu1 }
 0x3df   : > { %v8016_v36 = vadd.f32 %v5406_v13, %v3841_v14  ;;  %v5297_v56 = vadd.f32 %v5296_v47, %v5295_v28  ;;  %v5409_v8 = vadd.f32 %v5408_v60, %v5407_v2 }
 0x3e0   : > { %v5298_v12 = vpop.f32.mrf.mxu0  ;;  %v5410_v5 = vpop.f32.mrf.mxu1 }
 0x3e1   : > { %v3844_v20 = vadd.f32 %v5297_v56, %v7868_v26 }
 0x3e2   : > { %v5299_v48 = vpop.f32.mrf.mxu0  ;;  %v5411_v27 = vpop.f32.mrf.mxu1 }
 0x3e3   : > { %v8019_v33 = vadd.f32 %v5409_v8, %v3844_v20  ;;  %v5300_v29 = vadd.f32 %v5299_v48, %v5298_v12  ;;  %v5412_v19 = vadd.f32 %v5411_v27, %v5410_v5 }
 0x3e4   : > { %v5301_v23 = vpop.f32.mrf.mxu0  ;;  %v5413_v16 = vpop.f32.mrf.mxu1 }
 0x3e5   : > { %v3849_v31 = vadd.f32 %v5300_v29, %v7868_v26 }
 0x3e6   : > { %v5302_v25 = vpop.f32.mrf.mxu0  ;;  %v5414_v17 = vpop.f32.mrf.mxu1 }
 0x3e7   : > { %v8022_v50 = vadd.f32 %v5412_v19, %v3849_v31  ;;  %v5303_v40 = vadd.f32 %v5302_v25, %v5301_v23  ;;  %v5415_v35 = vadd.f32 %v5414_v17, %v5413_v16 }
 0x3e8   : > { %v5304_v30 = vpop.f32.mrf.mxu0  ;;  %v5416_v41 = vpop.f32.mrf.mxu1 }
 0x3e9   : > { %v3852_v22 = vadd.f32 %v5303_v40, %v7868_v26 }
 0x3ea   : > { %v5305_v52 = vpop.f32.mrf.mxu0  ;;  %v5417_v46 = vpop.f32.mrf.mxu1 }
 0x3eb   : > { %v8025_v54 = vadd.f32 %v5415_v35, %v3852_v22  ;;  %v5306_v24 = vadd.f32 %v5305_v52, %v5304_v30  ;;  %v5418_v18 = vadd.f32 %v5417_v46, %v5416_v41 }
 0x3ec   : > { %v5307_v45 = vpop.f32.mrf.mxu0  ;;  %v5419_v39 = vpop.f32.mrf.mxu1 }
 0x3ed   : > { %v3857_v37 = vadd.f32 %v5306_v24, %v7868_v26 }
 0x3ee   : > { %v5308_v11 = vpop.f32.mrf.mxu0  ;;  %v5420_v53 = vpop.f32.mrf.mxu1 }
 0x3ef   : > { %v8028_v3 = vadd.f32 %v5418_v18, %v3857_v37  ;;  %v5309_v51 = vadd.f32 %v5308_v11, %v5307_v45  ;;  %v5421_v38 = vadd.f32 %v5420_v53, %v5419_v39 }
 0x3f0   : > { %v5310_v57 = vpop.f32.mrf.mxu0  ;;  %v5422_v63 = vpop.f32.mrf.mxu1 }
 0x3f1   : > { %v3860_v43 = vadd.f32 %v5309_v51, %v7868_v26 }
 0x3f2   : > { %v5311_v49 = vpop.f32.mrf.mxu0  ;;  %v5423_v4 = vpop.f32.mrf.mxu1 }
 0x3f3   : > { %v8031_v9 = vadd.f32 %v5421_v38, %v3860_v43  ;;  %v5312_v0 = vadd.f32 %v5311_v49, %v5310_v57  ;;  %v5424_v62 = vadd.f32 %v5423_v4, %v5422_v63 }
 0x3f4   : > { %v5313_v13 = vpop.f32.mrf.mxu0  ;;  %v5425_v28 = vpop.f32.mrf.mxu1 }
 0x3f5   : > { %v3865_v2 = vadd.f32 %v5312_v0, %v7868_v26 }
 0x3f6   : > { %v5314_v14 = vpop.f32.mrf.mxu0  ;;  %v5426_v47 = vpop.f32.mrf.mxu1 }
 0x3f7   : > { %v8034_v60 = vadd.f32 %v5424_v62, %v3865_v2  ;;  %v5315_v56 = vadd.f32 %v5314_v14, %v5313_v13  ;;  %v5427_v8 = vadd.f32 %v5426_v47, %v5425_v28 }
 0x3f8   : > { %v5316_v12 = vpop.f32.mrf.mxu0  ;;  %v5428_v5 = vpop.f32.mrf.mxu1 }
 0x3f9   : > { %v3868_v20 = vadd.f32 %v5315_v56, %v7868_v26 }
 0x3fa   : > { %v5317_v48 = vpop.f32.mrf.mxu0  ;;  %v5429_v27 = vpop.f32.mrf.mxu1 }
 0x3fb   : > { %v8037_v29 = vadd.f32 %v5427_v8, %v3868_v20  ;;  %v5318_v19 = vadd.f32 %v5317_v48, %v5316_v12  ;;  %v5430_v23 = vadd.f32 %v5429_v27, %v5428_v5 }
 0x3fc   : > { %v5319_v16 = vpop.f32.mrf.mxu0  ;;  %v5431_v31 = vpop.f32.mrf.mxu1 }
 0x3fd   : > { %v3873_v25 = vadd.f32 %v5318_v19, %v7868_v26 }
 0x3fe   : > { %v5320_v17 = vpop.f32.mrf.mxu0  ;;  %v5432_v40 = vpop.f32.mrf.mxu1 }
 0x3ff   : > { %v8040_v35 = vadd.f32 %v5430_v23, %v3873_v25  ;;  %v5321_v30 = vadd.f32 %v5320_v17, %v5319_v16  ;;  %v5433_v41 = vadd.f32 %v5432_v40, %v5431_v31 }
 0x400   : > { %v5322_v22 = vpop.f32.mrf.mxu0  ;;  %v5434_v52 = vpop.f32.mrf.mxu1 }
 0x401   : > { %v3876_v46 = vadd.f32 %v5321_v30, %v7868_v26 }
 0x402   : > { %v5323_v24 = vpop.f32.mrf.mxu0  ;;  %v5435_v18 = vpop.f32.mrf.mxu1 }
 0x403   : > { %v8043_v45 = vadd.f32 %v5433_v41, %v3876_v46  ;;  %v5324_v39 = vadd.f32 %v5323_v24, %v5322_v22  ;;  %v5436_v37 = vadd.f32 %v5435_v18, %v5434_v52 }
 0x404   : > { %v5325_v11 = vpop.f32.mrf.mxu0  ;;  %v5437_v53 = vpop.f32.mrf.mxu1 }
 0x405   : > { %v3881_v51 = vadd.f32 %v5324_v39, %v7868_v26 }
 0x406   : > { %v5326_v38 = vpop.f32.mrf.mxu0  ;;  %v5438_v57 = vpop.f32.mrf.mxu1 }
 0x407   : > { %v8046_v63 = vadd.f32 %v5436_v37, %v3881_v51  ;;  %v5327_v43 = vadd.f32 %v5326_v38, %v5325_v11  ;;  %v5439_v49 = vadd.f32 %v5438_v57, %v5437_v53 }
 0x408   : > { %v5328_v4 = vpop.f32.mrf.mxu0  ;;  %v5440_v0 = vpop.f32.mrf.mxu1 }
 0x409   : > { %v3884_v62 = vadd.f32 %v5327_v43, %v7868_v26 }
 0x40a   : > { %v5329_v13 = vpop.f32.mrf.mxu0  ;;  %v5441_v28 = vpop.f32.mrf.mxu1 }
 0x40b   : > { %v8049_v2 = vadd.f32 %v5439_v49, %v3884_v62  ;;  %v5330_v14 = vadd.f32 %v5329_v13, %v5328_v4  ;;  %v5442_v47 = vadd.f32 %v5441_v28, %v5440_v0 }
 0x40c   : > { %v5331_v56 = vpop.f32.mrf.mxu0  ;;  %v5443_v8 = vpop.f32.mrf.mxu1 }
 0x40d   : > { %v3889_v12 = vadd.f32 %v5330_v14, %v7868_v26 }
 0x40e   : > { %v5332_v5 = vpop.f32.mrf.mxu0  ;;  %v5444_v20 = vpop.f32.mrf.mxu1 }
 0x40f   : > { %v8052_v48 = vadd.f32 %v5442_v47, %v3889_v12  ;;  %v5333_v27 = vadd.f32 %v5332_v5, %v5331_v56  ;;  %v5445_v19 = vadd.f32 %v5444_v20, %v5443_v8 }
 0x410   : > { %v5334_v23 = vpop.f32.mrf.mxu0  ;;  %v5446_v16 = vpop.f32.mrf.mxu1 }
 0x411   : > { %v3892_v31 = vadd.f32 %v5333_v27, %v7868_v26 }
 0x412   : > { %v5335_v25 = vpop.f32.mrf.mxu0  ;;  %v5447_v17 = vpop.f32.mrf.mxu1 }
 0x413   : > { %v8055_v40 = vadd.f32 %v5445_v19, %v3892_v31  ;;  %v5336_v30 = vadd.f32 %v5335_v25, %v5334_v23  ;;  %v5448_v41 = vadd.f32 %v5447_v17, %v5446_v16 }
 0x414   : > { %v5337_v22 = vpop.f32.mrf.mxu0  ;;  %v5449_v52 = vpop.f32.mrf.mxu1 }
 0x415   : > { %v3897_v46 = vadd.f32 %v5336_v30, %v7868_v26 }
 0x416   : > { %v5338_v24 = vpop.f32.mrf.mxu0  ;;  %v5450_v18 = vpop.f32.mrf.mxu1 }
 0x417   : > { %v8058_v39 = vadd.f32 %v5448_v41, %v3897_v46  ;;  %v5339_v37 = vadd.f32 %v5338_v24, %v5337_v22  ;;  %v5451_v11 = vadd.f32 %v5450_v18, %v5449_v52 }
 0x418   : > { %v5340_v53 = vpop.f32.mrf.mxu0  ;;  %v5452_v51 = vpop.f32.mrf.mxu1 }
 0x419   : > { %v3900_v38 = vadd.f32 %v5339_v37, %v7868_v26 }
 0x41a   : > { %v5341_v57 = vpop.f32.mrf.mxu0  ;;  %v5453_v43 = vpop.f32.mrf.mxu1 }
 0x41b   : > { %v8061_v49 = vadd.f32 %v5451_v11, %v3900_v38  ;;  %v5342_v4 = vadd.f32 %v5341_v57, %v5340_v53  ;;  %v5454_v0 = vadd.f32 %v5453_v43, %v5452_v51 }
 0x41c   : > { %v5343_v62 = vpop.f32.mrf.mxu0  ;;  %v5455_v13 = vpop.f32.mrf.mxu1 }
 0x41d   : > { %v3905_v28 = vadd.f32 %v5342_v4, %v7868_v26 }
 0x41e   : > { %v5344_v14 = vpop.f32.mrf.mxu0  ;;  %v5456_v47 = vpop.f32.mrf.mxu1 }
 0x41f   : > { %v8064_v56 = vadd.f32 %v5454_v0, %v3905_v28  ;;  %v5345_v8 = vadd.f32 %v5344_v14, %v5343_v62  ;;  %v5457_v12 = vadd.f32 %v5456_v47, %v5455_v13 }
 0x420   : > { %v5474_v5 = vpop.f32.mrf.mxu0  ;;  %v5586_v20 = vpop.f32.mrf.mxu1 }
 0x421   : > { %v3908_v27 = vadd.f32 %v5345_v8, %v7868_v26 }
 0x422   : > { %v5475_v19 = vpop.f32.mrf.mxu0  ;;  %v5587_v23 = vpop.f32.mrf.mxu1 }
 0x423   : > { %v8067_v16 = vadd.f32 %v5457_v12, %v3908_v27  ;;  %v5476_v31 = vadd.f32 %v5475_v19, %v5474_v5  ;;  %v5588_v52 = vadd.f32 %v5587_v23, %v5586_v20 }
 0x424   : > { %v5477_v25 = vpop.f32.mrf.mxu0  ;;  %v5589_v17 = vpop.f32.mrf.mxu1 }
 0x425   : > { %v4107_v30 = vadd.f32 %v5476_v31, %v7886_v21 }
 0x426   : > { %v5478_v41 = vpop.f32.mrf.mxu0  ;;  %v5590_v22 = vpop.f32.mrf.mxu1 }
 0x427   : > { %v5479_v46 = vadd.f32 %v5478_v41, %v5477_v25  ;;  %v4268_v37 = vadd.f32 %v5588_v52, %v4107_v30  ;;  %v5591_v53 = vadd.f32 %v5590_v22, %v5589_v17 }
 0x428   : > { %v5480_v24 = vpop.f32.mrf.mxu0  ;;  %v5592_v18 = vpop.f32.mrf.mxu1 }
 0x429   : > { %v4110_v11 = vadd.f32 %v5479_v46, %v7896_v42  ;;  %v4394_v0 = vmax.f32 %v4268_v37, 0.0 }
 0x42a   : > { %v5481_v26 = vpop.f32.mrf.mxu0  ;;  %v5593_v51 = vpop.f32.mrf.mxu1 }
 0x42b   : > { %v4271_v38 = vadd.f32 %v5591_v53, %v4110_v11  ;;  %v5482_v57 = vadd.f32 %v5481_v26, %v5480_v24  ;;  %v5594_v14 = vadd.f32 %v5593_v51, %v5592_v18 }
 0x42c   : > { %v5483_v43 = vpop.f32.mrf.mxu0  ;;  %v5595_v4 = vpop.f32.mrf.mxu1 }
 0x42d   : > { %v4395_v62 = vmax.f32 %v4271_v38, 0.0  ;;  %v4115_v21 = vadd.f32 %v5482_v57, %v7914_v10 }
 0x42e   : > { %v5484_v13 = vpop.f32.mrf.mxu0  ;;  %v5596_v28 = vpop.f32.mrf.mxu1 }
 0x42f   : > { %v5485_v47 = vadd.f32 %v5484_v13, %v5483_v43  ;;  %v4426_v8 = vpack.c.bf16 %v4395_v62, %v4394_v0  ;;  %v4276_v20 = vadd.f32 %v5594_v14, %v4115_v21  ;;  %v5597_v27 = vadd.f32 %v5596_v28, %v5595_v4 }
 0x430   : > { %v5486_v12 = vpop.f32.mrf.mxu0  ;;  %v5598_v5 = vpop.f32.mrf.mxu1 }
 0x431   : > { %v4118_v42 = vadd.f32 %v5485_v47, %v7924_v7  ;;  %5776 = vmatprep.mubr.bf16.mxu0 %v4426_v8  ;;  %v4396_v41 = vmax.f32 %v4276_v20, 0.0 }
 0x432   : > { %v5487_v19 = vpop.f32.mrf.mxu0  ;;  %v5599_v23 = vpop.f32.mrf.mxu1 }
 0x433   : > { %v4279_v31 = vadd.f32 %v5597_v27, %v4118_v42  ;;  %v5488_v25 = vadd.f32 %v5487_v19, %v5486_v12  ;;  %v5600_v18 = vadd.f32 %v5599_v23, %v5598_v5 }
 0x434   : > { %v5489_v17 = vpop.f32.mrf.mxu0  ;;  %v5601_v30 = vpop.f32.mrf.mxu1 }
 0x435   : > { %v4397_v10 = vmax.f32 %v4279_v31, 0.0  ;;  %v4123_v22 = vadd.f32 %v5488_v25, %v7942_v58 }
 0x436   : > { %v5490_v52 = vpop.f32.mrf.mxu0  ;;  %v5602_v46 = vpop.f32.mrf.mxu1 }
 0x437   : > { %v4427_v24 = vpack.c.bf16 %v4397_v10, %v4396_v41  ;;  %v5491_v37 = vadd.f32 %v5490_v52, %v5489_v17  ;;  %v4284_v7 = vadd.f32 %v5600_v18, %v4123_v22  ;;  %v5603_v51 = vadd.f32 %v5602_v46, %v5601_v30 }
 0x438   : > { %v5492_v11 = vpop.f32.mrf.mxu0  ;;  %v5604_v53 = vpop.f32.mrf.mxu1 }
 0x439   : > { %v4126_v26 = vadd.f32 %v5491_v37, %v7949_v6  ;;  %5777 = vmatmul.mubr.bf16.vlgmr.msra.gmra.mxu0 %v4427_v24  ;;  %v4398_v21 = vmax.f32 %v4284_v7, 0.0 }
 0x43a   : > { %v5493_v38 = vpop.f32.mrf.mxu0  ;;  %v5605_v57 = vpop.f32.mrf.mxu1 }
 0x43b   : > { %v4287_v43 = vadd.f32 %v5603_v51, %v4126_v26  ;;  %v5494_v4 = vadd.f32 %v5493_v38, %v5492_v11  ;;  %v5606_v47 = vadd.f32 %v5605_v57, %v5604_v53 }
 0x43c   : > { %v5495_v0 = vpop.f32.mrf.mxu0  ;;  %v5607_v62 = vpop.f32.mrf.mxu1 }
 0x43d   : > { %v4399_v58 = vmax.f32 %v4287_v43, 0.0  ;;  %v4131_v13 = vadd.f32 %v5494_v4, %v7964_v59 }
 0x43e   : > { %v5496_v28 = vpop.f32.mrf.mxu0  ;;  %v5608_v14 = vpop.f32.mrf.mxu1 }
 0x43f   : > { %v5497_v8 = vadd.f32 %v5496_v28, %v5495_v0  ;;  %v4428_v12 = vpack.c.bf16 %v4399_v58, %v4398_v21  ;;  %v4292_v6 = vadd.f32 %v5606_v47, %v4131_v13  ;;  %v5609_v27 = vadd.f32 %v5608_v14, %v5607_v62 }
 0x440   : > { %v5498_v5 = vpop.f32.mrf.mxu0  ;;  %v5610_v20 = vpop.f32.mrf.mxu1 }
 0x441   : > { %v4134_v42 = vadd.f32 %v5497_v8, %v7971_v44  ;;  %5780 = vmatprep.mubr.bf16.mxu0 %v4428_v12  ;;  %v4400_v41 = vmax.f32 %v4292_v6, 0.0 }
 0x442   : > { %v5499_v19 = vpop.f32.mrf.mxu0  ;;  %v5611_v23 = vpop.f32.mrf.mxu1 }
 0x443   : > { %v4295_v31 = vadd.f32 %v5609_v27, %v4134_v42  ;;  %v5500_v25 = vadd.f32 %v5499_v19, %v5498_v5  ;;  %v5612_v24 = vadd.f32 %v5611_v23, %v5610_v20 }
 0x444   : > { %v5501_v17 = vpop.f32.mrf.mxu0  ;;  %v5613_v30 = vpop.f32.mrf.mxu1 }
 0x445   : > { %v4401_v59 = vmax.f32 %v4295_v31, 0.0  ;;  %v4139_v10 = vadd.f32 %v5500_v25, %v7984_v1 }
 0x446   : > { %v5502_v22 = vpop.f32.mrf.mxu0  ;;  %v5614_v52 = vpop.f32.mrf.mxu1 }
 0x447   : > { %v4429_v46 = vpack.c.bf16 %v4401_v59, %v4400_v41  ;;  %v5503_v18 = vadd.f32 %v5502_v22, %v5501_v17  ;;  %v4300_v44 = vadd.f32 %v5612_v24, %v4139_v10  ;;  %v5615_v7 = vadd.f32 %v5614_v52, %v5613_v30 }
 0x448   : > { %v5504_v37 = vpop.f32.mrf.mxu0  ;;  %v5616_v11 = vpop.f32.mrf.mxu1 }
 0x449   : > { %v4142_v53 = vadd.f32 %v5503_v18, %v7993_v15  ;;  %5781 = vmatmul.mubr.bf16.gmra.mxu0 %v4429_v46  ;;  %v4402_v0 = vmax.f32 %v4300_v44, 0.0 }
 0x44a   : > { %v5505_v26 = vpop.f32.mrf.mxu0  ;;  %v5617_v51 = vpop.f32.mrf.mxu1 }
 0x44b   : > { %v4303_v38 = vadd.f32 %v5615_v7, %v4142_v53  ;;  %v5506_v57 = vadd.f32 %v5505_v26, %v5504_v37  ;;  %v5618_v13 = vadd.f32 %v5617_v51, %v5616_v11 }
 0x44c   : > { %v5507_v43 = vpop.f32.mrf.mxu0  ;;  %v5619_v4 = vpop.f32.mrf.mxu1 }
 0x44d   : > { %v4403_v1 = vmax.f32 %v4303_v38, 0.0  ;;  %v4147_v62 = vadd.f32 %v5506_v57, %v8000_v34 }
 0x44e   : > { %v5508_v21 = vpop.f32.mrf.mxu0  ;;  %v5620_v58 = vpop.f32.mrf.mxu1 }
 0x44f   : > { %v5509_v28 = vadd.f32 %v5508_v21, %v5507_v43  ;;  %v4430_v14 = vpack.c.bf16 %v4403_v1, %v4402_v0  ;;  %v4308_v15 = vadd.f32 %v5618_v13, %v4147_v62  ;;  %v5621_v5 = vadd.f32 %v5620_v58, %v5619_v4 }
 0x450   : > { %v5510_v47 = vpop.f32.mrf.mxu0  ;;  %v5622_v8 = vpop.f32.mrf.mxu1 }
 0x451   : > { %v4150_v12 = vadd.f32 %v5509_v28, %v8007_v55  ;;  %5784 = vmatprep.mubr.bf16.mxu0 %v4430_v14  ;;  %v4404_v31 = vmax.f32 %v4308_v15, 0.0 }
 0x452   : > { %v5511_v20 = vpop.f32.mrf.mxu0  ;;  %v5623_v6 = vpop.f32.mrf.mxu1 }
 0x453   : > { %v4311_v42 = vadd.f32 %v5621_v5, %v4150_v12  ;;  %v5512_v27 = vadd.f32 %v5511_v20, %v5510_v47  ;;  %v5624_v59 = vadd.f32 %v5623_v6, %v5622_v8 }
 0x454   : > { %v5513_v19 = vpop.f32.mrf.mxu0  ;;  %v5625_v23 = vpop.f32.mrf.mxu1 }
 0x455   : > { %v4405_v34 = vmax.f32 %v4311_v42, 0.0  ;;  %v4155_v25 = vadd.f32 %v5512_v27, %v8010_v32 }
 0x456   : > { %v5514_v17 = vpop.f32.mrf.mxu0  ;;  %v5626_v30 = vpop.f32.mrf.mxu1 }
 0x457   : > { %v4431_v41 = vpack.c.bf16 %v4405_v34, %v4404_v31  ;;  %v5515_v10 = vadd.f32 %v5514_v17, %v5513_v19  ;;  %v4316_v55 = vadd.f32 %v5624_v59, %v4155_v25  ;;  %v5627_v24 = vadd.f32 %v5626_v30, %v5625_v23 }
 0x458   : > { %v5516_v22 = vpop.f32.mrf.mxu0  ;;  %v5628_v52 = vpop.f32.mrf.mxu1 }
 0x459   : > { %v4158_v46 = vadd.f32 %v5515_v10, %v8013_v61  ;;  %5785 = vmatmul.mubr.bf16.gmra.mxu0 %v4431_v41  ;;  %v4406_v26 = vmax.f32 %v4316_v55, 0.0 }
 0x45a   : > { %v5517_v18 = vpop.f32.mrf.mxu0  ;;  %v5629_v37 = vpop.f32.mrf.mxu1 }
 0x45b   : > { %v4319_v11 = vadd.f32 %v5627_v24, %v4158_v46  ;;  %v5518_v44 = vadd.f32 %v5517_v18, %v5516_v22  ;;  %v5630_v43 = vadd.f32 %v5629_v37, %v5628_v52 }
 0x45c   : > { %v5519_v53 = vpop.f32.mrf.mxu0  ;;  %v5631_v7 = vpop.f32.mrf.mxu1 }
 0x45d   : > { %v4407_v32 = vmax.f32 %v4319_v11, 0.0  ;;  %v4163_v51 = vadd.f32 %v5518_v44, %v8016_v36 }
 0x45e   : > { %v5520_v38 = vpop.f32.mrf.mxu0  ;;  %v5632_v57 = vpop.f32.mrf.mxu1 }
 0x45f   : > { %v5521_v4 = vadd.f32 %v5520_v38, %v5519_v53  ;;  %v4432_v0 = vpack.c.bf16 %v4407_v32, %v4406_v26  ;;  %v4324_v61 = vadd.f32 %v5630_v43, %v4163_v51  ;;  %v5633_v58 = vadd.f32 %v5632_v57, %v5631_v7 }
 0x460   : > { %v5522_v1 = vpop.f32.mrf.mxu0  ;;  %v5634_v62 = vpop.f32.mrf.mxu1 }
 0x461   : > { %v4166_v21 = vadd.f32 %v5521_v4, %v8019_v33  ;;  %5788 = vmatprep.mubr.bf16.mxu0 %v4432_v0  ;;  %v4408_v12 = vmax.f32 %v4324_v61, 0.0 }
 0x462   : > { %v5523_v13 = vpop.f32.mrf.mxu0  ;;  %v5635_v28 = vpop.f32.mrf.mxu1 }
 0x463   : > { %v4327_v14 = vadd.f32 %v5633_v58, %v4166_v21  ;;  %v5524_v47 = vadd.f32 %v5523_v13, %v5522_v1  ;;  %v5636_v27 = vadd.f32 %v5635_v28, %v5634_v62 }
 0x464   : > { %v5525_v8 = vpop.f32.mrf.mxu0  ;;  %v5637_v15 = vpop.f32.mrf.mxu1 }
 0x465   : > { %v4409_v36 = vmax.f32 %v4327_v14, 0.0  ;;  %v4171_v5 = vadd.f32 %v5524_v47, %v8022_v50 }
 0x466   : > { %v5526_v20 = vpop.f32.mrf.mxu0  ;;  %v5638_v6 = vpop.f32.mrf.mxu1 }
 0x467   : > { %v4433_v42 = vpack.c.bf16 %v4409_v36, %v4408_v12  ;;  %v5527_v19 = vadd.f32 %v5526_v20, %v5525_v8  ;;  %v4332_v33 = vadd.f32 %v5636_v27, %v4171_v5  ;;  %v5639_v25 = vadd.f32 %v5638_v6, %v5637_v15 }
 0x468   : > { %v5528_v23 = vpop.f32.mrf.mxu0  ;;  %v5640_v31 = vpop.f32.mrf.mxu1 }
 0x469   : > { %v4174_v34 = vadd.f32 %v5527_v19, %v8025_v54  ;;  %5789 = vmatmul.mubr.bf16.gmra.mxu0 %v4433_v42  ;;  %v4410_v52 = vmax.f32 %v4332_v33, 0.0 }
 0x46a   : > { %v5529_v17 = vpop.f32.mrf.mxu0  ;;  %v5641_v30 = vpop.f32.mrf.mxu1 }
 0x46b   : > { %v4335_v41 = vadd.f32 %v5639_v25, %v4174_v34  ;;  %v5530_v59 = vadd.f32 %v5529_v17, %v5528_v23  ;;  %v5642_v18 = vadd.f32 %v5641_v30, %v5640_v31 }
 0x46c   : > { %v5531_v10 = vpop.f32.mrf.mxu0  ;;  %v5643_v22 = vpop.f32.mrf.mxu1 }
 0x46d   : > { %v4411_v50 = vmax.f32 %v4335_v41, 0.0  ;;  %v4179_v55 = vadd.f32 %v5530_v59, %v8028_v3 }
 0x46e   : > { %v5532_v46 = vpop.f32.mrf.mxu0  ;;  %v5644_v24 = vpop.f32.mrf.mxu1 }
 0x46f   : > { %v5533_v37 = vadd.f32 %v5532_v46, %v5531_v10  ;;  %v4434_v11 = vpack.c.bf16 %v4411_v50, %v4410_v52  ;;  %v4340_v54 = vadd.f32 %v5642_v18, %v4179_v55  ;;  %v5645_v26 = vadd.f32 %v5644_v24, %v5643_v22 }
 0x470   : > { %v5534_v44 = vpop.f32.mrf.mxu0  ;;  %v5646_v53 = vpop.f32.mrf.mxu1 }
 0x471   : > { %v4182_v7 = vadd.f32 %v5533_v37, %v8031_v9  ;;  %5792 = vmatprep.mubr.bf16.mxu0 %v4434_v11  ;;  %v4412_v0 = vmax.f32 %v4340_v54, 0.0 }
 0x472   : > { %v5535_v32 = vpop.f32.mrf.mxu0  ;;  %v5647_v51 = vpop.f32.mrf.mxu1 }
 0x473   : > { %v4343_v38 = vadd.f32 %v5645_v26, %v4182_v7  ;;  %v5536_v57 = vadd.f32 %v5535_v32, %v5534_v44  ;;  %v5648_v58 = vadd.f32 %v5647_v51, %v5646_v53 }
 0x474   : > { %v5537_v43 = vpop.f32.mrf.mxu0  ;;  %v5649_v4 = vpop.f32.mrf.mxu1 }
 0x475   : > { %v4413_v3 = vmax.f32 %v4343_v38, 0.0  ;;  %v4187_v1 = vadd.f32 %v5536_v57, %v8034_v60 }
 0x476   : > { %v5538_v62 = vpop.f32.mrf.mxu0  ;;  %v5650_v61 = vpop.f32.mrf.mxu1 }
 0x477   : > { %v4435_v21 = vpack.c.bf16 %v4413_v3, %v4412_v0  ;;  %v5539_v13 = vadd.f32 %v5538_v62, %v5537_v43  ;;  %v4348_v9 = vadd.f32 %v5648_v58, %v4187_v1  ;;  %v5651_v8 = vadd.f32 %v5650_v61, %v5649_v4 }
 0x478   : > { %v5540_v28 = vpop.f32.mrf.mxu0  ;;  %v5652_v14 = vpop.f32.mrf.mxu1 }
 0x479   : > { %v4190_v47 = vadd.f32 %v5539_v13, %v8037_v29  ;;  %5793 = vmatmul.mubr.bf16.gmra.mxu0 %v4435_v21  ;;  %v4414_v42 = vmax.f32 %v4348_v9, 0.0 }
 0x47a   : > { %v5541_v15 = vpop.f32.mrf.mxu0  ;;  %v5653_v12 = vpop.f32.mrf.mxu1 }
 0x47b   : > { %v4351_v36 = vadd.f32 %v5651_v8, %v4190_v47  ;;  %v5542_v5 = vadd.f32 %v5541_v15, %v5540_v28  ;;  %v5654_v31 = vadd.f32 %v5653_v12, %v5652_v14 }
 0x47c   : > { %v5543_v20 = vpop.f32.mrf.mxu0  ;;  %v5655_v6 = vpop.f32.mrf.mxu1 }
 0x47d   : > { %v4415_v60 = vmax.f32 %v4351_v36, 0.0  ;;  %v4195_v27 = vadd.f32 %v5542_v5, %v8040_v35 }
 0x47e   : > { %v5544_v19 = vpop.f32.mrf.mxu0  ;;  %v5656_v23 = vpop.f32.mrf.mxu1 }
 0x47f   : > { %v5545_v33 = vadd.f32 %v5544_v19, %v5543_v20  ;;  %v4436_v34 = vpack.c.bf16 %v4415_v60, %v4414_v42  ;;  %v4356_v29 = vadd.f32 %v5654_v31, %v4195_v27  ;;  %v5657_v41 = vadd.f32 %v5656_v23, %v5655_v6 }
 0x480   : > { %v5546_v25 = vpop.f32.mrf.mxu0  ;;  %v5658_v17 = vpop.f32.mrf.mxu1 }
 0x481   : > { %v4198_v30 = vadd.f32 %v5545_v33, %v8043_v45  ;;  %5796 = vmatprep.mubr.bf16.mxu0 %v4436_v34  ;;  %v4416_v46 = vmax.f32 %v4356_v29, 0.0 }
 0x482   : > { %v5547_v59 = vpop.f32.mrf.mxu0  ;;  %v5659_v10 = vpop.f32.mrf.mxu1 }
 0x483   : > { %v4359_v22 = vadd.f32 %v5657_v41, %v4198_v30  ;;  %v5548_v52 = vadd.f32 %v5547_v59, %v5546_v25  ;;  %v5660_v44 = vadd.f32 %v5659_v10, %v5658_v17 }
 0x484   : > { %v5549_v50 = vpop.f32.mrf.mxu0  ;;  %v5661_v55 = vpop.f32.mrf.mxu1 }
 0x485   : > { %v4417_v35 = vmax.f32 %v4359_v22, 0.0  ;;  %v4203_v24 = vadd.f32 %v5548_v52, %v8046_v63 }
 0x486   : > { %v5550_v18 = vpop.f32.mrf.mxu0  ;;  %v5662_v37 = vpop.f32.mrf.mxu1 }
 0x487   : > { %v4437_v11 = vpack.c.bf16 %v4417_v35, %v4416_v46  ;;  %v5551_v53 = vadd.f32 %v5550_v18, %v5549_v50  ;;  %v4364_v45 = vadd.f32 %v5660_v44, %v4203_v24  ;;  %v5663_v32 = vadd.f32 %v5662_v37, %v5661_v55 }
 0x488   : > { %v5552_v54 = vpop.f32.mrf.mxu0  ;;  %v5664_v7 = vpop.f32.mrf.mxu1 }
 0x489   : > { %v4206_v26 = vadd.f32 %v5551_v53, %v8049_v2  ;;  %5797 = vmatmul.mubr.bf16.gmra.mxu0 %v4437_v11  ;;  %v4418_v3 = vmax.f32 %v4364_v45, 0.0 }
 0x48a   : > { %v5553_v51 = vpop.f32.mrf.mxu0  ;;  %v5665_v38 = vpop.f32.mrf.mxu1 }
 0x48b   : > { %v4367_v57 = vadd.f32 %v5663_v32, %v4206_v26  ;;  %v5554_v43 = vadd.f32 %v5553_v51, %v5552_v54  ;;  %v5666_v21 = vadd.f32 %v5665_v38, %v5664_v7 }
 0x48c   : > { %v5555_v4 = vpop.f32.mrf.mxu0  ;;  %v5667_v0 = vpop.f32.mrf.mxu1 }
 0x48d   : > { %v4419_v63 = vmax.f32 %v4367_v57, 0.0  ;;  %v4211_v1 = vadd.f32 %v5554_v43, %v8052_v48 }
 0x48e   : > { %v5556_v62 = vpop.f32.mrf.mxu0  ;;  %v5668_v61 = vpop.f32.mrf.mxu1 }
 0x48f   : > { %v5557_v58 = vadd.f32 %v5556_v62, %v5555_v4  ;;  %v4438_v13 = vpack.c.bf16 %v4419_v63, %v4418_v3  ;;  %v4372_v2 = vadd.f32 %v5666_v21, %v4211_v1  ;;  %v5669_v47 = vadd.f32 %v5668_v61, %v5667_v0 }
 0x490   : > { %v5558_v28 = vpop.f32.mrf.mxu0  ;;  %v5670_v14 = vpop.f32.mrf.mxu1 }
 0x491   : > { %v4214_v9 = vadd.f32 %v5557_v58, %v8055_v40  ;;  %5800 = vmatprep.mubr.bf16.mxu0 %v4438_v13  ;;  %v4420_v6 = vmax.f32 %v4372_v2, 0.0 }
 0x492   : > { %v5559_v8 = vpop.f32.mrf.mxu0  ;;  %v5671_v15 = vpop.f32.mrf.mxu1 }
 0x493   : > { %v4375_v12 = vadd.f32 %v5669_v47, %v4214_v9  ;;  %v5560_v36 = vadd.f32 %v5559_v8, %v5558_v28  ;;  %v5672_v23 = vadd.f32 %v5671_v15, %v5670_v14 }
 0x494   : > { %v5561_v5 = vpop.f32.mrf.mxu0  ;;  %v5673_v20 = vpop.f32.mrf.mxu1 }
 0x495   : > { %v4421_v48 = vmax.f32 %v4375_v12, 0.0  ;;  %v4219_v42 = vadd.f32 %v5560_v36, %v8058_v39 }
 0x496   : > { %v5562_v60 = vpop.f32.mrf.mxu0  ;;  %v5674_v27 = vpop.f32.mrf.mxu1 }
 0x497   : > { %v4439_v19 = vpack.c.bf16 %v4421_v48, %v4420_v6  ;;  %v5563_v31 = vadd.f32 %v5562_v60, %v5561_v5  ;;  %v4380_v40 = vadd.f32 %v5672_v23, %v4219_v42  ;;  %v5675_v17 = vadd.f32 %v5674_v27, %v5673_v20  ;;  %v8131_v27 = vld [vmem:[%s8244_s11] sm:$0x1] }
 0x498   : > { %v5564_v33 = vpop.f32.mrf.mxu0  ;;  %v5676_v34 = vpop.f32.mrf.mxu1 }
 0x499   : > { %v4222_v25 = vadd.f32 %v5563_v31, %v8061_v49  ;;  %5801 = vmatmul.mubr.bf16.gmra.mxu0 %v4439_v19  ;;  %v4422_v52 = vmax.f32 %v4380_v40, 0.0  ;;  %v4723_v31 = vld [vmem:[#allocation2] sm:$0x1] }
 0x49a   : > { %v5565_v29 = vpop.f32.mrf.mxu0  ;;  %v5677_v30 = vpop.f32.mrf.mxu1  ;;  %4726 = vperm.xlu0 %5882, %v4723_v31  }
 0x49b   : > { %v4383_v41 = vadd.f32 %v5675_v17, %v4222_v25  ;;  %v5566_v59 = vadd.f32 %v5565_v29, %v5564_v33  ;;  %v5678_v35 = vadd.f32 %v5677_v30, %v5676_v34 }
 0x49c   : > { %v5567_v10 = vpop.f32.mrf.mxu0  ;;  %v5679_v22 = vpop.f32.mrf.mxu1 }
 0x49d   : > { %v4423_v39 = vmax.f32 %v4383_v41, 0.0  ;;  %v4227_v50 = vadd.f32 %v5566_v59, %v8064_v56  ;;  %v8104_v56 = vld [vmem:[%s8243_s10] ss:$0 sm:$0xff] }
 0x49e   : > { %v5568_v55 = vpop.f32.mrf.mxu0  ;;  %v5680_v46 = vpop.f32.mrf.mxu1 }
 0x49f   : > { %v5569_v24 = vadd.f32 %v5568_v55, %v5567_v10  ;;  %v4440_v18 = vpack.c.bf16 %v4423_v39, %v4422_v52  ;;  %v4388_v37 = vadd.f32 %v5678_v35, %v4227_v50  ;;  %v5681_v11 = vadd.f32 %v5680_v46, %v5679_v22 }
 0x4a1   : > { %v4230_v49 = vadd.f32 %v5569_v24, %v8067_v16  ;;  %5804 = vmatprep.mubr.bf16.mxu0 %v4440_v18  ;;  %v4424_v53 = vmax.f32 %v4388_v37, 0.0 }
 0x4a3   : > { %v4391_v44 = vadd.f32 %v5681_v11, %v4230_v49 }
 0x4a5   : > { %v4425_v54 = vmax.f32 %v4391_v44, 0.0 }
 0x4a7   : > { %v4441_v7 = vpack.c.bf16 %v4425_v54, %v4424_v53 }
 0x4a9   : > { %5805 = vmatmul.mubr.bf16.gmra.mxu0 %v4441_v7 }
 0x4aa   : > { %5722 = vmatprep.mubr.msk.bf16.mxu0 %vm4733_vm1, %v8131_v27 }
 0x4f9   : > { %v5778_v45 = vpop.f32.mrf.mxu0 }
 0x4fa   : > { %v4556_v32 = vadd.f32 %v5778_v45, %v8104_v56 }
 0x4fb   : > { %v4547_v26 = vpop.f32.mrf.mxu0 }
 0x4fc   : > { %v4548_v38 = vadd.f32 %v8104_v56, %v4547_v26  ;;  %v4676_v43 = vmax.f32 %v4556_v32, 0.0 }
 0x4fd   : > { %v5779_v51 = vpop.f32.mrf.mxu0 }
 0x4fe   : > { %v4559_v16 = vadd.f32 %v5779_v51, %v8104_v56  ;;  %v4674_v3 = vmax.f32 %v4548_v38, 0.0 }
 0x4ff   : > { %v4550_v57 = vpop.f32.mrf.mxu0 }
 0x500   : > { %v4677_v4 = vmax.f32 %v4559_v16, 0.0  ;;  %v4551_v0 = vadd.f32 %v8104_v56, %v4550_v57 }
 0x502   : > { %v8110_v63 = vpack.c.bf16 %v4677_v4, %v4676_v43  ;;  %v4675_v1 = vmax.f32 %v4551_v0, 0.0 }
 0x504   : > { %v8112_v62 = vpack.c.bf16 %v4675_v1, %v4674_v3 }
 0x509   : > { %v5782_v61 = vpop.f32.mrf.mxu0 }
 0x50a   : > { %v4572_v58 = vadd.f32 %v5782_v61, %v8104_v56 }
 0x50b   : > { %v4563_v21 = vpop.f32.mrf.mxu0 }
 0x50c   : > { %v4564_v28 = vadd.f32 %v8104_v56, %v4563_v21  ;;  %v4680_v9 = vmax.f32 %v4572_v58, 0.0 }
 0x50d   : > { %v5783_v13 = vpop.f32.mrf.mxu0 }
 0x50e   : > { %v4575_v14 = vadd.f32 %v5783_v13, %v8104_v56  ;;  %v4678_v15 = vmax.f32 %v4564_v28, 0.0 }
 0x50f   : > { %v4566_v2 = vpop.f32.mrf.mxu0 }
 0x510   : > { %v4681_v47 = vmax.f32 %v4575_v14, 0.0  ;;  %v4567_v8 = vadd.f32 %v8104_v56, %v4566_v2 }
 0x512   : > { %v8118_v12 = vpack.c.bf16 %v4681_v47, %v4680_v9  ;;  %v4679_v36 = vmax.f32 %v4567_v8, 0.0 }
 0x514   : > { %v8120_v5 = vpack.c.bf16 %v4679_v36, %v4678_v15 }
 0x519   : > { %v8122_v20 = vpop.f32.mrf.mxu0 }
 0x51b   : > { %v8124_v6 = vpop.f32.mrf.mxu0 }
 0x51d   : > { %v5787_v48 = vpop.f32.mrf.mxu0 }
 0x51e   : > { %v4591_v36 = vadd.f32 %v5787_v48, %v8104_v56 }
 0x51f   : > { %v8126_v42 = vpop.f32.mrf.mxu0 }
 0x520   : > { %v4583_v48 = vadd.f32 %v8104_v56, %v8126_v42 }
 0x529   : > { %v5790_v60 = vpop.f32.mrf.mxu0 }
 0x52a   : > { %v4604_v7 = vadd.f32 %v5790_v60, %v8104_v56 }
 0x52b   : > { %v4595_v19 = vpop.f32.mrf.mxu0 }
 0x52c   : > { %v4688_v38 = vmax.f32 %v4604_v7, 0.0  ;;  %v4596_v21 = vadd.f32 %v8104_v56, %v4595_v19 }
 0x52d   : > { %v5791_v23 = vpop.f32.mrf.mxu0 }
 0x52e   : > { %v4607_v53 = vadd.f32 %v5791_v23, %v8104_v56  ;;  %v4686_v8 = vmax.f32 %v4596_v21, 0.0  ;;  %v4588_v23 = vadd.f32 %v8122_v20, %v8104_v56  ;;  %v4580_v20 = vadd.f32 %v8104_v56, %v8124_v6 }
 0x52f   : > { %v4598_v33 = vpop.f32.mrf.mxu0 }
 0x530   : > { %v4689_v26 = vmax.f32 %v4607_v53, 0.0  ;;  %v4599_v43 = vadd.f32 %v8104_v56, %v4598_v33  ;;  %v4685_v33 = vmax.f32 %v4591_v36, 0.0 }
 0x532   : > { %v4713_v0 = vpack.c.bf16 %v4689_v26, %v4688_v38  ;;  %v4687_v14 = vmax.f32 %v4599_v43, 0.0  ;;  %v4747_v26 = vsel %vm4733_vm1, %v8118_v12, 0  ;;  %v4738_v12 = vsel %vm4733_vm1, %v8112_v62, 0  ;;  %v8365_v43 = vld [vmem:[#allocation16_spill] sm:$0xff] }
 0x534   : > { %v4759_v47 = vsel %vm4733_vm1, %v4713_v0, 0  ;;  %v4712_v60 = vpack.c.bf16 %v4687_v14, %v4686_v8 }
 0x539   : > { %v5794_v34 = vpop.f32.mrf.mxu0 }
 0x53a   : > { %v4620_v25 = vadd.f32 %v5794_v34, %v8104_v56 }
 0x53b   : > { %v4611_v40 = vpop.f32.mrf.mxu0 }
 0x53c   : > { %v4612_v29 = vadd.f32 %v8104_v56, %v4611_v40  ;;  %v4692_v59 = vmax.f32 %v4620_v25, 0.0  ;;  %v4756_v25 = vsel %vm4733_vm1, %v4712_v60, 0 }
 0x53d   : > { %v5795_v17 = vpop.f32.mrf.mxu0 }
 0x53e   : > { %v4623_v30 = vadd.f32 %v5795_v17, %v8104_v56  ;;  %v4690_v52 = vmax.f32 %v4612_v29, 0.0  ;;  %v4684_v17 = vmax.f32 %v4588_v23, 0.0 }
 0x53f   : > { %v4614_v41 = vpop.f32.mrf.mxu0 }
 0x540   : > { %v4693_v10 = vmax.f32 %v4623_v30, 0.0  ;;  %v4615_v22 = vadd.f32 %v8104_v56, %v4614_v41  ;;  %v4711_v30 = vpack.c.bf16 %v4685_v33, %v4684_v17 }
 0x542   : > { %v8139_v39 = vpack.c.bf16 %v4693_v10, %v4692_v59  ;;  %v4691_v50 = vmax.f32 %v4615_v22, 0.0  ;;  %v4683_v10 = vmax.f32 %v4583_v48, 0.0 }
 0x544   : > { %v8141_v55 = vpack.c.bf16 %v4691_v50, %v4690_v52  ;;  %v4753_v50 = vsel %vm4733_vm1, %v4711_v30, 0 }
 0x549   : > { %v5798_v46 = vpop.f32.mrf.mxu0 }
 0x54b   : > { %v8143_v35 = vpop.f32.mrf.mxu0 }
 0x54d   : > { %v5799_v24 = vpop.f32.mrf.mxu0 }
 0x54e   : > { %v4639_v22 = vadd.f32 %v5799_v24, %v8104_v56  ;;  %v4628_v24 = vadd.f32 %v8104_v56, %v8143_v35  ;;  %v6127_v35 = vmov 1966171168  }
 0x54f   : > { %v8145_v18 = vpop.f32.mrf.mxu0 }
 0x550   : > { %v4631_v6 = vadd.f32 %v8104_v56, %v8145_v18  ;;  %v4744_v18 = vsel %vm4733_vm1, %v8120_v5, 0  ;;  %v4830_v5 = vunpack.c.l.s4 %v6127_v35 }
 0x552   : > { %v4695_v7 = vmax.f32 %v4631_v6, 0.0  ;;  %v4831_v38 = vunpack.c.0.s8 %v4830_v5 }
 0x554   : > { %v4834_v62 = vsub.s32 %v4831_v38, %v8365_v43 }
 0x559   : > { %v5802_v37 = vpop.f32.mrf.mxu0 }
 0x55a   : > { %v4652_v15 = vadd.f32 %v5802_v37, %v8104_v56  ;;  %v4682_v37 = vmax.f32 %v4580_v20, 0.0 }
 0x55b   : > { %v4643_v49 = vpop.f32.mrf.mxu0 }
 0x55c   : > { %v4700_v31 = vmax.f32 %v4652_v15, 0.0  ;;  %v4644_v29 = vadd.f32 %v8104_v56, %v4643_v49  ;;  %v4636_v49 = vadd.f32 %v5798_v46, %v8104_v56 }
 0x55d   : > { %v5803_v11 = vpop.f32.mrf.mxu0 }
 0x55e   : > { %v4655_v2 = vadd.f32 %v5803_v11, %v8104_v56  ;;  %v4698_v59 = vmax.f32 %v4644_v29, 0.0  ;;  %v4710_v11 = vpack.c.bf16 %v4683_v10, %v4682_v37  ;;  %v4696_v42 = vmax.f32 %v4636_v49, 0.0 }
 0x55f   : > { %v4646_v44 = vpop.f32.mrf.mxu0 }
 0x560   : > { %v4701_v19 = vmax.f32 %v4655_v2, 0.0  ;;  %v4647_v40 = vadd.f32 %v8104_v56, %v4646_v44  ;;  %v4697_v44 = vmax.f32 %v4639_v22, 0.0 }
 0x562   : > { %v4719_v34 = vpack.c.bf16 %v4701_v19, %v4700_v31  ;;  %v4699_v41 = vmax.f32 %v4647_v40, 0.0  ;;  %v4717_v53 = vpack.c.bf16 %v4697_v44, %v4696_v42 }
 0x564   : > { %v4718_v52 = vpack.c.bf16 %v4699_v41, %v4698_v59 }
 0x569   : > { %v5806_v54 = vpop.f32.mrf.mxu0 }
 0x56a   : > { %v4668_v32 = vadd.f32 %v5806_v54, %v8104_v56  ;;  %v4750_v54 = vsel %vm4733_vm1, %v4710_v11, 0 }
 0x56b   : > { %v4659_v45 = vpop.f32.mrf.mxu0 }
 0x56c   : > { %v4660_v16 = vadd.f32 %v8104_v56, %v4659_v45  ;;  %v4704_v3 = vmax.f32 %v4668_v32, 0.0  ;;  %v4694_v45 = vmax.f32 %v4628_v24, 0.0  ;;  %v4727_v32 = vpop.permute.xlu0 %4726 }
 0x56d   : > { %v5807_v51 = vpop.f32.mrf.mxu0 }
 0x56e   : > { %v4671_v57 = vadd.f32 %v5807_v51, %v8104_v56  ;;  %v4702_v58 = vmax.f32 %v4660_v16, 0.0  ;;  %v4716_v46 = vpack.c.bf16 %v4695_v7, %v4694_v45  ;;  %v8364_v51 = vld [vmem:[#allocation17_spill] sm:$0xff] }
 0x56f   : > { %v4662_v4 = vpop.f32.mrf.mxu0 }
 0x570   : > { %v4705_v1 = vmax.f32 %v4671_v57, 0.0  ;;  %v4663_v61 = vadd.f32 %v8104_v56, %v4662_v4  ;;  %v4741_v56 = vsel %vm4733_vm1, %v8110_v63, 0 }
 0x572   : > { %v4721_v13 = vpack.c.bf16 %v4705_v1, %v4704_v3  ;;  %v4703_v28 = vmax.f32 %v4663_v61, 0.0  ;;  %v8366_v1 = vlaneseq }
 0x574   : > { %v4720_v9 = vpack.c.bf16 %v4703_v28, %v4702_v58  ;;  %5808 = vmatprep.subr.msk.bf16.mxu0 %vm4733_vm1, %v4721_v13  ;;  %vm4846_vm2 = vcmp.lt.s32.totalorder %v8366_v1, 256 }
 0x575   : > { %5707 = vmatpush3.bf16.xpose.msra.mxu0 %v4759_v47 }
 0x576   : > { %5809 = vmatprep.subr.msk.bf16.mxu0 %vm4733_vm1, %v4720_v9 }
 0x57d   : > { %5709 = vmatpush3.bf16.xpose.msra.mxu0 %v4756_v25 }
 0x57e   : > { %5810 = vmatprep.subr.msk.bf16.mxu0 %vm4733_vm1, %v4719_v34 }
 0x585   : > { %5711 = vmatpush3.bf16.xpose.msra.mxu0 %v4753_v50 }
 0x586   : > { %5811 = vmatprep.subr.msk.bf16.mxu0 %vm4733_vm1, %v4718_v52 }
 0x58d   : > { %5713 = vmatpush3.bf16.xpose.msra.mxu0 %v4750_v54 }
 0x58e   : > { %5812 = vmatprep.subr.msk.bf16.mxu0 %vm4733_vm1, %v4717_v53 }
 0x595   : > { %5715 = vmatpush3.bf16.xpose.msra.mxu0 %v4747_v26 }
 0x596   : > { %5813 = vmatprep.subr.msk.bf16.mxu0 %vm4733_vm1, %v4716_v46 }
 0x59d   : > { %5717 = vmatpush3.bf16.xpose.msra.mxu0 %v4744_v18 }
 0x59e   : > { %5814 = vmatprep.subr.msk.bf16.mxu0 %vm4733_vm1, %v8139_v39  ;;  %v4732_v39 = vrot.slane %v4727_v32, %v8364_v51 }
 0x5a5   : > { %5719 = vmatpush3.bf16.xpose.msra.mxu0 %v4741_v56 }
 0x5a6   : > { %5815 = vmatprep.subr.msk.bf16.mxu0 %vm4733_vm1, %v8141_v55 }
 0x5ad   : > { %5721 = vmatpush3.bf16.xpose.msra.mxu0 %v4738_v12 }
 0x5b4   : > { %5723 = vmatmul.mubr.msk.bf16.vlgmr.msra.gmra.mxu0 %vm4733_vm1, %v8131_v27 }
 0x674   : > { %v4819_v63 = vpop.f32.mrf.mxu0 }
 0x675   : > { %v4820_v57 = vadd.f32 %v4819_v63, %v4732_v39 }
 0x676   : > { %v4821_v16 = vpop.f32.mrf.mxu0 }
 0x677   : > { %v4822_v55 = vadd.f32 %v4821_v16, %v4732_v39 }
 0x678   : > { %v4823_v4 = vpop.f32.mrf.mxu0 }
 0x679   : > { %v4828_v0 = vcombine.low %v4820_v57, %v4822_v55 }
 0x67a   : > { %v4824_v3 = vpop.f32.mrf.mxu0 }
 0x67b   : > { %v4835_v27 = vrot.slane %v4828_v0, %v4834_v62 }
 0x67d   : > { %v4842_v61 = vrot.slane %v4835_v27, %v4834_v62 }
 0x67f   : > { %4848 = vst.msk [vmem:[%s466_s29] sm:$0x3] %vm4846_vm2, %v4842_v61 }
 0x680   : > { %6063 = shalt.err (!%p6060_p3)
}
 0x681   : > { %s6064_s22 = scalar_lea.hbm %s4862_s23, 32  ;;  %s6068_s14 = scalar_lea.hbm %s8246_s13, 64 }
 0x682   : > { %p6065_p2 = scmp.ne.s32.totalorder %s4862_s23, %s6064_s22  ;;  %p6069_p6 = scmp.lt.s32.totalorder %s4862_s23, %s8246_s13 }
 0x683   : > { %p6070_p9 = scmp.lt.s32.totalorder %s6068_s14, %s6064_s22 }
 0x684   : > { %p6066_p4 = pnand %p6065_p2, %p6240_p5 }
 0x685   : > { %p6071_p12 = por %p6070_p9, %p6069_p6 }
 0x686   : > { %p6067_p13 = pneg %p6066_p4 }
 0x688   : > { %p6072_p10 = pnand %p6071_p12, %p6067_p13 }
 0x68a   : > { %6075 = shalt.err (!%p6072_p10)
}
 0x68b   : > { %5824 = dma.vmem_to_hbm [thread:$0]  (%p6240_p5), %s4865_s15, 32, %s4862_s23, %s4850_s24  }
 0x68c PF: > { %s8367_s21 = sld [smem:[#allocation15_spill]]  ;;  %p5841_p7 = scmp.ge.s32.totalorder %s6118_s30, 2 }
 0x68d   : > { %s4876_s26 = sand.u32 1, %s6106_s27  }
 0x68e   : > { %s4877_s12 = scalar_lea.sflag [#allocation5], %s4876_s26 }
 0x692   : > { %p8368_p8 = scmp.ne.s32.totalorder %s8367_s21, 0 }
 0x694   : > { %p5834_p11 = pnand %p5841_p7, %p8368_p8 }
 0x696   : > { %p5835_p0 = pneg %p5834_p11 }
 0x698   : > { %6101 = dma.done.wait (%p5835_p0), %s4877_s12, 32  }
 0x699   : > { %6103 = vsyncadd (%p5835_p0), %s4877_s12, 4294967264  ;;  %s8369_s30 = sld [smem:[#allocation13_spill]]  ;;  %s8372_s27 = smov %s6110_s28 }
 0x69a   : > { %s8370_s16 = sld [smem:[#allocation12_spill]] }
 0x69b   : > { %s8371_s29 = sld [smem:[#allocation14_spill]] }
 0x69f   : > { %p27_p1 = scmp.ge.s32.totalorder %s8369_s30, 4  }
 0x6a0   : > { %s8373_s28 = smov %s8370_s16 }
 0x6a1   :  { %29 = sbr.rel (!%p27_p1) target bundleno = 8 (0x8), region = 116 }
 0x6a6   :  { %4882 = vsyncpa [#allocation4], 1 }
 0x6a7   :  { %4884 = vsyncpa [#allocation4 + $0x1], 1 }
 0x6a8   :  { %4885 = vsyncpa [#allocation7], 1 }
 0x6a9   :  { %4886 = vsyncpa [#allocation5], 1 }
 0x6aa   :  { %4888 = vsyncpa [#allocation5 + $0x1], 1 }

</bundles_post_ra>
